<compile_context>
chip_gen: v7x
topology: tpu7x:2x2x1
jax: 0.10.0
libtpu: 0.0.40
codegen_flags: <defaults>
</compile_context>

<pallas_src>
import numpy as np
import jax
import jax.numpy as jnp
from jax.experimental import pallas as pl
from jax.experimental.pallas import tpu as pltpu


_TB_MAX = 256  # max images per grid step (~12 MiB/step in VMEM at bf16) -- fits v5e/v6e/v7x.

_CPARAMS = pltpu.CompilerParams(
    dimension_semantics=("parallel",),          # independent batch tiles; shards v7x megacores
    vmem_limit_bytes=32 * 1024 * 1024,          # > v5e's 16 MiB default, < v7x's 64 MiB physical
)


def _tile_batch(batch):
    """Pick (padded_batch, images_per_tile). Multiples of 16 keep bf16 sublane tiling happy."""
    b16 = ((batch + 15) // 16) * 16
    if b16 <= _TB_MAX:
        return b16, b16
    # For v7x (2 TensorCores) large batches give grid >= 2 so "parallel" actually shards cores.
    tb = _TB_MAX
    b_pad = ((batch + tb - 1) // tb) * tb
    return b_pad, tb


# ----------------------------- Pallas kernels -----------------------------

def _stage1_kernel(x_ref, w_ref, b_ref, o_ref):
    """conv1 (banded matmul, band axis folded into K) + bias + 2x2 maxpool + ReLU.

    x_ref: (TB*12, 168) bf16   rows = (image, pooled_out_row), K = band_row*28 + in_col
    w_ref: (168, 512)   bf16   cols = (dh, dw) blocks of 128 = pooled_out_col*10 + channel (+pad)
    b_ref: (1, 128)     f32
    o_ref: (TB*12, 128) bf16   lane-dense pooled+ReLU output
    """
    c = o_ref.shape[-1]                                             # 128
    acc = jnp.dot(x_ref[...], w_ref[...], preferred_element_type=jnp.float32)
    m = jnp.maximum(jnp.maximum(acc[:, 0:c], acc[:, c:2 * c]),
                    jnp.maximum(acc[:, 2 * c:3 * c], acc[:, 3 * c:4 * c]))
    o_ref[...] = jnp.maximum(m + b_ref[...], 0.0).astype(o_ref.dtype)


def _stage2_fc_kernel(x_ref, w2_ref, b2_ref, w3_ref, b3_ref, w4_ref, b4_ref, o_ref):
    """conv2 + bias + 2x2 maxpool + ReLU + fc1 + ReLU + fc2 + LogSoftmax, fused.

    x_ref : (4, TB, 768) bf16  slab oh holds each image's banded stage-1 rows for pooled row oh
    w2_ref: (768, 512)   bf16  banded conv2 weights, 4 x 128-lane (dh,dw) blocks (20ch padded to 32)
    b2_ref: (1, 128) f32
    w3_ref: (4, 128, 64) bf16  fc1 weights split per pooled row oh (50 cols padded to 64)
    b3_ref: (1, 64) f32
    w4_ref: (64, 128)    bf16  fc2 weights (10 logits padded to 128 lanes)
    b4_ref: (1, 128) f32
    o_ref : (TB, 128)    f32   log-probs in cols 0..9, padding lanes hold garbage (sliced off)
    """
    tb = x_ref.shape[1]
    c = b2_ref.shape[-1]                                            # 128
    fc1 = jnp.zeros((tb, w3_ref.shape[-1]), jnp.float32)
    for oh in range(x_ref.shape[0]):                                # 4 pooled rows, static unroll
        acc = jnp.dot(x_ref[oh], w2_ref[...], preferred_element_type=jnp.float32)
        m = jnp.maximum(jnp.maximum(acc[:, 0:c], acc[:, c:2 * c]),
                        jnp.maximum(acc[:, 2 * c:3 * c], acc[:, 3 * c:4 * c]))
        h = jnp.maximum(m + b2_ref[...], 0.0)                       # (TB, 128) pooled+ReLU row oh
        fc1 = fc1 + jnp.dot(h.astype(w3_ref.dtype), w3_ref[oh],
                            preferred_element_type=jnp.float32)
    f1 = jnp.maximum(fc1 + b3_ref[...], 0.0)
    # TODO(synk): training-mode Dropout2d / Dropout (RNG masking + scaling) not implemented
    #             (eval-mode identity, matching module.eval()).
    z = jnp.dot(f1.astype(w4_ref.dtype), w4_ref[...],
                preferred_element_type=jnp.float32) + b4_ref[...]
    zv = z[:, :10]                                                  # only the 10 real logits
    zmax = jnp.max(zv, axis=-1, keepdims=True)
    lse = zmax + jnp.log(jnp.sum(jnp.exp(zv - zmax), axis=-1, keepdims=True))
    o_ref[...] = (z - lse).astype(o_ref.dtype)


# ----------------------------- pallas_call wrappers -----------------------------

def _stage1_call(xb, w, b, tb):
    rows, k = xb.shape
    n = w.shape[-1]
    out_c = n // 4
    tile_rows = tb * 12
    grid = (rows // tile_rows,)
    flops = 2 * rows * k * n
    bytes_accessed = (xb.size * xb.dtype.itemsize + w.size * w.dtype.itemsize
                      + rows * out_c * xb.dtype.itemsize)
    return pl.pallas_call(
        _stage1_kernel,
        out_shape=jax.ShapeDtypeStruct((rows, out_c), xb.dtype),
        grid=grid,
        in_specs=[
            pl.BlockSpec((tile_rows, k), lambda i: (i, 0)),   # batch-tiled activations
            pl.BlockSpec(w.shape, lambda i: (0, 0)),          # VMEM-resident banded weights
            pl.BlockSpec(b.shape, lambda i: (0, 0)),          # VMEM-resident bias
        ],
        out_specs=pl.BlockSpec((tile_rows, out_c), lambda i: (i, 0)),
        compiler_params=_CPARAMS,
        cost_estimate=pl.CostEstimate(flops=int(flops), transcendentals=0,
                                      bytes_accessed=int(bytes_accessed)),
    )(xb, w, b)


def _stage2_fc_call(xb, w2b, b2t, w3p, b3p, w4p, b4p, tb):
    _, b_pad, k2 = xb.shape
    grid = (b_pad // tb,)
    flops = (2 * b_pad * 4 * k2 * w2b.shape[-1]
             + 2 * b_pad * 4 * w3p.shape[1] * w3p.shape[2]
             + 2 * b_pad * w4p.shape[0] * w4p.shape[1])
    bytes_accessed = (xb.size * xb.dtype.itemsize + w2b.size * w2b.dtype.itemsize
                      + w3p.size * w3p.dtype.itemsize + w4p.size * w4p.dtype.itemsize
                      + b_pad * 128 * 4)
    return pl.pallas_call(
        _stage2_fc_kernel,
        out_shape=jax.ShapeDtypeStruct((b_pad, 128), jnp.float32),
        grid=grid,
        in_specs=[
            pl.BlockSpec((4, tb, k2), lambda i: (0, i, 0)),   # batch-tiled banded activations
            pl.BlockSpec(w2b.shape, lambda i: (0, 0)),
            pl.BlockSpec(b2t.shape, lambda i: (0, 0)),
            pl.BlockSpec(w3p.shape, lambda i: (0, 0, 0)),
            pl.BlockSpec(b3p.shape, lambda i: (0, 0)),
            pl.BlockSpec(w4p.shape, lambda i: (0, 0)),
            pl.BlockSpec(b4p.shape, lambda i: (0, 0)),
        ],
        out_specs=pl.BlockSpec((tb, 128), lambda i: (i, 0)),
        compiler_params=_CPARAMS,
        cost_estimate=pl.CostEstimate(flops=int(flops), transcendentals=int(b_pad * 11),
                                      bytes_accessed=int(bytes_accessed)),
    )(xb, w2b, b2t, w3p, b3p, w4p, b4p)


# ----------------------------- one-time weight preprocessing (host side) -----------------------------

def _build_banded_numpy(params):
    """Build the banded / lane-padded weight matrices once, in numpy float32."""
    w1 = np.asarray(params["w1"], np.float32)   # (10, 1, 5, 5)
    b1 = np.asarray(params["b1"], np.float32)
    w2 = np.asarray(params["w2"], np.float32)   # (20, 10, 5, 5)
    b2 = np.asarray(params["b2"], np.float32)
    w3 = np.asarray(params["w3"], np.float32)   # (50, 320)
    b3 = np.asarray(params["b3"], np.float32)
    w4 = np.asarray(params["w4"], np.float32)   # (10, 50)
    b4 = np.asarray(params["b4"], np.float32)

    dh = np.arange(2)[:, None, None, None, None]
    dw = np.arange(2)[None, :, None, None, None]
    ki = np.arange(5)[None, None, None, :, None]
    kj = np.arange(5)[None, None, None, None, :]

    # stage 1: K = (dh+ki)*28 + (2*ow2+dw+kj);  N = (2*dh+dw)*128 + ow2*10 + c  (cols 120..127 pad)
    ow2 = np.arange(12)[None, None, :, None, None]
    rows1 = (dh + ki) * 28 + (2 * ow2 + dw + kj)
    cols1 = (2 * dh + dw) * 128 + ow2 * 10
    w1b = np.zeros((6 * 28, 4 * 128), np.float32)
    for c in range(10):
        w1b[rows1, cols1 + c] = w1[c, 0]
    b1t = np.zeros((1, 128), np.float32)
    b1t[0, :120] = np.tile(b1, 12)

    # stage 2: K = (dh+ki)*128 + (2*ow+dw+kj)*10 + ci;  N = (2*dh+dw)*128 + ow*32 + co (co 20..31 pad)
    ow = np.arange(4)[None, None, :, None, None]
    rows2 = (dh + ki) * 128 + (2 * ow + dw + kj) * 10
    cols2 = (2 * dh + dw) * 128 + ow * 32
    w2b = np.zeros((6 * 128, 4 * 128), np.float32)
    for co in range(20):
        for ci in range(10):
            w2b[rows2 + ci, cols2 + co] = w2[co, ci]
    b2t = np.zeros((1, 128), np.float32)
    b2t[0, :] = np.tile(np.pad(b2, (0, 12)), 4)

    # fc1: PyTorch flatten of (B,20,4,4) -> index co*16 + oh*4 + ow; our layout rows=oh, cols=ow*32+co
    w3r = w3.reshape(50, 20, 4, 4).transpose(2, 3, 1, 0)            # (oh, ow, co, j)
    w3p = np.zeros((4, 4, 32, 64), np.float32)
    w3p[:, :, :20, :50] = w3r
    w3p = w3p.reshape(4, 128, 64)
    b3p = np.zeros((1, 64), np.float32)
    b3p[0, :50] = b3

    # fc2: pad 10 logits -> 128 lanes (zero columns), 50 -> 64 contraction rows
    w4p = np.zeros((64, 128), np.float32)
    w4p[:50, :10] = w4.T
    b4p = np.zeros((1, 128), np.float32)
    b4p[0, :10] = b4

    return {"w1b": w1b, "b1t": b1t, "w2b": w2b, "b2t": b2t,
            "w3p": w3p, "b3p": b3p, "w4p": w4p, "b4p": b4p}


def prepare_params(params, compute_dtype=jnp.bfloat16):
    """One-time: band + pad the weights and move them to device in the compute dtype."""
    bnp = _build_banded_numpy(params)
    cd = compute_dtype
    return {
        "w1b": jnp.asarray(bnp["w1b"], cd), "b1t": jnp.asarray(bnp["b1t"], jnp.float32),
        "w2b": jnp.asarray(bnp["w2b"], cd), "b2t": jnp.asarray(bnp["b2t"], jnp.float32),
        "w3p": jnp.asarray(bnp["w3p"], cd), "b3p": jnp.asarray(bnp["b3p"], jnp.float32),
        "w4p": jnp.asarray(bnp["w4p"], cd), "b4p": jnp.asarray(bnp["b4p"], jnp.float32),
    }


# ----------------------------- forward pass -----------------------------

def lenet3_forward(prep, img):
    """img: NCHW (B, 1, 28, 28) float32 -> log-probabilities (B, 10)."""
    B = img.shape[0]
    b_pad, tb = _tile_batch(B)
    cdt = prep["w1b"].dtype
    x = img.reshape(B, 28, 28).astype(cdt)
    if b_pad != B:
        x = jnp.pad(x, ((0, b_pad - B), (0, 0), (0, 0)))

    # ---- stage 1: banded im2row (layout plumbing only) -> fused conv1+bias+pool+ReLU ----
    xb1 = jnp.stack([x[:, r:r + 23:2, :] for r in range(6)], axis=2)    # (b_pad, 12, 6, 28)
    xb1 = xb1.reshape(b_pad * 12, 6 * 28)
    h1 = _stage1_call(xb1, prep["w1b"], prep["b1t"], tb)                # (b_pad*12, 128)

    # ---- stage 2 + fc head: per pooled-row slabs, one fused kernel ----
    h1 = h1.reshape(b_pad, 12, 128)
    xb2 = jnp.stack([h1[:, 2 * oh:2 * oh + 6, :].reshape(b_pad, 6 * 128)
                     for oh in range(4)], axis=0)                       # (4, b_pad, 768)
    out = _stage2_fc_call(xb2, prep["w2b"], prep["b2t"], prep["w3p"], prep["b3p"],
                          prep["w4p"], prep["b4p"], tb)                 # (b_pad, 128) f32
    return out[:B, :10]


# ----------------------------- references for validation -----------------------------

def init_params(key):
    """Deterministic synthetic params, PyTorch-default-like uniform(-1/sqrt(fan_in), +)."""
    def uniform(k, shape, fan_in):
        bound = 1.0 / jnp.sqrt(jnp.float32(fan_in))
        return jax.random.uniform(k, shape, jnp.float32, -bound, bound)
    ks = jax.random.split(key, 8)
    return {
        "w1": uniform(ks[0], (10, 1, 5, 5), 1 * 5 * 5),   "b1": uniform(ks[1], (10,), 1 * 5 * 5),
        "w2": uniform(ks[2], (20, 10, 5, 5), 10 * 5 * 5), "b2": uniform(ks[3], (20,), 10 * 5 * 5),
        "w3": uniform(ks[4], (50, 320), 320),             "b3": uniform(ks[5], (50,), 320),
        "w4": uniform(ks[6], (10, 50), 50),               "b4": uniform(ks[7], (10,), 50),
    }


def lenet3_reference(params, img):
    """Pure-JAX f32 reference (HIGHEST matmul precision so it is a trustworthy baseline)."""
    prec = jax.lax.Precision.HIGHEST

    def conv(x, w, b):
        y = jax.lax.conv_general_dilated(
            x, w, (1, 1), "VALID", dimension_numbers=("NCHW", "OIHW", "NCHW"), precision=prec)
        return y + b[None, :, None, None]

    def pool(x):
        return jax.lax.reduce_window(x, -jnp.inf, jax.lax.max,
                                     (1, 1, 2, 2), (1, 1, 2, 2), "VALID")

    x = jnp.maximum(pool(conv(img, params["w1"], params["b1"])), 0.0)
    x = jnp.maximum(pool(conv(x, params["w2"], params["b2"])), 0.0)
    x = x.reshape(img.shape[0], -1)
    x = jnp.maximum(jnp.dot(x, params["w3"].T, precision=prec) + params["b3"], 0.0)
    x = jnp.dot(x, params["w4"].T, precision=prec) + params["b4"]
    return jax.nn.log_softmax(x, axis=1)


def _np_banded_forward(bnp, img):
    """float64 host mirror of the Pallas math -> validates the banded weight construction."""
    B = img.shape[0]
    x = np.asarray(img, np.float64).reshape(B, 28, 28)
    xb1 = np.stack([x[:, r:r + 23:2, :] for r in range(6)], axis=2).reshape(B * 12, 168)
    acc = xb1 @ bnp["w1b"].astype(np.float64)
    m = np.maximum(np.maximum(acc[:, 0:128], acc[:, 128:256]),
                   np.maximum(acc[:, 256:384], acc[:, 384:512]))
    h1 = np.maximum(m + bnp["b1t"].astype(np.float64), 0.0).reshape(B, 12, 128)
    fc1 = np.zeros((B, 64))
    for oh in range(4):
        xb2 = h1[:, 2 * oh:2 * oh + 6, :].reshape(B, 768)
        acc = xb2 @ bnp["w2b"].astype(np.float64)
        m = np.maximum(np.maximum(acc[:, 0:128], acc[:, 128:256]),
                       np.maximum(acc[:, 256:384], acc[:, 384:512]))
        h2 = np.maximum(m + bnp["b2t"].astype(np.float64), 0.0)
        fc1 += h2 @ bnp["w3p"][oh].astype(np.float64)
    f1 = np.maximum(fc1 + bnp["b3p"].astype(np.float64), 0.0)
    z = (f1 @ bnp["w4p"].astype(np.float64) + bnp["b4p"].astype(np.float64))[:, :10]
    zmax = z.max(axis=1, keepdims=True)
    return z - zmax - np.log(np.exp(z - zmax).sum(axis=1, keepdims=True))


if __name__ == "__main__":
    key = jax.random.PRNGKey(0)
    pkey, xkey = jax.random.split(key)
    params = init_params(pkey)
    img = jax.random.normal(xkey, (2, 1, 28, 28), jnp.float32)   # MNIST-sized (fc expects 320 feats)

    ref = np.asarray(jax.block_until_ready(lenet3_reference(params, img)))

    # 1) Tight host-side check of the banded/padded weight construction (float64, no TPU rounding).
    bnp = _build_banded_numpy(params)
    np_out = _np_banded_forward(bnp, np.asarray(img))
    band_err = float(np.max(np.abs(np_out - ref)))
    assert np.allclose(np_out, ref, atol=1e-4, rtol=1e-4), band_err

    # 2) TPU Pallas forward (bf16 activations/weights, f32 accumulation).
    prep = prepare_params(params, jnp.bfloat16)
    fwd = jax.jit(lenet3_forward)
    out = np.asarray(jax.block_until_ready(fwd(prep, img)))

    assert out.shape == (2, 10), out.shape
    assert np.all(np.isfinite(out))
    kern_err = float(np.max(np.abs(out - ref)))
    assert np.allclose(out, ref, atol=5e-2, rtol=5e-2), kern_err   # bf16-justified tolerance
    print("KERNEL_OK")
</pallas_src>

<mosaic_0001>
module attributes {stable_mosaic.version = 11 : i64} {
  func.func @_stage1_kernel(%arg0: i32, %arg1: memref<192x168xbf16, #tpu.memory_space<vmem>>, %arg2: memref<168x512xbf16, #tpu.memory_space<vmem>>, %arg3: memref<1x128xf32, #tpu.memory_space<vmem>>, %arg4: memref<192x128xbf16, #tpu.memory_space<vmem>>) attributes {dimension_semantics = [#tpu.dimension_semantics<parallel>], iteration_bounds = array<i64: 1>, scalar_prefetch = 0 : i64, scratch_operands = 0 : i64, tpu.core_type = #tpu.core_type<tc>, window_params = [{transform_indices = @transform_0, window_bounds = array<i64: 192, 168>}, {pipeline_mode = #tpu.pipeline_mode<synchronous>, transform_indices = @transform_1, window_bounds = array<i64: 168, 512>}, {pipeline_mode = #tpu.pipeline_mode<synchronous>, transform_indices = @transform_2, window_bounds = array<i64: 1, 128>}, {transform_indices = @transform_3, window_bounds = array<i64: 192, 128>}]} {
    %c0 = arith.constant 0 : index
    %c0_0 = arith.constant 0 : index
    %0 = vector.load %arg1[%c0, %c0_0] : memref<192x168xbf16, #tpu.memory_space<vmem>>, vector<192x168xbf16>
    %c0_1 = arith.constant 0 : index
    %c0_2 = arith.constant 0 : index
    %1 = vector.load %arg2[%c0_1, %c0_2] : memref<168x512xbf16, #tpu.memory_space<vmem>>, vector<168x512xbf16>
    %cst = arith.constant dense<0.000000e+00> : vector<192x512xf32>
    %2 = tpu.matmul %0, %1, %cst {dimension_numbers = #tpu.dot_dimension_numbers<[1], [0], [0], [1], [0, 0, 1, 1], [], []>} : vector<192x168xbf16>, vector<168x512xbf16>, vector<192x512xf32> -> vector<192x512xf32>
    %3 = vector.extract_strided_slice %2 {offsets = [0, 0], sizes = [192, 128], strides = [1, 1]} : vector<192x512xf32> to vector<192x128xf32>
    %4 = vector.extract_strided_slice %2 {offsets = [0, 128], sizes = [192, 128], strides = [1, 1]} : vector<192x512xf32> to vector<192x128xf32>
    %5 = arith.maximumf %3, %4 : vector<192x128xf32>
    %6 = vector.extract_strided_slice %2 {offsets = [0, 256], sizes = [192, 128], strides = [1, 1]} : vector<192x512xf32> to vector<192x128xf32>
    %7 = vector.extract_strided_slice %2 {offsets = [0, 384], sizes = [192, 128], strides = [1, 1]} : vector<192x512xf32> to vector<192x128xf32>
    %8 = arith.maximumf %6, %7 : vector<192x128xf32>
    %9 = arith.maximumf %5, %8 : vector<192x128xf32>
    %c0_3 = arith.constant 0 : index
    %c0_4 = arith.constant 0 : index
    %10 = vector.load %arg3[%c0_3, %c0_4] : memref<1x128xf32, #tpu.memory_space<vmem>>, vector<1x128xf32>
    %11 = vector.broadcast %10 : vector<1x128xf32> to vector<192x128xf32>
    %12 = arith.addf %9, %11 : vector<192x128xf32>
    %cst_5 = arith.constant 0.000000e+00 : f32
    %13 = vector.broadcast %cst_5 : f32 to vector<192x128xf32>
    %14 = arith.maximumf %12, %13 : vector<192x128xf32>
    %15 = arith.truncf %14 : vector<192x128xf32> to vector<192x128xbf16>
    %c0_6 = arith.constant 0 : index
    %c0_7 = arith.constant 0 : index
    %16 = vector.load %arg4[%c0_6, %c0_7] : memref<192x128xbf16, #tpu.memory_space<vmem>>, vector<192x128xbf16>
    tpu.vector_store %arg4[%c0_6, %c0_7], %15 {strides = array<i32>} : memref<192x128xbf16, #tpu.memory_space<vmem>>, vector<192x128xbf16>,
    return
  }
  func.func @transform_0(%arg0: i32) -> (i32, i32) {
    %c0_i32 = arith.constant 0 : i32
    %c0_i32_0 = arith.constant 0 : i32
    return %arg0, %c0_i32 : i32, i32
  }
  func.func @transform_1(%arg0: i32) -> (i32, i32) {
    %c0_i32 = arith.constant 0 : i32
    %c0_i32_0 = arith.constant 0 : i32
    %c0_i32_1 = arith.constant 0 : i32
    return %c0_i32, %c0_i32_0 : i32, i32
  }
  func.func @transform_2(%arg0: i32) -> (i32, i32) {
    %c0_i32 = arith.constant 0 : i32
    %c0_i32_0 = arith.constant 0 : i32
    %c0_i32_1 = arith.constant 0 : i32
    return %c0_i32, %c0_i32_0 : i32, i32
  }
  func.func @transform_3(%arg0: i32) -> (i32, i32) {
    %c0_i32 = arith.constant 0 : i32
    %c0_i32_0 = arith.constant 0 : i32
    return %arg0, %c0_i32 : i32, i32
  }
}

module attributes {stable_mosaic.version = 11 : i64} {
  func.func @_stage2_fc_kernel(%arg0: i32, %arg1: memref<4x16x768xbf16, #tpu.memory_space<vmem>>, %arg2: memref<768x512xbf16, #tpu.memory_space<vmem>>, %arg3: memref<1x128xf32, #tpu.memory_space<vmem>>, %arg4: memref<4x128x64xbf16, #tpu.memory_space<vmem>>, %arg5: memref<1x64xf32, #tpu.memory_space<vmem>>, %arg6: memref<64x128xbf16, #tpu.memory_space<vmem>>, %arg7: memref<1x128xf32, #tpu.memory_space<vmem>>, %arg8: memref<16x128xf32, #tpu.memory_space<vmem>>) attributes {dimension_semantics = [#tpu.dimension_semantics<parallel>], iteration_bounds = array<i64: 1>, scalar_prefetch = 0 : i64, scratch_operands = 0 : i64, tpu.core_type = #tpu.core_type<tc>, window_params = [{transform_indices = @transform_0, window_bounds = array<i64: 4, 16, 768>}, {pipeline_mode = #tpu.pipeline_mode<synchronous>, transform_indices = @transform_1, window_bounds = array<i64: 768, 512>}, {pipeline_mode = #tpu.pipeline_mode<synchronous>, transform_indices = @transform_2, window_bounds = array<i64: 1, 128>}, {pipeline_mode = #tpu.pipeline_mode<synchronous>, transform_indices = @transform_3, window_bounds = array<i64: 4, 128, 64>}, {pipeline_mode = #tpu.pipeline_mode<synchronous>, transform_indices = @transform_4, window_bounds = array<i64: 1, 64>}, {pipeline_mode = #tpu.pipeline_mode<synchronous>, transform_indices = @transform_5, window_bounds = array<i64: 64, 128>}, {pipeline_mode = #tpu.pipeline_mode<synchronous>, transform_indices = @transform_6, window_bounds = array<i64: 1, 128>}, {transform_indices = @transform_7, window_bounds = array<i64: 16, 128>}]} {
    %cst = arith.constant 0.000000e+00 : f32
    %0 = vector.broadcast %cst : f32 to vector<16x64xf32>
    %c0 = arith.constant 0 : index
    %c0_0 = arith.constant 0 : index
    %c0_1 = arith.constant 0 : index
    %1 = vector.load %arg1[%c0, %c0_0, %c0_1] : memref<4x16x768xbf16, #tpu.memory_space<vmem>>, vector<1x16x768xbf16>
    %2 = vector.shape_cast %1 : vector<1x16x768xbf16> to vector<16x768xbf16>
    %c0_2 = arith.constant 0 : index
    %c0_3 = arith.constant 0 : index
    %3 = vector.load %arg2[%c0_2, %c0_3] : memref<768x512xbf16, #tpu.memory_space<vmem>>, vector<768x512xbf16>
    %cst_4 = arith.constant dense<0.000000e+00> : vector<16x512xf32>
    %4 = tpu.matmul %2, %3, %cst_4 {dimension_numbers = #tpu.dot_dimension_numbers<[1], [0], [0], [1], [0, 0, 1, 1], [], []>} : vector<16x768xbf16>, vector<768x512xbf16>, vector<16x512xf32> -> vector<16x512xf32>
    %5 = vector.extract_strided_slice %4 {offsets = [0, 0], sizes = [16, 128], strides = [1, 1]} : vector<16x512xf32> to vector<16x128xf32>
    %6 = vector.extract_strided_slice %4 {offsets = [0, 128], sizes = [16, 128], strides = [1, 1]} : vector<16x512xf32> to vector<16x128xf32>
    %7 = arith.maximumf %5, %6 : vector<16x128xf32>
    %8 = vector.extract_strided_slice %4 {offsets = [0, 256], sizes = [16, 128], strides = [1, 1]} : vector<16x512xf32> to vector<16x128xf32>
    %9 = vector.extract_strided_slice %4 {offsets = [0, 384], sizes = [16, 128], strides = [1, 1]} : vector<16x512xf32> to vector<16x128xf32>
    %10 = arith.maximumf %8, %9 : vector<16x128xf32>
    %11 = arith.maximumf %7, %10 : vector<16x128xf32>
    %c0_5 = arith.constant 0 : index
    %c0_6 = arith.constant 0 : index
    %12 = vector.load %arg3[%c0_5, %c0_6] : memref<1x128xf32, #tpu.memory_space<vmem>>, vector<1x128xf32>
    %13 = vector.broadcast %12 : vector<1x128xf32> to vector<16x128xf32>
    %14 = arith.addf %11, %13 : vector<16x128xf32>
    %cst_7 = arith.constant 0.000000e+00 : f32
    %15 = vector.broadcast %cst_7 : f32 to vector<16x128xf32>
    %16 = arith.maximumf %14, %15 : vector<16x128xf32>
    %17 = arith.truncf %16 : vector<16x128xf32> to vector<16x128xbf16>
    %c0_8 = arith.constant 0 : index
    %c0_9 = arith.constant 0 : index
    %c0_10 = arith.constant 0 : index
    %18 = vector.load %arg4[%c0_8, %c0_9, %c0_10] : memref<4x128x64xbf16, #tpu.memory_space<vmem>>, vector<1x128x64xbf16>
    %19 = vector.shape_cast %18 : vector<1x128x64xbf16> to vector<128x64xbf16>
    %cst_11 = arith.constant dense<0.000000e+00> : vector<16x64xf32>
    %20 = tpu.matmul %17, %19, %cst_11 {dimension_numbers = #tpu.dot_dimension_numbers<[1], [0], [0], [1], [0, 0, 1, 1], [], []>} : vector<16x128xbf16>, vector<128x64xbf16>, vector<16x64xf32> -> vector<16x64xf32>
    %21 = arith.addf %0, %20 : vector<16x64xf32>
    %c1 = arith.constant 1 : index
    %c0_12 = arith.constant 0 : index
    %c0_13 = arith.constant 0 : index
    %22 = vector.load %arg1[%c1, %c0_12, %c0_13] : memref<4x16x768xbf16, #tpu.memory_space<vmem>>, vector<1x16x768xbf16>
    %23 = vector.shape_cast %22 : vector<1x16x768xbf16> to vector<16x768xbf16>
    %c0_14 = arith.constant 0 : index
    %c0_15 = arith.constant 0 : index
    %24 = vector.load %arg2[%c0_14, %c0_15] : memref<768x512xbf16, #tpu.memory_space<vmem>>, vector<768x512xbf16>
    %cst_16 = arith.constant dense<0.000000e+00> : vector<16x512xf32>
    %25 = tpu.matmul %23, %24, %cst_16 {dimension_numbers = #tpu.dot_dimension_numbers<[1], [0], [0], [1], [0, 0, 1, 1], [], []>} : vector<16x768xbf16>, vector<768x512xbf16>, vector<16x512xf32> -> vector<16x512xf32>
    %26 = vector.extract_strided_slice %25 {offsets = [0, 0], sizes = [16, 128], strides = [1, 1]} : vector<16x512xf32> to vector<16x128xf32>
    %27 = vector.extract_strided_slice %25 {offsets = [0, 128], sizes = [16, 128], strides = [1, 1]} : vector<16x512xf32> to vector<16x128xf32>
    %28 = arith.maximumf %26, %27 : vector<16x128xf32>
    %29 = vector.extract_strided_slice %25 {offsets = [0, 256], sizes = [16, 128], strides = [1, 1]} : vector<16x512xf32> to vector<16x128xf32>
    %30 = vector.extract_strided_slice %25 {offsets = [0, 384], sizes = [16, 128], strides = [1, 1]} : vector<16x512xf32> to vector<16x128xf32>
    %31 = arith.maximumf %29, %30 : vector<16x128xf32>
    %32 = arith.maximumf %28, %31 : vector<16x128xf32>
    %c0_17 = arith.constant 0 : index
    %c0_18 = arith.constant 0 : index
    %33 = vector.load %arg3[%c0_17, %c0_18] : memref<1x128xf32, #tpu.memory_space<vmem>>, vector<1x128xf32>
    %34 = vector.broadcast %33 : vector<1x128xf32> to vector<16x128xf32>
    %35 = arith.addf %32, %34 : vector<16x128xf32>
    %cst_19 = arith.constant 0.000000e+00 : f32
    %36 = vector.broadcast %cst_19 : f32 to vector<16x128xf32>
    %37 = arith.maximumf %35, %36 : vector<16x128xf32>
    %38 = arith.truncf %37 : vector<16x128xf32> to vector<16x128xbf16>
    %c1_20 = arith.constant 1 : index
    %c0_21 = arith.constant 0 : index
    %c0_22 = arith.constant 0 : index
    %39 = vector.load %arg4[%c1_20, %c0_21, %c0_22] : memref<4x128x64xbf16, #tpu.memory_space<vmem>>, vector<1x128x64xbf16>
    %40 = vector.shape_cast %39 : vector<1x128x64xbf16> to vector<128x64xbf16>
    %cst_23 = arith.constant dense<0.000000e+00> : vector<16x64xf32>
    %41 = tpu.matmul %38, %40, %cst_23 {dimension_numbers = #tpu.dot_dimension_numbers<[1], [0], [0], [1], [0, 0, 1, 1], [], []>} : vector<16x128xbf16>, vector<128x64xbf16>, vector<16x64xf32> -> vector<16x64xf32>
    %42 = arith.addf %21, %41 : vector<16x64xf32>
    %c2 = arith.constant 2 : index
    %c0_24 = arith.constant 0 : index
    %c0_25 = arith.constant 0 : index
    %43 = vector.load %arg1[%c2, %c0_24, %c0_25] : memref<4x16x768xbf16, #tpu.memory_space<vmem>>, vector<1x16x768xbf16>
    %44 = vector.shape_cast %43 : vector<1x16x768xbf16> to vector<16x768xbf16>
    %c0_26 = arith.constant 0 : index
    %c0_27 = arith.constant 0 : index
    %45 = vector.load %arg2[%c0_26, %c0_27] : memref<768x512xbf16, #tpu.memory_space<vmem>>, vector<768x512xbf16>
    %cst_28 = arith.constant dense<0.000000e+00> : vector<16x512xf32>
    %46 = tpu.matmul %44, %45, %cst_28 {dimension_numbers = #tpu.dot_dimension_numbers<[1], [0], [0], [1], [0, 0, 1, 1], [], []>} : vector<16x768xbf16>, vector<768x512xbf16>, vector<16x512xf32> -> vector<16x512xf32>
    %47 = vector.extract_strided_slice %46 {offsets = [0, 0], sizes = [16, 128], strides = [1, 1]} : vector<16x512xf32> to vector<16x128xf32>
    %48 = vector.extract_strided_slice %46 {offsets = [0, 128], sizes = [16, 128], strides = [1, 1]} : vector<16x512xf32> to vector<16x128xf32>
    %49 = arith.maximumf %47, %48 : vector<16x128xf32>
    %50 = vector.extract_strided_slice %46 {offsets = [0, 256], sizes = [16, 128], strides = [1, 1]} : vector<16x512xf32> to vector<16x128xf32>
    %51 = vector.extract_strided_slice %46 {offsets = [0, 384], sizes = [16, 128], strides = [1, 1]} : vector<16x512xf32> to vector<16x128xf32>
    %52 = arith.maximumf %50, %51 : vector<16x128xf32>
    %53 = arith.maximumf %49, %52 : vector<16x128xf32>
    %c0_29 = arith.constant 0 : index
    %c0_30 = arith.constant 0 : index
    %54 = vector.load %arg3[%c0_29, %c0_30] : memref<1x128xf32, #tpu.memory_space<vmem>>, vector<1x128xf32>
    %55 = vector.broadcast %54 : vector<1x128xf32> to vector<16x128xf32>
    %56 = arith.addf %53, %55 : vector<16x128xf32>
    %cst_31 = arith.constant 0.000000e+00 : f32
    %57 = vector.broadcast %cst_31 : f32 to vector<16x128xf32>
    %58 = arith.maximumf %56, %57 : vector<16x128xf32>
    %59 = arith.truncf %58 : vector<16x128xf32> to vector<16x128xbf16>
    %c2_32 = arith.constant 2 : index
    %c0_33 = arith.constant 0 : index
    %c0_34 = arith.constant 0 : index
    %60 = vector.load %arg4[%c2_32, %c0_33, %c0_34] : memref<4x128x64xbf16, #tpu.memory_space<vmem>>, vector<1x128x64xbf16>
    %61 = vector.shape_cast %60 : vector<1x128x64xbf16> to vector<128x64xbf16>
    %cst_35 = arith.constant dense<0.000000e+00> : vector<16x64xf32>
    %62 = tpu.matmul %59, %61, %cst_35 {dimension_numbers = #tpu.dot_dimension_numbers<[1], [0], [0], [1], [0, 0, 1, 1], [], []>} : vector<16x128xbf16>, vector<128x64xbf16>, vector<16x64xf32> -> vector<16x64xf32>
    %63 = arith.addf %42, %62 : vector<16x64xf32>
    %c3 = arith.constant 3 : index
    %c0_36 = arith.constant 0 : index
    %c0_37 = arith.constant 0 : index
    %64 = vector.load %arg1[%c3, %c0_36, %c0_37] : memref<4x16x768xbf16, #tpu.memory_space<vmem>>, vector<1x16x768xbf16>
    %65 = vector.shape_cast %64 : vector<1x16x768xbf16> to vector<16x768xbf16>
    %c0_38 = arith.constant 0 : index
    %c0_39 = arith.constant 0 : index
    %66 = vector.load %arg2[%c0_38, %c0_39] : memref<768x512xbf16, #tpu.memory_space<vmem>>, vector<768x512xbf16>
    %cst_40 = arith.constant dense<0.000000e+00> : vector<16x512xf32>
    %67 = tpu.matmul %65, %66, %cst_40 {dimension_numbers = #tpu.dot_dimension_numbers<[1], [0], [0], [1], [0, 0, 1, 1], [], []>} : vector<16x768xbf16>, vector<768x512xbf16>, vector<16x512xf32> -> vector<16x512xf32>
    %68 = vector.extract_strided_slice %67 {offsets = [0, 0], sizes = [16, 128], strides = [1, 1]} : vector<16x512xf32> to vector<16x128xf32>
    %69 = vector.extract_strided_slice %67 {offsets = [0, 128], sizes = [16, 128], strides = [1, 1]} : vector<16x512xf32> to vector<16x128xf32>
    %70 = arith.maximumf %68, %69 : vector<16x128xf32>
    %71 = vector.extract_strided_slice %67 {offsets = [0, 256], sizes = [16, 128], strides = [1, 1]} : vector<16x512xf32> to vector<16x128xf32>
    %72 = vector.extract_strided_slice %67 {offsets = [0, 384], sizes = [16, 128], strides = [1, 1]} : vector<16x512xf32> to vector<16x128xf32>
    %73 = arith.maximumf %71, %72 : vector<16x128xf32>
    %74 = arith.maximumf %70, %73 : vector<16x128xf32>
    %c0_41 = arith.constant 0 : index
    %c0_42 = arith.constant 0 : index
    %75 = vector.load %arg3[%c0_41, %c0_42] : memref<1x128xf32, #tpu.memory_space<vmem>>, vector<1x128xf32>
    %76 = vector.broadcast %75 : vector<1x128xf32> to vector<16x128xf32>
    %77 = arith.addf %74, %76 : vector<16x128xf32>
    %cst_43 = arith.constant 0.000000e+00 : f32
    %78 = vector.broadcast %cst_43 : f32 to vector<16x128xf32>
    %79 = arith.maximumf %77, %78 : vector<16x128xf32>
    %80 = arith.truncf %79 : vector<16x128xf32> to vector<16x128xbf16>
    %c3_44 = arith.constant 3 : index
    %c0_45 = arith.constant 0 : index
    %c0_46 = arith.constant 0 : index
    %81 = vector.load %arg4[%c3_44, %c0_45, %c0_46] : memref<4x128x64xbf16, #tpu.memory_space<vmem>>, vector<1x128x64xbf16>
    %82 = vector.shape_cast %81 : vector<1x128x64xbf16> to vector<128x64xbf16>
    %cst_47 = arith.constant dense<0.000000e+00> : vector<16x64xf32>
    %83 = tpu.matmul %80, %82, %cst_47 {dimension_numbers = #tpu.dot_dimension_numbers<[1], [0], [0], [1], [0, 0, 1, 1], [], []>} : vector<16x128xbf16>, vector<128x64xbf16>, vector<16x64xf32> -> vector<16x64xf32>
    %84 = arith.addf %63, %83 : vector<16x64xf32>
    %c0_48 = arith.constant 0 : index
    %c0_49 = arith.constant 0 : index
    %85 = vector.load %arg5[%c0_48, %c0_49] : memref<1x64xf32, #tpu.memory_space<vmem>>, vector<1x64xf32>
    %86 = vector.broadcast %85 : vector<1x64xf32> to vector<16x64xf32>
    %87 = arith.addf %84, %86 : vector<16x64xf32>
    %cst_50 = arith.constant 0.000000e+00 : f32
    %88 = vector.broadcast %cst_50 : f32 to vector<16x64xf32>
    %89 = arith.maximumf %87, %88 : vector<16x64xf32>
    %90 = arith.truncf %89 : vector<16x64xf32> to vector<16x64xbf16>
    %c0_51 = arith.constant 0 : index
    %c0_52 = arith.constant 0 : index
    %91 = vector.load %arg6[%c0_51, %c0_52] : memref<64x128xbf16, #tpu.memory_space<vmem>>, vector<64x128xbf16>
    %cst_53 = arith.constant dense<0.000000e+00> : vector<16x128xf32>
    %92 = tpu.matmul %90, %91, %cst_53 {dimension_numbers = #tpu.dot_dimension_numbers<[1], [0], [0], [1], [0, 0, 1, 1], [], []>} : vector<16x64xbf16>, vector<64x128xbf16>, vector<16x128xf32> -> vector<16x128xf32>
    %c0_54 = arith.constant 0 : index
    %c0_55 = arith.constant 0 : index
    %93 = vector.load %arg7[%c0_54, %c0_55] : memref<1x128xf32, #tpu.memory_space<vmem>>, vector<1x128xf32>
    %94 = vector.broadcast %93 : vector<1x128xf32> to vector<16x128xf32>
    %95 = arith.addf %92, %94 : vector<16x128xf32>
    %96 = vector.extract_strided_slice %95 {offsets = [0, 0], sizes = [16, 10], strides = [1, 1]} : vector<16x128xf32> to vector<16x10xf32>
    %cst_56 = arith.constant dense<0xFF800000> : vector<16xf32>
    %97 = vector.multi_reduction <maximumf>, %96, %cst_56 [1] : vector<16x10xf32> to vector<16xf32>
    %98 = vector.shape_cast %97 : vector<16xf32> to vector<16x1xf32>
    %99 = vector.broadcast %98 : vector<16x1xf32> to vector<16x10xf32>
    %100 = arith.subf %96, %99 : vector<16x10xf32>
    %101 = math.exp %100 : vector<16x10xf32>
    %cst_57 = arith.constant dense<0.000000e+00> : vector<16xf32>
    %102 = vector.multi_reduction <add>, %101, %cst_57 [1] : vector<16x10xf32> to vector<16xf32>
    %103 = vector.shape_cast %102 : vector<16xf32> to vector<16x1xf32>
    %104 = math.log %103 : vector<16x1xf32>
    %105 = arith.addf %98, %104 : vector<16x1xf32>
    %106 = vector.broadcast %105 : vector<16x1xf32> to vector<16x128xf32>
    %107 = arith.subf %95, %106 : vector<16x128xf32>
    %c0_58 = arith.constant 0 : index
    %c0_59 = arith.constant 0 : index
    %108 = vector.load %arg8[%c0_58, %c0_59] : memref<16x128xf32, #tpu.memory_space<vmem>>, vector<16x128xf32>
    tpu.vector_store %arg8[%c0_58, %c0_59], %107 {strides = array<i32>} : memref<16x128xf32, #tpu.memory_space<vmem>>, vector<16x128xf32>,
    return
  }
  func.func @transform_0(%arg0: i32) -> (i32, i32, i32) {
    %c0_i32 = arith.constant 0 : i32
    %c0_i32_0 = arith.constant 0 : i32
    %c0_i32_1 = arith.constant 0 : i32
    return %c0_i32, %arg0, %c0_i32_0 : i32, i32, i32
  }
  func.func @transform_1(%arg0: i32) -> (i32, i32) {
    %c0_i32 = arith.constant 0 : i32
    %c0_i32_0 = arith.constant 0 : i32
    %c0_i32_1 = arith.constant 0 : i32
    return %c0_i32, %c0_i32_0 : i32, i32
  }
  func.func @transform_2(%arg0: i32) -> (i32, i32) {
    %c0_i32 = arith.constant 0 : i32
    %c0_i32_0 = arith.constant 0 : i32
    %c0_i32_1 = arith.constant 0 : i32
    return %c0_i32, %c0_i32_0 : i32, i32
  }
  func.func @transform_3(%arg0: i32) -> (i32, i32, i32) {
    %c0_i32 = arith.constant 0 : i32
    %c0_i32_0 = arith.constant 0 : i32
    %c0_i32_1 = arith.constant 0 : i32
    %c0_i32_2 = arith.constant 0 : i32
    return %c0_i32, %c0_i32_0, %c0_i32_1 : i32, i32, i32
  }
  func.func @transform_4(%arg0: i32) -> (i32, i32) {
    %c0_i32 = arith.constant 0 : i32
    %c0_i32_0 = arith.constant 0 : i32
    %c0_i32_1 = arith.constant 0 : i32
    return %c0_i32, %c0_i32_0 : i32, i32
  }
  func.func @transform_5(%arg0: i32) -> (i32, i32) {
    %c0_i32 = arith.constant 0 : i32
    %c0_i32_0 = arith.constant 0 : i32
    %c0_i32_1 = arith.constant 0 : i32
    return %c0_i32, %c0_i32_0 : i32, i32
  }
  func.func @transform_6(%arg0: i32) -> (i32, i32) {
    %c0_i32 = arith.constant 0 : i32
    %c0_i32_0 = arith.constant 0 : i32
    %c0_i32_1 = arith.constant 0 : i32
    return %c0_i32, %c0_i32_0 : i32, i32
  }
  func.func @transform_7(%arg0: i32) -> (i32, i32) {
    %c0_i32 = arith.constant 0 : i32
    %c0_i32_0 = arith.constant 0 : i32
    return %arg0, %c0_i32 : i32, i32
  }
}

</mosaic_0001>

<bundles_post_ra>
// kernel: lenet3_forward.2
= control target key start
LH: loop header
LB: loop body
LE: loop exit
PB: predicated region body
PF: predicated region fallthrough
CT: control target
= control target key end

     0   :  { %vm399_vm0 = vcmask 326656   ;;  %vm436_vm1 = vcmask 1043456   ;;  %s1627_s1 = inlined_call_operand.vmem [shape: bf16[168,512], index: 1, kind: input, shape index: {}]   ;;  %s1628_s0 = inlined_call_operand.vmem [shape: bf16[192,168], index: 0, kind: input, shape index: {}]   ;;  %s1629_s2 = inlined_call_operand.vmem [shape: f32[1,128], index: 2, kind: input, shape index: {}]   ;;  %s1630_s3 = inlined_call_operand.vmem [shape: bf16[192,128], index: 3, kind: output, shape index: {}]  }
   0x1   :  { %v1220_v0 = vld [vmem:[%s1627_s1 + $0x4] ss:$16 sps:$4 sm:$0xff]   ;;  %v1222_v1 = vld [vmem:[%s1627_s1 + $0xc] ss:$16 sps:$4 sm:$0xff]   ;;  %v1224_v2 = vld [vmem:[%s1627_s1] ss:$16 sps:$4 sm:$0xff]  }
   0x2   :  { %449 = vmatprep.subr.bf16.mxu0 %v1220_v0  ;;  %v1225_v3 = vld [vmem:[%s1627_s1 + $0x8] ss:$16 sps:$4 sm:$0xff]   ;;  %602 = vmatprep.subr.bf16.mxu1 %v1222_v1  ;;  %v1226_v4 = vld [vmem:[%s1627_s1 + $0x24] ss:$16 sps:$4 sm:$0xff]   ;;  %v1228_v5 = vld [vmem:[%s1627_s1 + $0x2c] ss:$16 sps:$4 sm:$0xff]  }
   0x3   :  { %450 = vmatpush1.bf16.msra.mxu0 %v1224_v2  ;;  %603 = vmatpush1.bf16.msra.mxu1 %v1225_v3  ;;  %v1230_v6 = vld [vmem:[%s1627_s1 + $0x20] ss:$16 sps:$4 sm:$0xff]   ;;  %v1231_v7 = vld [vmem:[%s1627_s1 + $0x28] ss:$16 sps:$4 sm:$0xff]   ;;  %v1232_v8 = vld [vmem:[%s1627_s1 + $0x44] ss:$16 sps:$4 sm:$0xff]  }
   0x4   :  { %451 = vmatprep.subr.bf16.mxu0 %v1226_v4  ;;  %604 = vmatprep.subr.bf16.mxu1 %v1228_v5  ;;  %v1234_v9 = vld [vmem:[%s1627_s1 + $0x4c] ss:$16 sps:$4 sm:$0xff]   ;;  %v1236_v10 = vld [vmem:[%s1627_s1 + $0x40] ss:$16 sps:$4 sm:$0xff]   ;;  %v1237_v11 = vld [vmem:[%s1627_s1 + $0x48] ss:$16 sps:$4 sm:$0xff]  }
   0x5   :  { %v1238_v12 = vld [vmem:[%s1627_s1 + $0x64] ss:$16 sps:$4 sm:$0xff]   ;;  %v1240_v13 = vld [vmem:[%s1627_s1 + $0x6c] ss:$16 sps:$4 sm:$0xff]   ;;  %v1242_v14 = vld [vmem:[%s1627_s1 + $0x60] ss:$16 sps:$4 sm:$0xff]  }
   0x6   :  { %v1243_v15 = vld [vmem:[%s1627_s1 + $0x68] ss:$16 sps:$4 sm:$0xff]   ;;  %v1244_v16 = vld [vmem:[%s1627_s1 + $0x84] ss:$16 sps:$4 sm:$0xff]   ;;  %v1246_v17 = vld [vmem:[%s1627_s1 + $0x8c] ss:$16 sps:$4 sm:$0xff]  }
   0x7   :  { %452 = vmatpush1.bf16.msra.mxu0 %v1230_v6  ;;  %605 = vmatpush1.bf16.msra.mxu1 %v1231_v7  ;;  %v1248_v18 = vld [vmem:[%s1627_s1 + $0x80] ss:$16 sps:$4 sm:$0xff]   ;;  %v1249_v19 = vld [vmem:[%s1627_s1 + $0x88] ss:$16 sps:$4 sm:$0xff]   ;;  %v1250_v20 = vld [vmem:[%s1627_s1 + $0xa4] ss:$16 sps:$4 sm:$0xff]  }
   0x8   :  { %453 = vmatprep.subr.bf16.mxu0 %v1232_v8  ;;  %606 = vmatprep.subr.bf16.mxu1 %v1234_v9  ;;  %v1252_v21 = vld [vmem:[%s1627_s1 + $0xac] ss:$16 sps:$4 sm:$0xff]   ;;  %v1254_v22 = vld [vmem:[%s1627_s1 + $0xa0] ss:$16 sps:$4 sm:$0xff]   ;;  %v1255_v23 = vld [vmem:[%s1627_s1 + $0xa8] ss:$16 sps:$4 sm:$0xff]  }
   0x9   :  { %v1256_v24 = vld [vmem:[%s1627_s1 + $0xc4] ss:$16 sps:$4 sm:$0xff]   ;;  %v1258_v25 = vld [vmem:[%s1627_s1 + $0xcc] ss:$16 sps:$4 sm:$0xff]   ;;  %v1260_v26 = vld [vmem:[%s1627_s1 + $0xc0] ss:$16 sps:$4 sm:$0xff]  }
   0xa   :  { %v1261_v27 = vld [vmem:[%s1627_s1 + $0xc8] ss:$16 sps:$4 sm:$0xff]   ;;  %v1262_v28 = vld [vmem:[%s1627_s1 + $0xe4] ss:$16 sps:$4 sm:$0xff]   ;;  %v1264_v29 = vld [vmem:[%s1627_s1 + $0xec] ss:$16 sps:$4 sm:$0xff]  }
   0xb   :  { %454 = vmatpush1.bf16.msra.mxu0 %v1236_v10  ;;  %607 = vmatpush1.bf16.msra.mxu1 %v1237_v11  ;;  %v1266_v30 = vld [vmem:[%s1627_s1 + $0xe0] ss:$16 sps:$4 sm:$0xff]   ;;  %v1267_v31 = vld [vmem:[%s1627_s1 + $0xe8] ss:$16 sps:$4 sm:$0xff]   ;;  %v1286_v32 = vld [vmem:[%s1628_s0 + $0x4] ss:$8 sps:$4 sm:$0xff]  }
   0xc   :  { %455 = vmatprep.subr.bf16.mxu0 %v1238_v12  ;;  %608 = vmatprep.subr.bf16.mxu1 %v1240_v13  ;;  %v1268_v33 = vld [vmem:[%s1627_s1 + $0x104] ss:$16 sps:$4 sm:$0xff]   ;;  %v1270_v34 = vld [vmem:[%s1627_s1 + $0x10c] ss:$16 sps:$4 sm:$0xff]   ;;  %v1272_v35 = vld [vmem:[%s1627_s1 + $0x100] ss:$16 sps:$4 sm:$0xff]  }
   0xd   :  { %1075 = vmatprep.mubr.msk.bf16.mxu0 %vm399_vm0, %v1286_v32  ;;  %1088 = vmatprep.mubr.msk.bf16.mxu1 %vm399_vm0, %v1286_v32  ;;  %v1273_v36 = vld [vmem:[%s1627_s1 + $0x108] ss:$16 sps:$4 sm:$0xff]   ;;  %v1274_v37 = vld [vmem:[%s1627_s1 + $0x124] ss:$16 sps:$4 sm:$0xff]   ;;  %v1276_v38 = vld [vmem:[%s1627_s1 + $0x12c] ss:$16 sps:$4 sm:$0xff]  }
   0xe   :  { %v79_v39 = vld [vmem:[%s1627_s1 + $0x140] sm:$0xff]  ;;  %v80_v40 = vld [vmem:[%s1627_s1 + $0x148] sm:$0xff]  ;;  %v1287_v50 = vld [vmem:[%s1628_s0 + $0x14] ss:$8 sps:$4 sm:$0xff]  }
   0xf   :  { %456 = vmatpush1.bf16.msra.mxu0 %v1242_v14  ;;  %609 = vmatpush1.bf16.msra.mxu1 %v1243_v15  ;;  %v1278_v41 = vld [vmem:[%s1627_s1 + $0x120] ss:$16 sps:$4 sm:$0xff]   ;;  %v1279_v42 = vld [vmem:[%s1627_s1 + $0x128] ss:$16 sps:$4 sm:$0xff]   ;;  %v1071_v43 = vcombine.high %v79_v39, %v79_v39  ;;  %v1073_v44 = vcombine.high %v80_v40, %v80_v40  ;;  %v1070_v45 = vcombine.low %v79_v39, %v79_v39  ;;  %v1290_v52 = vld [vmem:[%s1628_s0 + $0x24] ss:$8 sps:$4 sm:$0xff]  }
  0x10   :  { %457 = vmatprep.subr.bf16.mxu0 %v1244_v16  ;;  %610 = vmatprep.subr.bf16.mxu1 %v1246_v17  ;;  %v1072_v46 = vcombine.low %v80_v40, %v80_v40  ;;  %v1284_v49 = vld [vmem:[%s1628_s0] ss:$8 sps:$4 sm:$0xff]   ;;  %v1289_v51 = vld [vmem:[%s1628_s0 + $0x10] ss:$8 sps:$4 sm:$0xff]   ;;  %v1293_v54 = vld [vmem:[%s1628_s0 + $0x34] ss:$8 sps:$4 sm:$0xff]  }
  0x11   :  { %v438_v47 = vsel %vm436_vm1, %v1070_v45, 0  ;;  %v1292_v53 = vld [vmem:[%s1628_s0 + $0x20] ss:$8 sps:$4 sm:$0xff]   ;;  %v1295_v55 = vld [vmem:[%s1628_s0 + $0x30] ss:$8 sps:$4 sm:$0xff]  }
  0x12   :  { %v444_v48 = vsel %vm436_vm1, %v1072_v46, 0  ;;  %v1296_v56 = vld [vmem:[%s1628_s0 + $0x44] ss:$8 sps:$4 sm:$0xff]   ;;  %v1298_v57 = vld [vmem:[%s1628_s0 + $0x40] ss:$8 sps:$4 sm:$0xff]  }
  0x13   :  { %458 = vmatpush1.bf16.msra.mxu0 %v1248_v18  ;;  %611 = vmatpush1.bf16.msra.mxu1 %v1249_v19  ;;  %v1299_v58 = vld [vmem:[%s1628_s0 + $0x54] ss:$8 sps:$4 sm:$0xff]   ;;  %v1301_v59 = vld [vmem:[%s1628_s0 + $0x50] ss:$8 sps:$4 sm:$0xff]   ;;  %v1302_v60 = vld [vmem:[%s1628_s0 + $0x64] ss:$8 sps:$4 sm:$0xff]  }
  0x14   :  { %459 = vmatprep.subr.bf16.mxu0 %v1250_v20  ;;  %612 = vmatprep.subr.bf16.mxu1 %v1252_v21  ;;  %v1304_v61 = vld [vmem:[%s1628_s0 + $0x60] ss:$8 sps:$4 sm:$0xff]   ;;  %v1305_v62 = vld [vmem:[%s1628_s0 + $0x74] ss:$8 sps:$4 sm:$0xff]   ;;  %v1307_v63 = vld [vmem:[%s1628_s0 + $0x70] ss:$8 sps:$4 sm:$0xff]  }
  0x15   :  { %v1308_v0 = vld [vmem:[%s1628_s0 + $0x84] ss:$8 sps:$4 sm:$0xff]   ;;  %v1310_v1 = vld [vmem:[%s1628_s0 + $0x80] ss:$8 sps:$4 sm:$0xff]   ;;  %v1311_v2 = vld [vmem:[%s1628_s0 + $0x94] ss:$8 sps:$4 sm:$0xff]  }
  0x16   :  { %v1313_v3 = vld [vmem:[%s1628_s0 + $0x90] ss:$8 sps:$4 sm:$0xff]   ;;  %v1314_v4 = vld [vmem:[%s1628_s0 + $0xa4] ss:$8 sps:$4 sm:$0xff]   ;;  %v1316_v5 = vld [vmem:[%s1628_s0 + $0xa0] ss:$8 sps:$4 sm:$0xff]  }
  0x17   :  { %460 = vmatpush1.bf16.msra.mxu0 %v1254_v22  ;;  %613 = vmatpush1.bf16.msra.mxu1 %v1255_v23  ;;  %v1317_v6 = vld [vmem:[%s1628_s0 + $0xb4] ss:$8 sps:$4 sm:$0xff]   ;;  %v1319_v7 = vld [vmem:[%s1628_s0 + $0xb0] ss:$8 sps:$4 sm:$0xff]   ;;  %v1565_v16 = vld [vmem:[%s1629_s2] ss:$0 sm:$0xff] }
  0x18   :  { %461 = vmatprep.subr.bf16.mxu0 %v1256_v24  ;;  %614 = vmatprep.subr.bf16.mxu1 %v1258_v25 }
  0x1b   :  { %462 = vmatpush1.bf16.msra.mxu0 %v1260_v26  ;;  %615 = vmatpush1.bf16.msra.mxu1 %v1261_v27 }
  0x1c   :  { %463 = vmatprep.subr.bf16.mxu0 %v1262_v28  ;;  %616 = vmatprep.subr.bf16.mxu1 %v1264_v29 }
  0x1f   :  { %464 = vmatpush1.bf16.msra.mxu0 %v1266_v30  ;;  %617 = vmatpush1.bf16.msra.mxu1 %v1267_v31 }
  0x20   :  { %465 = vmatprep.subr.bf16.mxu0 %v1268_v33  ;;  %618 = vmatprep.subr.bf16.mxu1 %v1270_v34 }
  0x23   :  { %466 = vmatpush1.bf16.msra.mxu0 %v1272_v35  ;;  %619 = vmatpush1.bf16.msra.mxu1 %v1273_v36 }
  0x24   :  { %467 = vmatprep.subr.bf16.mxu0 %v1274_v37  ;;  %620 = vmatprep.subr.bf16.mxu1 %v1276_v38 }
  0x27   :  { %468 = vmatpush1.bf16.msra.mxu0 %v1278_v41  ;;  %621 = vmatpush1.bf16.msra.mxu1 %v1279_v42 }
  0x28   :  { %1074 = vmatprep.subr.msk.bf16.mxu0 %vm436_vm1, %v1071_v43  ;;  %1087 = vmatprep.subr.msk.bf16.mxu1 %vm436_vm1, %v1073_v44 }
  0x2b   :  { %470 = vmatpush1.bf16.msra.mxu0 %v438_v47  ;;  %623 = vmatpush1.bf16.msra.mxu1 %v444_v48 }
  0x2e   :  { %482 = vmatmul.mubr.bf16.vlgmr.msra.gmra.mrb[0].mxu0 %v1284_v49  ;;  %635 = vmatmul.mubr.bf16.vlgmr.msra.gmra.mrb[0].mxu1 %v1284_v49 }
  0x2f   :  { %1076 = vmatprep.mubr.msk.bf16.mxu0 %vm399_vm0, %v1287_v50  ;;  %1089 = vmatprep.mubr.msk.bf16.mxu1 %vm399_vm0, %v1287_v50 }
  0x36   :  { %492 = vmatmul.mubr.bf16.gmra.mrb[4].mxu0 %v1289_v51  ;;  %645 = vmatmul.mubr.bf16.gmra.mrb[4].mxu1 %v1289_v51 }
  0x37   :  { %1077 = vmatprep.mubr.msk.bf16.mxu0 %vm399_vm0, %v1290_v52  ;;  %1090 = vmatprep.mubr.msk.bf16.mxu1 %vm399_vm0, %v1290_v52 }
  0x3e   :  { %502 = vmatmul.mubr.bf16.gmra.mrb[8].mxu0 %v1292_v53  ;;  %655 = vmatmul.mubr.bf16.gmra.mrb[8].mxu1 %v1292_v53 }
  0x3f   :  { %1078 = vmatprep.mubr.msk.bf16.mxu0 %vm399_vm0, %v1293_v54  ;;  %1091 = vmatprep.mubr.msk.bf16.mxu1 %vm399_vm0, %v1293_v54 }
  0x46   :  { %512 = vmatmul.mubr.bf16.gmra.mrb[12].mxu0 %v1295_v55  ;;  %665 = vmatmul.mubr.bf16.gmra.mrb[12].mxu1 %v1295_v55 }
  0x47   :  { %1079 = vmatprep.mubr.msk.bf16.mxu0 %vm399_vm0, %v1296_v56  ;;  %1092 = vmatprep.mubr.msk.bf16.mxu1 %vm399_vm0, %v1296_v56 }
  0x4e   :  { %522 = vmatmul.mubr.bf16.gmra.mrb[16].mxu0 %v1298_v57  ;;  %675 = vmatmul.mubr.bf16.gmra.mrb[16].mxu1 %v1298_v57 }
  0x4f   :  { %1080 = vmatprep.mubr.msk.bf16.mxu0 %vm399_vm0, %v1299_v58  ;;  %1093 = vmatprep.mubr.msk.bf16.mxu1 %vm399_vm0, %v1299_v58 }
  0x56   :  { %532 = vmatmul.mubr.bf16.gmra.mrb[20].mxu0 %v1301_v59  ;;  %685 = vmatmul.mubr.bf16.gmra.mrb[20].mxu1 %v1301_v59 }
  0x57   :  { %1081 = vmatprep.mubr.msk.bf16.mxu0 %vm399_vm0, %v1302_v60  ;;  %1094 = vmatprep.mubr.msk.bf16.mxu1 %vm399_vm0, %v1302_v60 }
  0x5e   :  { %542 = vmatmul.mubr.bf16.gmra.mrb[24].mxu0 %v1304_v61  ;;  %695 = vmatmul.mubr.bf16.gmra.mrb[24].mxu1 %v1304_v61 }
  0x5f   :  { %1082 = vmatprep.mubr.msk.bf16.mxu0 %vm399_vm0, %v1305_v62  ;;  %1095 = vmatprep.mubr.msk.bf16.mxu1 %vm399_vm0, %v1305_v62 }
  0x66   :  { %552 = vmatmul.mubr.bf16.gmra.mrb[28].mxu0 %v1307_v63  ;;  %705 = vmatmul.mubr.bf16.gmra.mrb[28].mxu1 %v1307_v63 }
  0x67   :  { %1083 = vmatprep.mubr.msk.bf16.mxu0 %vm399_vm0, %v1308_v0  ;;  %1096 = vmatprep.mubr.msk.bf16.mxu1 %vm399_vm0, %v1308_v0 }
  0x6e   :  { %562 = vmatmul.mubr.bf16.gmra.mrb[32].mxu0 %v1310_v1  ;;  %715 = vmatmul.mubr.bf16.gmra.mrb[32].mxu1 %v1310_v1 }
  0x6f   :  { %1084 = vmatprep.mubr.msk.bf16.mxu0 %vm399_vm0, %v1311_v2  ;;  %1097 = vmatprep.mubr.msk.bf16.mxu1 %vm399_vm0, %v1311_v2 }
  0x76   :  { %572 = vmatmul.mubr.bf16.gmra.mrb[36].mxu0 %v1313_v3  ;;  %725 = vmatmul.mubr.bf16.gmra.mrb[36].mxu1 %v1313_v3 }
  0x77   :  { %1085 = vmatprep.mubr.msk.bf16.mxu0 %vm399_vm0, %v1314_v4  ;;  %1098 = vmatprep.mubr.msk.bf16.mxu1 %vm399_vm0, %v1314_v4 }
  0x7e   :  { %582 = vmatmul.mubr.bf16.gmra.mrb[40].mxu0 %v1316_v5  ;;  %735 = vmatmul.mubr.bf16.gmra.mrb[40].mxu1 %v1316_v5 }
  0x7f   :  { %1086 = vmatprep.mubr.msk.bf16.mxu0 %vm399_vm0, %v1317_v6  ;;  %1099 = vmatprep.mubr.msk.bf16.mxu1 %vm399_vm0, %v1317_v6 }
  0x86   :  { %592 = vmatmul.mubr.bf16.gmra.mrb[44].mxu0 %v1319_v7  ;;  %745 = vmatmul.mubr.bf16.gmra.mrb[44].mxu1 %v1319_v7 }
 0x101   :  { %v483_v8 = vpop.f32.mrb[0].mxu0  ;;  %v636_v9 = vpop.f32.mrb[0].mxu1 }
 0x102   :  { %v485_v10 = vpop.f32.mrb[1].mxu0  ;;  %v638_v11 = vpop.f32.mrb[1].mxu1 }
 0x103   :  { %v755_v12 = vmax.f32 %v483_v8, %v485_v10  ;;  %v779_v13 = vmax.f32 %v636_v9, %v638_v11  ;;  %v487_v14 = vpop.f32.mrb[2].mxu0  ;;  %v640_v15 = vpop.f32.mrb[2].mxu1 }
 0x104   :  { %v489_v17 = vpop.f32.mrb[3].mxu0  ;;  %v642_v18 = vpop.f32.mrb[3].mxu1 }
 0x105   :  { %v803_v19 = vmax.f32 %v755_v12, %v779_v13  ;;  %v756_v20 = vmax.f32 %v487_v14, %v489_v17  ;;  %v780_v21 = vmax.f32 %v640_v15, %v642_v18 }
 0x107   :  { %v834_v22 = vadd.f32 %v1565_v16, %v803_v19  ;;  %v804_v23 = vmax.f32 %v756_v20, %v780_v21 }
 0x109   :  { %v835_v24 = vadd.f32 %v1565_v16, %v804_v23  ;;  %v493_v25 = vpop.f32.mrb[4].mxu0  ;;  %v646_v26 = vpop.f32.mrb[4].mxu1  ;;  %v858_v29 = vmax.f32 %v834_v22, 0.0 }
 0x10a   :  { %v495_v27 = vpop.f32.mrb[5].mxu0  ;;  %v648_v28 = vpop.f32.mrb[5].mxu1 }
 0x10b   :  { %v859_v30 = vmax.f32 %v835_v24, 0.0  ;;  %v757_v31 = vmax.f32 %v493_v25, %v495_v27  ;;  %v781_v32 = vmax.f32 %v646_v26, %v648_v28  ;;  %v497_v33 = vpop.f32.mrb[6].mxu0  ;;  %v650_v34 = vpop.f32.mrb[6].mxu1 }
 0x10c   :  { %v499_v35 = vpop.f32.mrb[7].mxu0  ;;  %v652_v36 = vpop.f32.mrb[7].mxu1 }
 0x10d   :  { %v1152_v37 = vpack.c.bf16 %v859_v30, %v858_v29  ;;  %v805_v38 = vmax.f32 %v757_v31, %v781_v32  ;;  %v758_v39 = vmax.f32 %v497_v33, %v499_v35  ;;  %v782_v40 = vmax.f32 %v650_v34, %v652_v36 }
 0x10f   :  { %1153 = vst [vmem:[%s1630_s3] sm:$0xff] %v1152_v37   ;;  %v836_v41 = vadd.f32 %v1565_v16, %v805_v38  ;;  %v806_v42 = vmax.f32 %v758_v39, %v782_v40 }
 0x111   :  { %v837_v43 = vadd.f32 %v1565_v16, %v806_v42  ;;  %v503_v44 = vpop.f32.mrb[8].mxu0  ;;  %v656_v45 = vpop.f32.mrb[8].mxu1  ;;  %v860_v48 = vmax.f32 %v836_v41, 0.0 }
 0x112   :  { %v505_v46 = vpop.f32.mrb[9].mxu0  ;;  %v658_v47 = vpop.f32.mrb[9].mxu1 }
 0x113   :  { %v861_v49 = vmax.f32 %v837_v43, 0.0  ;;  %v759_v50 = vmax.f32 %v503_v44, %v505_v46  ;;  %v783_v51 = vmax.f32 %v656_v45, %v658_v47  ;;  %v507_v52 = vpop.f32.mrb[10].mxu0  ;;  %v660_v53 = vpop.f32.mrb[10].mxu1 }
 0x114   :  { %v509_v54 = vpop.f32.mrb[11].mxu0  ;;  %v662_v55 = vpop.f32.mrb[11].mxu1 }
 0x115   :  { %v1157_v56 = vpack.c.bf16 %v861_v49, %v860_v48  ;;  %v807_v57 = vmax.f32 %v759_v50, %v783_v51  ;;  %v760_v58 = vmax.f32 %v507_v52, %v509_v54  ;;  %v784_v59 = vmax.f32 %v660_v53, %v662_v55 }
 0x117   :  { %1209 = vst [vmem:[%s1630_s3 + $0x8] sm:$0xff] %v1157_v56   ;;  %v838_v60 = vadd.f32 %v1565_v16, %v807_v57  ;;  %v808_v61 = vmax.f32 %v760_v58, %v784_v59 }
 0x119   :  { %v839_v62 = vadd.f32 %v1565_v16, %v808_v61  ;;  %v513_v63 = vpop.f32.mrb[12].mxu0  ;;  %v666_v0 = vpop.f32.mrb[12].mxu1  ;;  %v862_v3 = vmax.f32 %v838_v60, 0.0 }
 0x11a   :  { %v515_v1 = vpop.f32.mrb[13].mxu0  ;;  %v668_v2 = vpop.f32.mrb[13].mxu1 }
 0x11b   :  { %v863_v4 = vmax.f32 %v839_v62, 0.0  ;;  %v761_v5 = vmax.f32 %v513_v63, %v515_v1  ;;  %v785_v6 = vmax.f32 %v666_v0, %v668_v2  ;;  %v517_v7 = vpop.f32.mrb[14].mxu0  ;;  %v670_v8 = vpop.f32.mrb[14].mxu1 }
 0x11c   :  { %v519_v9 = vpop.f32.mrb[15].mxu0  ;;  %v672_v10 = vpop.f32.mrb[15].mxu1 }
 0x11d   :  { %v1162_v11 = vpack.c.bf16 %v863_v4, %v862_v3  ;;  %v809_v12 = vmax.f32 %v761_v5, %v785_v6  ;;  %v762_v13 = vmax.f32 %v517_v7, %v519_v9  ;;  %v786_v14 = vmax.f32 %v670_v8, %v672_v10 }
 0x11f   :  { %1210 = vst [vmem:[%s1630_s3 + $0x10] sm:$0xff] %v1162_v11   ;;  %v840_v15 = vadd.f32 %v1565_v16, %v809_v12  ;;  %v810_v17 = vmax.f32 %v762_v13, %v786_v14 }
 0x121   :  { %v841_v18 = vadd.f32 %v1565_v16, %v810_v17  ;;  %v523_v19 = vpop.f32.mrb[16].mxu0  ;;  %v676_v20 = vpop.f32.mrb[16].mxu1  ;;  %v864_v23 = vmax.f32 %v840_v15, 0.0 }
 0x122   :  { %v525_v21 = vpop.f32.mrb[17].mxu0  ;;  %v678_v22 = vpop.f32.mrb[17].mxu1 }
 0x123   :  { %v865_v24 = vmax.f32 %v841_v18, 0.0  ;;  %v763_v25 = vmax.f32 %v523_v19, %v525_v21  ;;  %v787_v26 = vmax.f32 %v676_v20, %v678_v22  ;;  %v527_v27 = vpop.f32.mrb[18].mxu0  ;;  %v680_v28 = vpop.f32.mrb[18].mxu1 }
 0x124   :  { %v529_v29 = vpop.f32.mrb[19].mxu0  ;;  %v682_v30 = vpop.f32.mrb[19].mxu1 }
 0x125   :  { %v1167_v31 = vpack.c.bf16 %v865_v24, %v864_v23  ;;  %v811_v32 = vmax.f32 %v763_v25, %v787_v26  ;;  %v764_v33 = vmax.f32 %v527_v27, %v529_v29  ;;  %v788_v34 = vmax.f32 %v680_v28, %v682_v30 }
 0x127   :  { %1211 = vst [vmem:[%s1630_s3 + $0x18] sm:$0xff] %v1167_v31   ;;  %v842_v35 = vadd.f32 %v1565_v16, %v811_v32  ;;  %v812_v36 = vmax.f32 %v764_v33, %v788_v34 }
 0x129   :  { %v843_v37 = vadd.f32 %v1565_v16, %v812_v36  ;;  %v533_v38 = vpop.f32.mrb[20].mxu0  ;;  %v686_v39 = vpop.f32.mrb[20].mxu1  ;;  %v866_v42 = vmax.f32 %v842_v35, 0.0 }
 0x12a   :  { %v535_v40 = vpop.f32.mrb[21].mxu0  ;;  %v688_v41 = vpop.f32.mrb[21].mxu1 }
 0x12b   :  { %v867_v43 = vmax.f32 %v843_v37, 0.0  ;;  %v765_v44 = vmax.f32 %v533_v38, %v535_v40  ;;  %v789_v45 = vmax.f32 %v686_v39, %v688_v41  ;;  %v537_v46 = vpop.f32.mrb[22].mxu0  ;;  %v690_v47 = vpop.f32.mrb[22].mxu1 }
 0x12c   :  { %v539_v48 = vpop.f32.mrb[23].mxu0  ;;  %v692_v49 = vpop.f32.mrb[23].mxu1 }
 0x12d   :  { %v1172_v50 = vpack.c.bf16 %v867_v43, %v866_v42  ;;  %v813_v51 = vmax.f32 %v765_v44, %v789_v45  ;;  %v766_v52 = vmax.f32 %v537_v46, %v539_v48  ;;  %v790_v53 = vmax.f32 %v690_v47, %v692_v49 }
 0x12f   :  { %1212 = vst [vmem:[%s1630_s3 + $0x20] sm:$0xff] %v1172_v50   ;;  %v844_v54 = vadd.f32 %v1565_v16, %v813_v51  ;;  %v814_v55 = vmax.f32 %v766_v52, %v790_v53 }
 0x131   :  { %v845_v56 = vadd.f32 %v1565_v16, %v814_v55  ;;  %v543_v57 = vpop.f32.mrb[24].mxu0  ;;  %v696_v58 = vpop.f32.mrb[24].mxu1  ;;  %v868_v61 = vmax.f32 %v844_v54, 0.0 }
 0x132   :  { %v545_v59 = vpop.f32.mrb[25].mxu0  ;;  %v698_v60 = vpop.f32.mrb[25].mxu1 }
 0x133   :  { %v869_v62 = vmax.f32 %v845_v56, 0.0  ;;  %v767_v63 = vmax.f32 %v543_v57, %v545_v59  ;;  %v791_v0 = vmax.f32 %v696_v58, %v698_v60  ;;  %v547_v1 = vpop.f32.mrb[26].mxu0  ;;  %v700_v2 = vpop.f32.mrb[26].mxu1 }
 0x134   :  { %v549_v3 = vpop.f32.mrb[27].mxu0  ;;  %v702_v4 = vpop.f32.mrb[27].mxu1 }
 0x135   :  { %v1177_v5 = vpack.c.bf16 %v869_v62, %v868_v61  ;;  %v815_v6 = vmax.f32 %v767_v63, %v791_v0  ;;  %v768_v7 = vmax.f32 %v547_v1, %v549_v3  ;;  %v792_v8 = vmax.f32 %v700_v2, %v702_v4 }
 0x137   :  { %1213 = vst [vmem:[%s1630_s3 + $0x28] sm:$0xff] %v1177_v5   ;;  %v846_v9 = vadd.f32 %v1565_v16, %v815_v6  ;;  %v816_v10 = vmax.f32 %v768_v7, %v792_v8 }
 0x139   :  { %v847_v11 = vadd.f32 %v1565_v16, %v816_v10  ;;  %v553_v12 = vpop.f32.mrb[28].mxu0  ;;  %v706_v13 = vpop.f32.mrb[28].mxu1  ;;  %v870_v17 = vmax.f32 %v846_v9, 0.0 }
 0x13a   :  { %v555_v14 = vpop.f32.mrb[29].mxu0  ;;  %v708_v15 = vpop.f32.mrb[29].mxu1 }
 0x13b   :  { %v871_v18 = vmax.f32 %v847_v11, 0.0  ;;  %v769_v19 = vmax.f32 %v553_v12, %v555_v14  ;;  %v793_v20 = vmax.f32 %v706_v13, %v708_v15  ;;  %v557_v21 = vpop.f32.mrb[30].mxu0  ;;  %v710_v22 = vpop.f32.mrb[30].mxu1 }
 0x13c   :  { %v559_v23 = vpop.f32.mrb[31].mxu0  ;;  %v712_v24 = vpop.f32.mrb[31].mxu1 }
 0x13d   :  { %v1182_v25 = vpack.c.bf16 %v871_v18, %v870_v17  ;;  %v817_v26 = vmax.f32 %v769_v19, %v793_v20  ;;  %v770_v27 = vmax.f32 %v557_v21, %v559_v23  ;;  %v794_v28 = vmax.f32 %v710_v22, %v712_v24 }
 0x13f   :  { %1214 = vst [vmem:[%s1630_s3 + $0x30] sm:$0xff] %v1182_v25   ;;  %v848_v29 = vadd.f32 %v1565_v16, %v817_v26  ;;  %v818_v30 = vmax.f32 %v770_v27, %v794_v28 }
 0x141   :  { %v849_v31 = vadd.f32 %v1565_v16, %v818_v30  ;;  %v563_v32 = vpop.f32.mrb[32].mxu0  ;;  %v716_v33 = vpop.f32.mrb[32].mxu1  ;;  %v872_v36 = vmax.f32 %v848_v29, 0.0 }
 0x142   :  { %v565_v34 = vpop.f32.mrb[33].mxu0  ;;  %v718_v35 = vpop.f32.mrb[33].mxu1 }
 0x143   :  { %v873_v37 = vmax.f32 %v849_v31, 0.0  ;;  %v771_v38 = vmax.f32 %v563_v32, %v565_v34  ;;  %v795_v39 = vmax.f32 %v716_v33, %v718_v35  ;;  %v567_v40 = vpop.f32.mrb[34].mxu0  ;;  %v720_v41 = vpop.f32.mrb[34].mxu1 }
 0x144   :  { %v569_v42 = vpop.f32.mrb[35].mxu0  ;;  %v722_v43 = vpop.f32.mrb[35].mxu1 }
 0x145   :  { %v1187_v44 = vpack.c.bf16 %v873_v37, %v872_v36  ;;  %v819_v45 = vmax.f32 %v771_v38, %v795_v39  ;;  %v772_v46 = vmax.f32 %v567_v40, %v569_v42  ;;  %v796_v47 = vmax.f32 %v720_v41, %v722_v43 }
 0x147   :  { %1215 = vst [vmem:[%s1630_s3 + $0x38] sm:$0xff] %v1187_v44   ;;  %v850_v48 = vadd.f32 %v1565_v16, %v819_v45  ;;  %v820_v49 = vmax.f32 %v772_v46, %v796_v47 }
 0x149   :  { %v851_v50 = vadd.f32 %v1565_v16, %v820_v49  ;;  %v573_v51 = vpop.f32.mrb[36].mxu0  ;;  %v726_v52 = vpop.f32.mrb[36].mxu1  ;;  %v874_v55 = vmax.f32 %v850_v48, 0.0 }
 0x14a   :  { %v575_v53 = vpop.f32.mrb[37].mxu0  ;;  %v728_v54 = vpop.f32.mrb[37].mxu1 }
 0x14b   :  { %v875_v56 = vmax.f32 %v851_v50, 0.0  ;;  %v773_v57 = vmax.f32 %v573_v51, %v575_v53  ;;  %v797_v58 = vmax.f32 %v726_v52, %v728_v54  ;;  %v577_v59 = vpop.f32.mrb[38].mxu0  ;;  %v730_v60 = vpop.f32.mrb[38].mxu1 }
 0x14c   :  { %v579_v61 = vpop.f32.mrb[39].mxu0  ;;  %v732_v62 = vpop.f32.mrb[39].mxu1 }
 0x14d   :  { %v1192_v63 = vpack.c.bf16 %v875_v56, %v874_v55  ;;  %v821_v0 = vmax.f32 %v773_v57, %v797_v58  ;;  %v774_v1 = vmax.f32 %v577_v59, %v579_v61  ;;  %v798_v2 = vmax.f32 %v730_v60, %v732_v62 }
 0x14f   :  { %1216 = vst [vmem:[%s1630_s3 + $0x40] sm:$0xff] %v1192_v63   ;;  %v852_v3 = vadd.f32 %v1565_v16, %v821_v0  ;;  %v822_v4 = vmax.f32 %v774_v1, %v798_v2 }
 0x151   :  { %v853_v5 = vadd.f32 %v1565_v16, %v822_v4  ;;  %v583_v6 = vpop.f32.mrb[40].mxu0  ;;  %v736_v7 = vpop.f32.mrb[40].mxu1  ;;  %v876_v10 = vmax.f32 %v852_v3, 0.0 }
 0x152   :  { %v585_v8 = vpop.f32.mrb[41].mxu0  ;;  %v738_v9 = vpop.f32.mrb[41].mxu1 }
 0x153   :  { %v877_v11 = vmax.f32 %v853_v5, 0.0  ;;  %v775_v12 = vmax.f32 %v583_v6, %v585_v8  ;;  %v799_v13 = vmax.f32 %v736_v7, %v738_v9  ;;  %v587_v14 = vpop.f32.mrb[42].mxu0  ;;  %v740_v15 = vpop.f32.mrb[42].mxu1 }
 0x154   :  { %v589_v17 = vpop.f32.mrb[43].mxu0  ;;  %v742_v18 = vpop.f32.mrb[43].mxu1 }
 0x155   :  { %v1197_v19 = vpack.c.bf16 %v877_v11, %v876_v10  ;;  %v823_v20 = vmax.f32 %v775_v12, %v799_v13  ;;  %v776_v21 = vmax.f32 %v587_v14, %v589_v17  ;;  %v800_v22 = vmax.f32 %v740_v15, %v742_v18 }
 0x157   :  { %1217 = vst [vmem:[%s1630_s3 + $0x48] sm:$0xff] %v1197_v19   ;;  %v854_v23 = vadd.f32 %v1565_v16, %v823_v20  ;;  %v824_v24 = vmax.f32 %v776_v21, %v800_v22 }
 0x159   :  { %v855_v25 = vadd.f32 %v1565_v16, %v824_v24  ;;  %v593_v26 = vpop.f32.mrb[44].mxu0  ;;  %v746_v27 = vpop.f32.mrb[44].mxu1  ;;  %v878_v30 = vmax.f32 %v854_v23, 0.0 }
 0x15a   :  { %v595_v28 = vpop.f32.mrb[45].mxu0  ;;  %v748_v29 = vpop.f32.mrb[45].mxu1 }
 0x15b   :  { %v879_v31 = vmax.f32 %v855_v25, 0.0  ;;  %v777_v32 = vmax.f32 %v593_v26, %v595_v28  ;;  %v801_v33 = vmax.f32 %v746_v27, %v748_v29  ;;  %v597_v34 = vpop.f32.mrb[46].mxu0  ;;  %v750_v35 = vpop.f32.mrb[46].mxu1 }
 0x15c   :  { %v599_v36 = vpop.f32.mrb[47].mxu0  ;;  %v752_v37 = vpop.f32.mrb[47].mxu1 }
 0x15d   :  { %v1202_v38 = vpack.c.bf16 %v879_v31, %v878_v30  ;;  %v825_v39 = vmax.f32 %v777_v32, %v801_v33  ;;  %v778_v40 = vmax.f32 %v597_v34, %v599_v36  ;;  %v802_v41 = vmax.f32 %v750_v35, %v752_v37 }
 0x15f   :  { %1218 = vst [vmem:[%s1630_s3 + $0x50] sm:$0xff] %v1202_v38   ;;  %v856_v42 = vadd.f32 %v1565_v16, %v825_v39  ;;  %v826_v43 = vmax.f32 %v778_v40, %v802_v41 }
 0x161   :  { %v857_v44 = vadd.f32 %v1565_v16, %v826_v43  ;;  %v880_v45 = vmax.f32 %v856_v42, 0.0 }
 0x163   :  { %v881_v46 = vmax.f32 %v857_v44, 0.0 }
 0x165   :  { %v1207_v47 = vpack.c.bf16 %v881_v46, %v880_v45 }
 0x167   :  { %1219 = vst [vmem:[%s1630_s3 + $0x58] sm:$0xff] %v1207_v47  }

// kernel: lenet3_forward.3
= control target key start
LH: loop header
LB: loop body
LE: loop exit
PB: predicated region body
PF: predicated region fallthrough
CT: control target
= control target key end

     0   :  { %vm4072_vm0 = vmmov 0   ;;  %vm2887_vm1 = vcmask 523264   ;;  %vm2932_vm2 = vcmask 80896   ;;  %s6833_s1 = inlined_call_operand.vmem [shape: bf16[768,512], index: 1, kind: input, shape index: {}]   ;;  %s6834_s0 = inlined_call_operand.vmem [shape: bf16[4,16,768], index: 0, kind: input, shape index: {}]   ;;  %s6835_s3 = inlined_call_operand.vmem [shape: bf16[4,128,64], index: 3, kind: input, shape index: {}]   ;;  %s6836_s2 = inlined_call_operand.vmem [shape: f32[1,128], index: 2, kind: input, shape index: {}]   ;;  %s6837_s5 = inlined_call_operand.vmem [shape: bf16[64,128], index: 5, kind: input, shape index: {}]   ;;  %s6838_s4 = inlined_call_operand.vmem [shape: f32[1,64], index: 4, kind: input, shape index: {}]   ;;  %s6839_s6 = inlined_call_operand.vmem [shape: f32[1,128], index: 6, kind: input, shape index: {}]   ;;  %s6840_s7 = inlined_call_operand.vmem [shape: f32[16,128], index: 7, kind: output, shape index: {}]  }
   0x1   :  { %v3486_v0 = vld [vmem:[%s6833_s1 + $0x4] ss:$16 sps:$4 sm:$0xff]   ;;  %v3488_v1 = vld [vmem:[%s6833_s1 + $0xc] ss:$16 sps:$4 sm:$0xff]   ;;  %v3490_v2 = vld [vmem:[%s6833_s1] ss:$16 sps:$4 sm:$0xff]  }
   0x2   :  { %1215 = vmatprep.subr.bf16.mxu0 %v3486_v0  ;;  %v3491_v3 = vld [vmem:[%s6833_s1 + $0x8] ss:$16 sps:$4 sm:$0xff]   ;;  %1344 = vmatprep.subr.bf16.mxu1 %v3488_v1  ;;  %v3492_v4 = vld [vmem:[%s6833_s1 + $0x24] ss:$16 sps:$4 sm:$0xff]   ;;  %v3494_v5 = vld [vmem:[%s6833_s1 + $0x2c] ss:$16 sps:$4 sm:$0xff]  }
   0x3   :  { %1216 = vmatpush1.bf16.msra.mxu0 %v3490_v2  ;;  %1345 = vmatpush1.bf16.msra.mxu1 %v3491_v3  ;;  %v3496_v6 = vld [vmem:[%s6833_s1 + $0x20] ss:$16 sps:$4 sm:$0xff]   ;;  %v3497_v7 = vld [vmem:[%s6833_s1 + $0x28] ss:$16 sps:$4 sm:$0xff]   ;;  %v3498_v8 = vld [vmem:[%s6833_s1 + $0x44] ss:$16 sps:$4 sm:$0xff]  }
   0x4   :  { %1217 = vmatprep.subr.bf16.mxu0 %v3492_v4  ;;  %1346 = vmatprep.subr.bf16.mxu1 %v3494_v5  ;;  %v3500_v9 = vld [vmem:[%s6833_s1 + $0x4c] ss:$16 sps:$4 sm:$0xff]   ;;  %v3502_v10 = vld [vmem:[%s6833_s1 + $0x40] ss:$16 sps:$4 sm:$0xff]   ;;  %v3503_v11 = vld [vmem:[%s6833_s1 + $0x48] ss:$16 sps:$4 sm:$0xff]  }
   0x5   :  { %v3504_v12 = vld [vmem:[%s6833_s1 + $0x64] ss:$16 sps:$4 sm:$0xff]   ;;  %v3506_v13 = vld [vmem:[%s6833_s1 + $0x6c] ss:$16 sps:$4 sm:$0xff]   ;;  %v3508_v14 = vld [vmem:[%s6833_s1 + $0x60] ss:$16 sps:$4 sm:$0xff]  }
   0x6   :  { %v3509_v15 = vld [vmem:[%s6833_s1 + $0x68] ss:$16 sps:$4 sm:$0xff]   ;;  %v3510_v16 = vld [vmem:[%s6833_s1 + $0x84] ss:$16 sps:$4 sm:$0xff]   ;;  %v3512_v17 = vld [vmem:[%s6833_s1 + $0x8c] ss:$16 sps:$4 sm:$0xff]  }
   0x7   :  { %1218 = vmatpush1.bf16.msra.mxu0 %v3496_v6  ;;  %1347 = vmatpush1.bf16.msra.mxu1 %v3497_v7  ;;  %v3514_v18 = vld [vmem:[%s6833_s1 + $0x80] ss:$16 sps:$4 sm:$0xff]   ;;  %v3515_v19 = vld [vmem:[%s6833_s1 + $0x88] ss:$16 sps:$4 sm:$0xff]   ;;  %v3516_v20 = vld [vmem:[%s6833_s1 + $0xa4] ss:$16 sps:$4 sm:$0xff]  }
   0x8   :  { %1219 = vmatprep.subr.bf16.mxu0 %v3498_v8  ;;  %1348 = vmatprep.subr.bf16.mxu1 %v3500_v9  ;;  %v3518_v21 = vld [vmem:[%s6833_s1 + $0xac] ss:$16 sps:$4 sm:$0xff]   ;;  %v3520_v22 = vld [vmem:[%s6833_s1 + $0xa0] ss:$16 sps:$4 sm:$0xff]   ;;  %v3521_v23 = vld [vmem:[%s6833_s1 + $0xa8] ss:$16 sps:$4 sm:$0xff]  }
   0x9   :  { %v3522_v24 = vld [vmem:[%s6833_s1 + $0xc4] ss:$16 sps:$4 sm:$0xff]   ;;  %v3524_v25 = vld [vmem:[%s6833_s1 + $0xcc] ss:$16 sps:$4 sm:$0xff]   ;;  %v3526_v26 = vld [vmem:[%s6833_s1 + $0xc0] ss:$16 sps:$4 sm:$0xff]  }
   0xa   :  { %v3527_v27 = vld [vmem:[%s6833_s1 + $0xc8] ss:$16 sps:$4 sm:$0xff]   ;;  %v3528_v28 = vld [vmem:[%s6833_s1 + $0xe4] ss:$16 sps:$4 sm:$0xff]   ;;  %v3530_v29 = vld [vmem:[%s6833_s1 + $0xec] ss:$16 sps:$4 sm:$0xff]  }
   0xb   :  { %1220 = vmatpush1.bf16.msra.mxu0 %v3502_v10  ;;  %1349 = vmatpush1.bf16.msra.mxu1 %v3503_v11  ;;  %v3532_v30 = vld [vmem:[%s6833_s1 + $0xe0] ss:$16 sps:$4 sm:$0xff]   ;;  %v3533_v31 = vld [vmem:[%s6833_s1 + $0xe8] ss:$16 sps:$4 sm:$0xff]   ;;  %v3534_v32 = vld [vmem:[%s6833_s1 + $0x104] ss:$16 sps:$4 sm:$0xff]  }
   0xc   :  { %1221 = vmatprep.subr.bf16.mxu0 %v3504_v12  ;;  %1350 = vmatprep.subr.bf16.mxu1 %v3506_v13  ;;  %v3536_v33 = vld [vmem:[%s6833_s1 + $0x10c] ss:$16 sps:$4 sm:$0xff]   ;;  %v3538_v34 = vld [vmem:[%s6833_s1 + $0x100] ss:$16 sps:$4 sm:$0xff]   ;;  %v3539_v35 = vld [vmem:[%s6833_s1 + $0x108] ss:$16 sps:$4 sm:$0xff]  }
   0xd   :  { %v3540_v36 = vld [vmem:[%s6833_s1 + $0x124] ss:$16 sps:$4 sm:$0xff]   ;;  %v3542_v37 = vld [vmem:[%s6833_s1 + $0x12c] ss:$16 sps:$4 sm:$0xff]   ;;  %v3544_v38 = vld [vmem:[%s6833_s1 + $0x120] ss:$16 sps:$4 sm:$0xff]  }
   0xe   :  { %v3545_v39 = vld [vmem:[%s6833_s1 + $0x128] ss:$16 sps:$4 sm:$0xff]   ;;  %v3546_v40 = vld [vmem:[%s6833_s1 + $0x144] ss:$16 sps:$4 sm:$0xff]   ;;  %v3548_v41 = vld [vmem:[%s6833_s1 + $0x14c] ss:$16 sps:$4 sm:$0xff]  }
   0xf   :  { %1222 = vmatpush1.bf16.msra.mxu0 %v3508_v14  ;;  %1351 = vmatpush1.bf16.msra.mxu1 %v3509_v15  ;;  %v3550_v42 = vld [vmem:[%s6833_s1 + $0x140] ss:$16 sps:$4 sm:$0xff]   ;;  %v3551_v43 = vld [vmem:[%s6833_s1 + $0x148] ss:$16 sps:$4 sm:$0xff]   ;;  %v3552_v44 = vld [vmem:[%s6833_s1 + $0x164] ss:$16 sps:$4 sm:$0xff]  }
  0x10   :  { %1223 = vmatprep.subr.bf16.mxu0 %v3510_v16  ;;  %1352 = vmatprep.subr.bf16.mxu1 %v3512_v17  ;;  %v3554_v45 = vld [vmem:[%s6833_s1 + $0x16c] ss:$16 sps:$4 sm:$0xff]   ;;  %v3556_v46 = vld [vmem:[%s6833_s1 + $0x160] ss:$16 sps:$4 sm:$0xff]   ;;  %v3557_v47 = vld [vmem:[%s6833_s1 + $0x168] ss:$16 sps:$4 sm:$0xff]  }
  0x11   :  { %v3584_v48 = vld [vmem:[%s6834_s0 + $0x4] ss:$24 sps:$4 sm:$0xff]   ;;  %v4273_v51 = vld [vmem:[%s6833_s1 + $0x180] ss:$16 sps:$4 sm:$0xff]   ;;  %v4278_v52 = vld [vmem:[%s6833_s1 + $0x188] ss:$16 sps:$4 sm:$0xff]  }
  0x12   :  { %v4263_v49 = vld [vmem:[%s6833_s1 + $0x184] ss:$16 sps:$4 sm:$0xff]   ;;  %v4268_v50 = vld [vmem:[%s6833_s1 + $0x18c] ss:$16 sps:$4 sm:$0xff]   ;;  %1247 = vmatprep.mubr.bf16.mxu0 %v3584_v48  ;;  %1376 = vmatprep.mubr.bf16.mxu1 %v3584_v48  ;;  %v4295_v55 = vld [vmem:[%s6833_s1 + $0x1a0] ss:$16 sps:$4 sm:$0xff]  }
  0x13   :  { %1224 = vmatpush1.bf16.msra.mxu0 %v3514_v18  ;;  %1353 = vmatpush1.bf16.msra.mxu1 %v3515_v19  ;;  %v4283_v53 = vld [vmem:[%s6833_s1 + $0x1a4] ss:$16 sps:$4 sm:$0xff]   ;;  %v4290_v54 = vld [vmem:[%s6833_s1 + $0x1ac] ss:$16 sps:$4 sm:$0xff]   ;;  %v4300_v56 = vld [vmem:[%s6833_s1 + $0x1a8] ss:$16 sps:$4 sm:$0xff]  }
  0x14   :  { %1225 = vmatprep.subr.bf16.mxu0 %v3516_v20  ;;  %1354 = vmatprep.subr.bf16.mxu1 %v3518_v21  ;;  %v4307_v57 = vld [vmem:[%s6833_s1 + $0x1c4] ss:$16 sps:$4 sm:$0xff]   ;;  %v4314_v58 = vld [vmem:[%s6833_s1 + $0x1cc] ss:$16 sps:$4 sm:$0xff]   ;;  %v4319_v59 = vld [vmem:[%s6833_s1 + $0x1c0] ss:$16 sps:$4 sm:$0xff]  }
  0x15   :  { %v4326_v60 = vld [vmem:[%s6833_s1 + $0x1c8] ss:$16 sps:$4 sm:$0xff]   ;;  %v4331_v61 = vld [vmem:[%s6833_s1 + $0x1e4] ss:$16 sps:$4 sm:$0xff]   ;;  %v4338_v62 = vld [vmem:[%s6833_s1 + $0x1ec] ss:$16 sps:$4 sm:$0xff]  }
  0x16   :  { %v4343_v63 = vld [vmem:[%s6833_s1 + $0x1e0] ss:$16 sps:$4 sm:$0xff]   ;;  %v4348_v0 = vld [vmem:[%s6833_s1 + $0x1e8] ss:$16 sps:$4 sm:$0xff]   ;;  %v4355_v1 = vld [vmem:[%s6833_s1 + $0x204] ss:$16 sps:$4 sm:$0xff]  }
  0x17   :  { %1226 = vmatpush1.bf16.msra.mxu0 %v3520_v22  ;;  %1355 = vmatpush1.bf16.msra.mxu1 %v3521_v23  ;;  %v4362_v2 = vld [vmem:[%s6833_s1 + $0x20c] ss:$16 sps:$4 sm:$0xff]   ;;  %v3582_v3 = vld [vmem:[%s6834_s0] ss:$24 sps:$4 sm:$0xff]   ;;  %v4382_v6 = vld [vmem:[%s6833_s1 + $0x224] ss:$16 sps:$4 sm:$0xff]  }
  0x18   :  { %1227 = vmatprep.subr.bf16.mxu0 %v3522_v24  ;;  %1356 = vmatprep.subr.bf16.mxu1 %v3524_v25  ;;  %v4370_v4 = vld [vmem:[%s6833_s1 + $0x200] ss:$16 sps:$4 sm:$0xff]   ;;  %v4377_v5 = vld [vmem:[%s6833_s1 + $0x208] ss:$16 sps:$4 sm:$0xff]   ;;  %v4389_v7 = vld [vmem:[%s6833_s1 + $0x22c] ss:$16 sps:$4 sm:$0xff]  }
  0x19   :  { %v4394_v8 = vld [vmem:[%s6833_s1 + $0x220] ss:$16 sps:$4 sm:$0xff]   ;;  %v4399_v9 = vld [vmem:[%s6833_s1 + $0x228] ss:$16 sps:$4 sm:$0xff]   ;;  %v4406_v10 = vld [vmem:[%s6833_s1 + $0x244] ss:$16 sps:$4 sm:$0xff]  }
  0x1a   :  { %v4413_v11 = vld [vmem:[%s6833_s1 + $0x24c] ss:$16 sps:$4 sm:$0xff]   ;;  %v4418_v12 = vld [vmem:[%s6833_s1 + $0x240] ss:$16 sps:$4 sm:$0xff]   ;;  %v4425_v13 = vld [vmem:[%s6833_s1 + $0x248] ss:$16 sps:$4 sm:$0xff]  }
  0x1b   :  { %1228 = vmatpush1.bf16.msra.mxu0 %v3526_v26  ;;  %1357 = vmatpush1.bf16.msra.mxu1 %v3527_v27  ;;  %v4430_v14 = vld [vmem:[%s6833_s1 + $0x264] ss:$16 sps:$4 sm:$0xff]   ;;  %v4437_v15 = vld [vmem:[%s6833_s1 + $0x26c] ss:$16 sps:$4 sm:$0xff]   ;;  %v4442_v16 = vld [vmem:[%s6833_s1 + $0x260] ss:$16 sps:$4 sm:$0xff]  }
  0x1c   :  { %1229 = vmatprep.subr.bf16.mxu0 %v3528_v28  ;;  %1358 = vmatprep.subr.bf16.mxu1 %v3530_v29  ;;  %v4447_v17 = vld [vmem:[%s6833_s1 + $0x268] ss:$16 sps:$4 sm:$0xff]   ;;  %v4454_v18 = vld [vmem:[%s6833_s1 + $0x284] ss:$16 sps:$4 sm:$0xff]   ;;  %v4461_v19 = vld [vmem:[%s6833_s1 + $0x28c] ss:$16 sps:$4 sm:$0xff]  }
  0x1d   :  { %v4466_v20 = vld [vmem:[%s6833_s1 + $0x280] ss:$16 sps:$4 sm:$0xff]   ;;  %v4473_v21 = vld [vmem:[%s6833_s1 + $0x288] ss:$16 sps:$4 sm:$0xff]   ;;  %v4478_v22 = vld [vmem:[%s6833_s1 + $0x2a4] ss:$16 sps:$4 sm:$0xff]  }
  0x1e   :  { %v4485_v23 = vld [vmem:[%s6833_s1 + $0x2ac] ss:$16 sps:$4 sm:$0xff]   ;;  %v4490_v24 = vld [vmem:[%s6833_s1 + $0x2a0] ss:$16 sps:$4 sm:$0xff]   ;;  %v4495_v25 = vld [vmem:[%s6833_s1 + $0x2a8] ss:$16 sps:$4 sm:$0xff]  }
  0x1f   :  { %1230 = vmatpush1.bf16.msra.mxu0 %v3532_v30  ;;  %1359 = vmatpush1.bf16.msra.mxu1 %v3533_v31  ;;  %v4502_v26 = vld [vmem:[%s6833_s1 + $0x2c4] ss:$16 sps:$4 sm:$0xff]   ;;  %v4509_v27 = vld [vmem:[%s6833_s1 + $0x2cc] ss:$16 sps:$4 sm:$0xff]   ;;  %v4514_v28 = vld [vmem:[%s6833_s1 + $0x2c0] ss:$16 sps:$4 sm:$0xff]  }
  0x20   :  { %1231 = vmatprep.subr.bf16.mxu0 %v3534_v32  ;;  %1360 = vmatprep.subr.bf16.mxu1 %v3536_v33  ;;  %v4519_v29 = vld [vmem:[%s6833_s1 + $0x2c8] ss:$16 sps:$4 sm:$0xff]   ;;  %v3683_v30 = vld [vmem:[%s6834_s0 + $0xc] ss:$24 sps:$4 sm:$0xff]   ;;  %v4541_v33 = vld [vmem:[%s6833_s1 + $0x2e0] ss:$16 sps:$4 sm:$0xff]  }
  0x21   :  { %v4529_v31 = vld [vmem:[%s6833_s1 + $0x2e4] ss:$16 sps:$4 sm:$0xff]   ;;  %v4536_v32 = vld [vmem:[%s6833_s1 + $0x2ec] ss:$16 sps:$4 sm:$0xff]  }
  0x22   :  { %v4632_v48 = vld [vmem:[%s6833_s1 + $0x36c] ss:$16 sps:$4 sm:$0xff]  }
  0x23   :  { %1232 = vmatpush1.bf16.msra.mxu0 %v3538_v34  ;;  %1361 = vmatpush1.bf16.msra.mxu1 %v3539_v35  ;;  %v4548_v34 = vld [vmem:[%s6833_s1 + $0x2e8] ss:$16 sps:$4 sm:$0xff]   ;;  %v4553_v35 = vld [vmem:[%s6833_s1 + $0x304] ss:$16 sps:$4 sm:$0xff]   ;;  %7056 = vst [vmem:[#allocation9_spill] sm:$0xff] %v4632_v48 }
  0x24   :  { %1233 = vmatprep.subr.bf16.mxu0 %v3540_v36  ;;  %1362 = vmatprep.subr.bf16.mxu1 %v3542_v37  ;;  %v4560_v36 = vld [vmem:[%s6833_s1 + $0x30c] ss:$16 sps:$4 sm:$0xff]   ;;  %v4565_v37 = vld [vmem:[%s6833_s1 + $0x300] ss:$16 sps:$4 sm:$0xff]  }
  0x27   :  { %1234 = vmatpush1.bf16.msra.mxu0 %v3544_v38  ;;  %1363 = vmatpush1.bf16.msra.mxu1 %v3545_v39  ;;  %v4570_v38 = vld [vmem:[%s6833_s1 + $0x308] ss:$16 sps:$4 sm:$0xff]   ;;  %v4577_v39 = vld [vmem:[%s6833_s1 + $0x324] ss:$16 sps:$4 sm:$0xff]  }
  0x28   :  { %1235 = vmatprep.subr.bf16.mxu0 %v3546_v40  ;;  %1364 = vmatprep.subr.bf16.mxu1 %v3548_v41  ;;  %v4584_v40 = vld [vmem:[%s6833_s1 + $0x32c] ss:$16 sps:$4 sm:$0xff]   ;;  %v4589_v41 = vld [vmem:[%s6833_s1 + $0x320] ss:$16 sps:$4 sm:$0xff]  }
  0x29   :  { %7049 = vst [vmem:[#allocation2_spill] sm:$0xff] %v4589_v41 }
  0x2b   :  { %1236 = vmatpush1.bf16.msra.mxu0 %v3550_v42  ;;  %1365 = vmatpush1.bf16.msra.mxu1 %v3551_v43  ;;  %v4596_v42 = vld [vmem:[%s6833_s1 + $0x328] ss:$16 sps:$4 sm:$0xff]   ;;  %v4601_v43 = vld [vmem:[%s6833_s1 + $0x344] ss:$16 sps:$4 sm:$0xff]  }
  0x2c   :  { %1237 = vmatprep.subr.bf16.mxu0 %v3552_v44  ;;  %1366 = vmatprep.subr.bf16.mxu1 %v3554_v45  ;;  %7050 = vst [vmem:[#allocation3_spill] sm:$0xff] %v4596_v42  ;;  %7051 = vst [vmem:[#allocation4_spill] sm:$0xff] %v4601_v43  ;;  %v4608_v44 = vld [vmem:[%s6833_s1 + $0x34c] ss:$16 sps:$4 sm:$0xff]   ;;  %v4613_v45 = vld [vmem:[%s6833_s1 + $0x340] ss:$16 sps:$4 sm:$0xff]  }
  0x2d   :  { %7052 = vst [vmem:[#allocation5_spill] sm:$0xff] %v4608_v44  ;;  %7053 = vst [vmem:[#allocation6_spill] sm:$0xff] %v4613_v45 }
  0x2f   :  { %1238 = vmatpush1.bf16.msra.mxu0 %v3556_v46  ;;  %1367 = vmatpush1.bf16.msra.mxu1 %v3557_v47  ;;  %v4618_v46 = vld [vmem:[%s6833_s1 + $0x348] ss:$16 sps:$4 sm:$0xff]   ;;  %v4625_v47 = vld [vmem:[%s6833_s1 + $0x364] ss:$16 sps:$4 sm:$0xff]  }
  0x30   :  { %1239 = vmatprep.subr.bf16.mxu0 %v4263_v49  ;;  %1368 = vmatprep.subr.bf16.mxu1 %v4268_v50  ;;  %7054 = vst [vmem:[#allocation7_spill] sm:$0xff] %v4618_v46  ;;  %7055 = vst [vmem:[#allocation8_spill] sm:$0xff] %v4625_v47 }
  0x33   :  { %1240 = vmatpush1.bf16.msra.mxu0 %v4273_v51  ;;  %1369 = vmatpush1.bf16.msra.mxu1 %v4278_v52 }
  0x34   :  { %1241 = vmatprep.subr.bf16.mxu0 %v4283_v53  ;;  %1370 = vmatprep.subr.bf16.mxu1 %v4290_v54 }
  0x37   :  { %1242 = vmatpush1.bf16.msra.mxu0 %v4295_v55  ;;  %1371 = vmatpush1.bf16.msra.mxu1 %v4300_v56 }
  0x38   :  { %1243 = vmatprep.subr.bf16.mxu0 %v4307_v57  ;;  %1372 = vmatprep.subr.bf16.mxu1 %v4314_v58 }
  0x3b   :  { %1244 = vmatpush1.bf16.msra.mxu0 %v4319_v59  ;;  %1373 = vmatpush1.bf16.msra.mxu1 %v4326_v60 }
  0x3c   :  { %1245 = vmatprep.subr.bf16.mxu0 %v4331_v61  ;;  %1374 = vmatprep.subr.bf16.mxu1 %v4338_v62 }
  0x3f   :  { %1246 = vmatpush1.bf16.msra.mxu0 %v4343_v63  ;;  %1375 = vmatpush1.bf16.msra.mxu1 %v4348_v0 }
  0x40   :  { %1258 = vmatprep.subr.bf16.mxu0 %v4355_v1  ;;  %1387 = vmatprep.subr.bf16.mxu1 %v4362_v2 }
  0x42   :  { %1248 = vmatmul.mubr.bf16.vlgmr.msra.gmra.mrb[0].mxu0 %v3582_v3  ;;  %1377 = vmatmul.mubr.bf16.vlgmr.msra.gmra.mrb[0].mxu1 %v3582_v3  ;;  %v4637_v3 = vld [vmem:[%s6833_s1 + $0x360] ss:$16 sps:$4 sm:$0xff]  }
  0x43   :  { %1259 = vmatpush1.bf16.msra.mxu0 %v4370_v4  ;;  %1388 = vmatpush1.bf16.msra.mxu1 %v4377_v5  ;;  %7057 = vst [vmem:[#allocation10_spill] sm:$0xff] %v4637_v3 }
  0x44   :  { %1260 = vmatprep.subr.bf16.mxu0 %v4382_v6  ;;  %1389 = vmatprep.subr.bf16.mxu1 %v4389_v7 }
  0x45   :  { %1290 = vmatprep.mubr.bf16.mxu0 %v3683_v30  ;;  %1419 = vmatprep.mubr.bf16.mxu1 %v3683_v30  ;;  %v4644_v30 = vld [vmem:[%s6833_s1 + $0x368] ss:$16 sps:$4 sm:$0xff]  }
  0x46   :  { %7058 = vst [vmem:[#allocation11_spill] sm:$0xff] %v4644_v30 }
  0x47   :  { %1261 = vmatpush1.bf16.msra.mxu0 %v4394_v8  ;;  %1390 = vmatpush1.bf16.msra.mxu1 %v4399_v9 }
  0x48   :  { %1262 = vmatprep.subr.bf16.mxu0 %v4406_v10  ;;  %1391 = vmatprep.subr.bf16.mxu1 %v4413_v11 }
  0x4b   :  { %1263 = vmatpush1.bf16.msra.mxu0 %v4418_v12  ;;  %1392 = vmatpush1.bf16.msra.mxu1 %v4425_v13 }
  0x4c   :  { %1264 = vmatprep.subr.bf16.mxu0 %v4430_v14  ;;  %1393 = vmatprep.subr.bf16.mxu1 %v4437_v15 }
  0x4f   :  { %1265 = vmatpush1.bf16.msra.mxu0 %v4442_v16  ;;  %1394 = vmatpush1.bf16.msra.mxu1 %v4447_v17 }
  0x50   :  { %1266 = vmatprep.subr.bf16.mxu0 %v4454_v18  ;;  %1395 = vmatprep.subr.bf16.mxu1 %v4461_v19 }
  0x53   :  { %1267 = vmatpush1.bf16.msra.mxu0 %v4466_v20  ;;  %1396 = vmatpush1.bf16.msra.mxu1 %v4473_v21 }
  0x54   :  { %1268 = vmatprep.subr.bf16.mxu0 %v4478_v22  ;;  %1397 = vmatprep.subr.bf16.mxu1 %v4485_v23 }
  0x57   :  { %1269 = vmatpush1.bf16.msra.mxu0 %v4490_v24  ;;  %1398 = vmatpush1.bf16.msra.mxu1 %v4495_v25 }
  0x58   :  { %1270 = vmatprep.subr.bf16.mxu0 %v4502_v26  ;;  %1399 = vmatprep.subr.bf16.mxu1 %v4509_v27 }
  0x5b   :  { %1271 = vmatpush1.bf16.msra.mxu0 %v4514_v28  ;;  %1400 = vmatpush1.bf16.msra.mxu1 %v4519_v29 }
  0x5c   :  { %1272 = vmatprep.subr.bf16.mxu0 %v4529_v31  ;;  %1401 = vmatprep.subr.bf16.mxu1 %v4536_v32 }
  0x5f   :  { %1273 = vmatpush1.bf16.msra.mxu0 %v4541_v33  ;;  %1402 = vmatpush1.bf16.msra.mxu1 %v4548_v34 }
  0x60   :  { %1274 = vmatprep.subr.bf16.mxu0 %v4553_v35  ;;  %1403 = vmatprep.subr.bf16.mxu1 %v4560_v36 }
  0x63   :  { %1275 = vmatpush1.bf16.msra.mxu0 %v4565_v37  ;;  %1404 = vmatpush1.bf16.msra.mxu1 %v4570_v38 }
  0x64   :  { %1276 = vmatprep.subr.bf16.mxu0 %v4577_v39  ;;  %1405 = vmatprep.subr.bf16.mxu1 %v4584_v40 }
  0x67   :  { %1277 = vmatpush1.bf16.msra.mxu0 %v4589_v41  ;;  %1406 = vmatpush1.bf16.msra.mxu1 %v4596_v42  ;;  %v4779_v42 = vld [vmem:[%s6833_s1 + $0x42c] ss:$16 sps:$4 sm:$0xff]   ;;  %v4842_v41 = vld [vmem:[%s6833_s1 + $0x468] ss:$16 sps:$4 sm:$0xff]  }
  0x68   :  { %1278 = vmatprep.subr.bf16.mxu0 %v4601_v43  ;;  %1407 = vmatprep.subr.bf16.mxu1 %v4608_v44  ;;  %v4649_v44 = vld [vmem:[%s6833_s1 + $0x384] ss:$16 sps:$4 sm:$0xff]   ;;  %v4666_v43 = vld [vmem:[%s6833_s1 + $0x388] ss:$16 sps:$4 sm:$0xff]   ;;  %7080 = vst [vmem:[#allocation33_spill] sm:$0xff] %v4779_v42  ;;  %7086 = vst [vmem:[#allocation39_spill] sm:$0xff] %v4842_v41 }
  0x69   :  { %7059 = vst [vmem:[#allocation12_spill] sm:$0xff] %v4649_v44  ;;  %7062 = vst [vmem:[#allocation15_spill] sm:$0xff] %v4666_v43 }
  0x6b   :  { %1279 = vmatpush1.bf16.msra.mxu0 %v4613_v45  ;;  %1408 = vmatpush1.bf16.msra.mxu1 %v4618_v46  ;;  %v4656_v45 = vld [vmem:[%s6833_s1 + $0x38c] ss:$16 sps:$4 sm:$0xff]   ;;  %v4661_v46 = vld [vmem:[%s6833_s1 + $0x380] ss:$16 sps:$4 sm:$0xff]  }
  0x6c   :  { %1280 = vmatprep.subr.bf16.mxu0 %v4625_v47  ;;  %1409 = vmatprep.subr.bf16.mxu1 %v4632_v48  ;;  %7060 = vst [vmem:[#allocation13_spill] sm:$0xff] %v4656_v45  ;;  %7061 = vst [vmem:[#allocation14_spill] sm:$0xff] %v4661_v46  ;;  %v4673_v48 = vld [vmem:[%s6833_s1 + $0x3a4] ss:$16 sps:$4 sm:$0xff]   ;;  %v4680_v47 = vld [vmem:[%s6833_s1 + $0x3ac] ss:$16 sps:$4 sm:$0xff]  }
  0x6d   :  { %7063 = vst [vmem:[#allocation16_spill] sm:$0xff] %v4673_v48  ;;  %7064 = vst [vmem:[#allocation17_spill] sm:$0xff] %v4680_v47 }
  0x6f   :  { %1281 = vmatpush1.bf16.msra.mxu0 %v4637_v3  ;;  %1410 = vmatpush1.bf16.msra.mxu1 %v4644_v30  ;;  %v4685_v3 = vld [vmem:[%s6833_s1 + $0x3a0] ss:$16 sps:$4 sm:$0xff]   ;;  %v4714_v30 = vld [vmem:[%s6833_s1 + $0x3c8] ss:$16 sps:$4 sm:$0xff]  }
  0x70   :  { %1282 = vmatprep.subr.bf16.mxu0 %v4649_v44  ;;  %1411 = vmatprep.subr.bf16.mxu1 %v4656_v45  ;;  %7065 = vst [vmem:[#allocation18_spill] sm:$0xff] %v4685_v3  ;;  %v4692_v44 = vld [vmem:[%s6833_s1 + $0x3a8] ss:$16 sps:$4 sm:$0xff]   ;;  %v4697_v45 = vld [vmem:[%s6833_s1 + $0x3c4] ss:$16 sps:$4 sm:$0xff]   ;;  %7070 = vst [vmem:[#allocation23_spill] sm:$0xff] %v4714_v30 }
  0x71   :  { %7066 = vst [vmem:[#allocation19_spill] sm:$0xff] %v4692_v44  ;;  %7067 = vst [vmem:[#allocation20_spill] sm:$0xff] %v4697_v45 }
  0x73   :  { %1283 = vmatpush1.bf16.msra.mxu0 %v4661_v46  ;;  %1412 = vmatpush1.bf16.msra.mxu1 %v4666_v43  ;;  %v4704_v46 = vld [vmem:[%s6833_s1 + $0x3cc] ss:$16 sps:$4 sm:$0xff]   ;;  %v4709_v43 = vld [vmem:[%s6833_s1 + $0x3c0] ss:$16 sps:$4 sm:$0xff]  }
  0x74   :  { %1284 = vmatprep.subr.bf16.mxu0 %v4673_v48  ;;  %1413 = vmatprep.subr.bf16.mxu1 %v4680_v47  ;;  %7068 = vst [vmem:[#allocation21_spill] sm:$0xff] %v4704_v46  ;;  %7069 = vst [vmem:[#allocation22_spill] sm:$0xff] %v4709_v43  ;;  %v4721_v47 = vld [vmem:[%s6833_s1 + $0x3e4] ss:$16 sps:$4 sm:$0xff]   ;;  %v4728_v48 = vld [vmem:[%s6833_s1 + $0x3ec] ss:$16 sps:$4 sm:$0xff]  }
  0x75   :  { %7071 = vst [vmem:[#allocation24_spill] sm:$0xff] %v4721_v47  ;;  %7072 = vst [vmem:[#allocation25_spill] sm:$0xff] %v4728_v48 }
  0x77   :  { %1285 = vmatpush1.bf16.msra.mxu0 %v4685_v3  ;;  %1414 = vmatpush1.bf16.msra.mxu1 %v4692_v44  ;;  %v4733_v3 = vld [vmem:[%s6833_s1 + $0x3e0] ss:$16 sps:$4 sm:$0xff]  }
  0x78   :  { %1286 = vmatprep.subr.bf16.mxu0 %v4697_v45  ;;  %1415 = vmatprep.subr.bf16.mxu1 %v4704_v46  ;;  %7073 = vst [vmem:[#allocation26_spill] sm:$0xff] %v4733_v3  ;;  %v4740_v45 = vld [vmem:[%s6833_s1 + $0x3e8] ss:$16 sps:$4 sm:$0xff]   ;;  %v4745_v46 = vld [vmem:[%s6833_s1 + $0x404] ss:$16 sps:$4 sm:$0xff]  }
  0x79   :  { %7074 = vst [vmem:[#allocation27_spill] sm:$0xff] %v4740_v45  ;;  %7075 = vst [vmem:[#allocation28_spill] sm:$0xff] %v4745_v46  ;;  %v4760_v44 = vld [vmem:[%s6833_s1 + $0x400] ss:$16 sps:$4 sm:$0xff]  }
  0x7a   :  { %7077 = vst [vmem:[#allocation30_spill] sm:$0xff] %v4760_v44 }
  0x7b   :  { %1287 = vmatpush1.bf16.msra.mxu0 %v4709_v43  ;;  %1416 = vmatpush1.bf16.msra.mxu1 %v4714_v30  ;;  %v4752_v43 = vld [vmem:[%s6833_s1 + $0x40c] ss:$16 sps:$4 sm:$0xff]   ;;  %v3681_v30 = vld [vmem:[%s6834_s0 + $0x8] ss:$24 sps:$4 sm:$0xff]  }
  0x7c   :  { %1288 = vmatprep.subr.bf16.mxu0 %v4721_v47  ;;  %1417 = vmatprep.subr.bf16.mxu1 %v4728_v48  ;;  %7076 = vst [vmem:[#allocation29_spill] sm:$0xff] %v4752_v43  ;;  %v4765_v47 = vld [vmem:[%s6833_s1 + $0x408] ss:$16 sps:$4 sm:$0xff]   ;;  %v4772_v48 = vld [vmem:[%s6833_s1 + $0x424] ss:$16 sps:$4 sm:$0xff]  }
  0x7d   :  { %7078 = vst [vmem:[#allocation31_spill] sm:$0xff] %v4765_v47  ;;  %7079 = vst [vmem:[#allocation32_spill] sm:$0xff] %v4772_v48 }
  0x7f   :  { %1289 = vmatpush1.bf16.msra.mxu0 %v4733_v3  ;;  %1418 = vmatpush1.bf16.msra.mxu1 %v4740_v45  ;;  %v4784_v3 = vld [vmem:[%s6833_s1 + $0x420] ss:$16 sps:$4 sm:$0xff]   ;;  %v4789_v45 = vld [vmem:[%s6833_s1 + $0x428] ss:$16 sps:$4 sm:$0xff]  }
  0x80   :  { %1301 = vmatprep.subr.bf16.mxu0 %v4745_v46  ;;  %1430 = vmatprep.subr.bf16.mxu1 %v4752_v43  ;;  %v3782_v43 = vld [vmem:[%s6834_s0 + $0x14] ss:$24 sps:$4 sm:$0xff]  }
  0x81   :  { %v4799_v46 = vld [vmem:[%s6833_s1 + $0x444] ss:$16 sps:$4 sm:$0xff]  }
  0x82   :  { %1291 = vmatmul.mubr.bf16.vlgmr.msra.gmra.mrb[0].mxu0 %v3681_v30  ;;  %1420 = vmatmul.mubr.bf16.vlgmr.msra.gmra.mrb[0].mxu1 %v3681_v30  ;;  %v4806_v30 = vld [vmem:[%s6833_s1 + $0x44c] ss:$16 sps:$4 sm:$0xff]  }
  0x83   :  { %1302 = vmatpush1.bf16.msra.mxu0 %v4760_v44  ;;  %1431 = vmatpush1.bf16.msra.mxu1 %v4765_v47  ;;  %v4811_v44 = vld [vmem:[%s6833_s1 + $0x440] ss:$16 sps:$4 sm:$0xff]   ;;  %v4816_v47 = vld [vmem:[%s6833_s1 + $0x448] ss:$16 sps:$4 sm:$0xff]  }
  0x84   :  { %1303 = vmatprep.subr.bf16.mxu0 %v4772_v48  ;;  %1432 = vmatprep.subr.bf16.mxu1 %v4779_v42  ;;  %7081 = vst [vmem:[#allocation34_spill] sm:$0xff] %v4811_v44  ;;  %7082 = vst [vmem:[#allocation35_spill] sm:$0xff] %v4816_v47  ;;  %v4821_v42 = vld [vmem:[%s6833_s1 + $0x464] ss:$16 sps:$4 sm:$0xff]   ;;  %v4826_v48 = vld [vmem:[%s6833_s1 + $0x46c] ss:$16 sps:$4 sm:$0xff]  }
  0x85   :  { %1333 = vmatprep.mubr.bf16.mxu0 %v3782_v43  ;;  %1462 = vmatprep.mubr.bf16.mxu1 %v3782_v43  ;;  %7083 = vst [vmem:[#allocation36_spill] sm:$0xff] %v4821_v42  ;;  %7084 = vst [vmem:[#allocation37_spill] sm:$0xff] %v4826_v48  ;;  %v4837_v43 = vld [vmem:[%s6833_s1 + $0x460] ss:$16 sps:$4 sm:$0xff]  }
  0x86   :  { %7085 = vst [vmem:[#allocation38_spill] sm:$0xff] %v4837_v43 }
  0x87   :  { %1304 = vmatpush1.bf16.msra.mxu0 %v4784_v3  ;;  %1433 = vmatpush1.bf16.msra.mxu1 %v4789_v45 }
  0x88   :  { %1305 = vmatprep.subr.bf16.mxu0 %v4799_v46  ;;  %1434 = vmatprep.subr.bf16.mxu1 %v4806_v30 }
  0x8b   :  { %1306 = vmatpush1.bf16.msra.mxu0 %v4811_v44  ;;  %1435 = vmatpush1.bf16.msra.mxu1 %v4816_v47  ;;  %v4849_v44 = vld [vmem:[%s6833_s1 + $0x484] ss:$16 sps:$4 sm:$0xff]   ;;  %v4854_v47 = vld [vmem:[%s6833_s1 + $0x48c] ss:$16 sps:$4 sm:$0xff]  }
  0x8c   :  { %1307 = vmatprep.subr.bf16.mxu0 %v4821_v42  ;;  %1436 = vmatprep.subr.bf16.mxu1 %v4826_v48  ;;  %7087 = vst [vmem:[#allocation40_spill] sm:$0xff] %v4849_v44  ;;  %7088 = vst [vmem:[#allocation41_spill] sm:$0xff] %v4854_v47  ;;  %v4861_v42 = vld [vmem:[%s6833_s1 + $0x480] ss:$16 sps:$4 sm:$0xff]   ;;  %v4866_v48 = vld [vmem:[%s6833_s1 + $0x488] ss:$16 sps:$4 sm:$0xff]  }
  0x8d   :  { %7089 = vst [vmem:[#allocation42_spill] sm:$0xff] %v4861_v42  ;;  %7090 = vst [vmem:[#allocation43_spill] sm:$0xff] %v4866_v48 }
  0x8f   :  { %1308 = vmatpush1.bf16.msra.mxu0 %v4837_v43  ;;  %1437 = vmatpush1.bf16.msra.mxu1 %v4842_v41  ;;  %v4873_v43 = vld [vmem:[%s6833_s1 + $0x4a4] ss:$16 sps:$4 sm:$0xff]   ;;  %v4878_v41 = vld [vmem:[%s6833_s1 + $0x4ac] ss:$16 sps:$4 sm:$0xff]  }
  0x90   :  { %1309 = vmatprep.subr.bf16.mxu0 %v4849_v44  ;;  %1438 = vmatprep.subr.bf16.mxu1 %v4854_v47  ;;  %7091 = vst [vmem:[#allocation44_spill] sm:$0xff] %v4873_v43  ;;  %7092 = vst [vmem:[#allocation45_spill] sm:$0xff] %v4878_v41  ;;  %v4885_v44 = vld [vmem:[%s6833_s1 + $0x4a0] ss:$16 sps:$4 sm:$0xff]   ;;  %v4890_v47 = vld [vmem:[%s6833_s1 + $0x4a8] ss:$16 sps:$4 sm:$0xff]  }
  0x91   :  { %7093 = vst [vmem:[#allocation46_spill] sm:$0xff] %v4885_v44  ;;  %7094 = vst [vmem:[#allocation47_spill] sm:$0xff] %v4890_v47 }
  0x93   :  { %1310 = vmatpush1.bf16.msra.mxu0 %v4861_v42  ;;  %1439 = vmatpush1.bf16.msra.mxu1 %v4866_v48  ;;  %v4897_v42 = vld [vmem:[%s6833_s1 + $0x4c4] ss:$16 sps:$4 sm:$0xff]   ;;  %v4902_v48 = vld [vmem:[%s6833_s1 + $0x4cc] ss:$16 sps:$4 sm:$0xff]  }
  0x94   :  { %1311 = vmatprep.subr.bf16.mxu0 %v4873_v43  ;;  %1440 = vmatprep.subr.bf16.mxu1 %v4878_v41  ;;  %7095 = vst [vmem:[#allocation48_spill] sm:$0xff] %v4897_v42  ;;  %7096 = vst [vmem:[#allocation49_spill] sm:$0xff] %v4902_v48  ;;  %v4909_v43 = vld [vmem:[%s6833_s1 + $0x4c0] ss:$16 sps:$4 sm:$0xff]   ;;  %v4914_v41 = vld [vmem:[%s6833_s1 + $0x4c8] ss:$16 sps:$4 sm:$0xff]  }
  0x95   :  { %7097 = vst [vmem:[#allocation50_spill] sm:$0xff] %v4909_v43  ;;  %7098 = vst [vmem:[#allocation51_spill] sm:$0xff] %v4914_v41 }
  0x97   :  { %1312 = vmatpush1.bf16.msra.mxu0 %v4885_v44  ;;  %1441 = vmatpush1.bf16.msra.mxu1 %v4890_v47  ;;  %v4921_v44 = vld [vmem:[%s6833_s1 + $0x4e4] ss:$16 sps:$4 sm:$0xff]   ;;  %v4926_v47 = vld [vmem:[%s6833_s1 + $0x4ec] ss:$16 sps:$4 sm:$0xff]  }
  0x98   :  { %1313 = vmatprep.subr.bf16.mxu0 %v4897_v42  ;;  %1442 = vmatprep.subr.bf16.mxu1 %v4902_v48  ;;  %7099 = vst [vmem:[#allocation52_spill] sm:$0xff] %v4921_v44  ;;  %7100 = vst [vmem:[#allocation53_spill] sm:$0xff] %v4926_v47  ;;  %v4933_v42 = vld [vmem:[%s6833_s1 + $0x4e0] ss:$16 sps:$4 sm:$0xff]   ;;  %v4938_v48 = vld [vmem:[%s6833_s1 + $0x4e8] ss:$16 sps:$4 sm:$0xff]  }
  0x99   :  { %7101 = vst [vmem:[#allocation54_spill] sm:$0xff] %v4933_v42  ;;  %7102 = vst [vmem:[#allocation55_spill] sm:$0xff] %v4938_v48 }
  0x9b   :  { %1314 = vmatpush1.bf16.msra.mxu0 %v4909_v43  ;;  %1443 = vmatpush1.bf16.msra.mxu1 %v4914_v41  ;;  %v4945_v43 = vld [vmem:[%s6833_s1 + $0x504] ss:$16 sps:$4 sm:$0xff]   ;;  %v4950_v41 = vld [vmem:[%s6833_s1 + $0x50c] ss:$16 sps:$4 sm:$0xff]  }
  0x9c   :  { %1315 = vmatprep.subr.bf16.mxu0 %v4921_v44  ;;  %1444 = vmatprep.subr.bf16.mxu1 %v4926_v47  ;;  %7103 = vst [vmem:[#allocation56_spill] sm:$0xff] %v4945_v43  ;;  %7104 = vst [vmem:[#allocation57_spill] sm:$0xff] %v4950_v41  ;;  %v4957_v44 = vld [vmem:[%s6833_s1 + $0x500] ss:$16 sps:$4 sm:$0xff]   ;;  %v4962_v47 = vld [vmem:[%s6833_s1 + $0x508] ss:$16 sps:$4 sm:$0xff]  }
  0x9d   :  { %7105 = vst [vmem:[#allocation58_spill] sm:$0xff] %v4957_v44  ;;  %7106 = vst [vmem:[#allocation59_spill] sm:$0xff] %v4962_v47 }
  0x9f   :  { %1316 = vmatpush1.bf16.msra.mxu0 %v4933_v42  ;;  %1445 = vmatpush1.bf16.msra.mxu1 %v4938_v48  ;;  %v4969_v42 = vld [vmem:[%s6833_s1 + $0x524] ss:$16 sps:$4 sm:$0xff]   ;;  %v4974_v48 = vld [vmem:[%s6833_s1 + $0x52c] ss:$16 sps:$4 sm:$0xff]  }
  0xa0   :  { %1317 = vmatprep.subr.bf16.mxu0 %v4945_v43  ;;  %1446 = vmatprep.subr.bf16.mxu1 %v4950_v41  ;;  %7107 = vst [vmem:[#allocation60_spill] sm:$0xff] %v4969_v42  ;;  %7108 = vst [vmem:[#allocation61_spill] sm:$0xff] %v4974_v48  ;;  %v4981_v43 = vld [vmem:[%s6833_s1 + $0x520] ss:$16 sps:$4 sm:$0xff]   ;;  %v4986_v41 = vld [vmem:[%s6833_s1 + $0x528] ss:$16 sps:$4 sm:$0xff]  }
  0xa1   :  { %7109 = vst [vmem:[#allocation62_spill] sm:$0xff] %v4981_v43  ;;  %7110 = vst [vmem:[#allocation63_spill] sm:$0xff] %v4986_v41 }
  0xa3   :  { %1318 = vmatpush1.bf16.msra.mxu0 %v4957_v44  ;;  %1447 = vmatpush1.bf16.msra.mxu1 %v4962_v47  ;;  %v4993_v44 = vld [vmem:[%s6833_s1 + $0x544] ss:$16 sps:$4 sm:$0xff]   ;;  %v4998_v47 = vld [vmem:[%s6833_s1 + $0x54c] ss:$16 sps:$4 sm:$0xff]  }
  0xa4   :  { %1319 = vmatprep.subr.bf16.mxu0 %v4969_v42  ;;  %1448 = vmatprep.subr.bf16.mxu1 %v4974_v48  ;;  %7111 = vst [vmem:[#allocation64_spill] sm:$0xff] %v4993_v44  ;;  %7112 = vst [vmem:[#allocation65_spill] sm:$0xff] %v4998_v47  ;;  %v5005_v42 = vld [vmem:[%s6833_s1 + $0x540] ss:$16 sps:$4 sm:$0xff]   ;;  %v5010_v48 = vld [vmem:[%s6833_s1 + $0x548] ss:$16 sps:$4 sm:$0xff]  }
  0xa5   :  { %7113 = vst [vmem:[#allocation66_spill] sm:$0xff] %v5005_v42  ;;  %7114 = vst [vmem:[#allocation67_spill] sm:$0xff] %v5010_v48 }
  0xa7   :  { %1320 = vmatpush1.bf16.msra.mxu0 %v4981_v43  ;;  %1449 = vmatpush1.bf16.msra.mxu1 %v4986_v41  ;;  %v5017_v43 = vld [vmem:[%s6833_s1 + $0x564] ss:$16 sps:$4 sm:$0xff]   ;;  %v5022_v41 = vld [vmem:[%s6833_s1 + $0x56c] ss:$16 sps:$4 sm:$0xff]  }
  0xa8   :  { %1321 = vmatprep.subr.bf16.mxu0 %v4993_v44  ;;  %1450 = vmatprep.subr.bf16.mxu1 %v4998_v47  ;;  %7115 = vst [vmem:[#allocation68_spill] sm:$0xff] %v5017_v43  ;;  %7116 = vst [vmem:[#allocation69_spill] sm:$0xff] %v5022_v41  ;;  %v5029_v44 = vld [vmem:[%s6833_s1 + $0x560] ss:$16 sps:$4 sm:$0xff]   ;;  %v5034_v47 = vld [vmem:[%s6833_s1 + $0x568] ss:$16 sps:$4 sm:$0xff]  }
  0xa9   :  { %7117 = vst [vmem:[#allocation70_spill] sm:$0xff] %v5029_v44  ;;  %7118 = vst [vmem:[#allocation71_spill] sm:$0xff] %v5034_v47 }
  0xab   :  { %1322 = vmatpush1.bf16.msra.mxu0 %v5005_v42  ;;  %1451 = vmatpush1.bf16.msra.mxu1 %v5010_v48  ;;  %v5041_v42 = vld [vmem:[%s6833_s1 + $0x584] ss:$16 sps:$4 sm:$0xff]   ;;  %v5046_v48 = vld [vmem:[%s6833_s1 + $0x58c] ss:$16 sps:$4 sm:$0xff]  }
  0xac   :  { %1323 = vmatprep.subr.bf16.mxu0 %v5017_v43  ;;  %1452 = vmatprep.subr.bf16.mxu1 %v5022_v41  ;;  %7119 = vst [vmem:[#allocation72_spill] sm:$0xff] %v5041_v42  ;;  %7120 = vst [vmem:[#allocation73_spill] sm:$0xff] %v5046_v48  ;;  %v5053_v43 = vld [vmem:[%s6833_s1 + $0x580] ss:$16 sps:$4 sm:$0xff]   ;;  %v5058_v41 = vld [vmem:[%s6833_s1 + $0x588] ss:$16 sps:$4 sm:$0xff]  }
  0xad   :  { %7121 = vst [vmem:[#allocation74_spill] sm:$0xff] %v5053_v43  ;;  %7122 = vst [vmem:[#allocation75_spill] sm:$0xff] %v5058_v41 }
  0xaf   :  { %1324 = vmatpush1.bf16.msra.mxu0 %v5029_v44  ;;  %1453 = vmatpush1.bf16.msra.mxu1 %v5034_v47  ;;  %v5065_v44 = vld [vmem:[%s6833_s1 + $0x5a4] ss:$16 sps:$4 sm:$0xff]   ;;  %v5070_v47 = vld [vmem:[%s6833_s1 + $0x5ac] ss:$16 sps:$4 sm:$0xff]  }
  0xb0   :  { %1325 = vmatprep.subr.bf16.mxu0 %v5041_v42  ;;  %1454 = vmatprep.subr.bf16.mxu1 %v5046_v48  ;;  %7123 = vst [vmem:[#allocation76_spill] sm:$0xff] %v5065_v44  ;;  %7124 = vst [vmem:[#allocation77_spill] sm:$0xff] %v5070_v47  ;;  %v5077_v42 = vld [vmem:[%s6833_s1 + $0x5a0] ss:$16 sps:$4 sm:$0xff]   ;;  %v5082_v48 = vld [vmem:[%s6833_s1 + $0x5a8] ss:$16 sps:$4 sm:$0xff]  }
  0xb1   :  { %7125 = vst [vmem:[#allocation78_spill] sm:$0xff] %v5077_v42  ;;  %7126 = vst [vmem:[#allocation79_spill] sm:$0xff] %v5082_v48 }
  0xb3   :  { %1326 = vmatpush1.bf16.msra.mxu0 %v5053_v43  ;;  %1455 = vmatpush1.bf16.msra.mxu1 %v5058_v41  ;;  %v5089_v43 = vld [vmem:[%s6833_s1 + $0x5c4] ss:$16 sps:$4 sm:$0xff]   ;;  %v5094_v41 = vld [vmem:[%s6833_s1 + $0x5cc] ss:$16 sps:$4 sm:$0xff]  }
  0xb4   :  { %1327 = vmatprep.subr.bf16.mxu0 %v5065_v44  ;;  %1456 = vmatprep.subr.bf16.mxu1 %v5070_v47  ;;  %7127 = vst [vmem:[#allocation80_spill] sm:$0xff] %v5089_v43  ;;  %7128 = vst [vmem:[#allocation81_spill] sm:$0xff] %v5094_v41  ;;  %v5101_v44 = vld [vmem:[%s6833_s1 + $0x5c0] ss:$16 sps:$4 sm:$0xff]   ;;  %v5106_v47 = vld [vmem:[%s6833_s1 + $0x5c8] ss:$16 sps:$4 sm:$0xff]  }
  0xb5   :  { %7129 = vst [vmem:[#allocation82_spill] sm:$0xff] %v5101_v44  ;;  %7130 = vst [vmem:[#allocation83_spill] sm:$0xff] %v5106_v47 }
  0xb7   :  { %1328 = vmatpush1.bf16.msra.mxu0 %v5077_v42  ;;  %1457 = vmatpush1.bf16.msra.mxu1 %v5082_v48  ;;  %v5113_v42 = vld [vmem:[%s6833_s1 + $0x5e4] ss:$16 sps:$4 sm:$0xff]   ;;  %v5118_v48 = vld [vmem:[%s6833_s1 + $0x5ec] ss:$16 sps:$4 sm:$0xff]  }
  0xb8   :  { %1329 = vmatprep.subr.bf16.mxu0 %v5089_v43  ;;  %1458 = vmatprep.subr.bf16.mxu1 %v5094_v41  ;;  %7131 = vst [vmem:[#allocation84_spill] sm:$0xff] %v5113_v42  ;;  %v5125_v43 = vld [vmem:[%s6833_s1 + $0x5e0] ss:$16 sps:$4 sm:$0xff]   ;;  %v5130_v41 = vld [vmem:[%s6833_s1 + $0x5e8] ss:$16 sps:$4 sm:$0xff]  }
  0xb9   :  { %7132 = vst [vmem:[#allocation85_spill] sm:$0xff] %v5125_v43  ;;  %7133 = vst [vmem:[#allocation86_spill] sm:$0xff] %v5130_v41 }
  0xbb   :  { %1330 = vmatpush1.bf16.msra.mxu0 %v5101_v44  ;;  %1459 = vmatpush1.bf16.msra.mxu1 %v5106_v47  ;;  %v3780_v44 = vld [vmem:[%s6834_s0 + $0x10] ss:$24 sps:$4 sm:$0xff]   ;;  %v5142_v47 = vld [vmem:[%s6833_s1 + $0x4] ss:$16 sps:$4 sm:$0xff]  }
  0xbc   :  { %1331 = vmatprep.subr.bf16.mxu0 %v5113_v42  ;;  %1460 = vmatprep.subr.bf16.mxu1 %v5118_v48  ;;  %7134 = vst [vmem:[#allocation87_spill] sm:$0xff] %v5142_v47  ;;  %v5148_v42 = vld [vmem:[%s6833_s1 + $0xc] ss:$16 sps:$4 sm:$0xff]  }
  0xbd   :  { %7135 = vst [vmem:[#allocation88_spill] sm:$0xff] %v5148_v42 }
  0xbf   :  { %1332 = vmatpush1.bf16.msra.mxu0 %v5125_v43  ;;  %1461 = vmatpush1.bf16.msra.mxu1 %v5130_v41  ;;  %v3785_v43 = vld [vmem:[%s6834_s0 + $0x34] ss:$24 sps:$4 sm:$0xff]   ;;  %v5157_v41 = vld [vmem:[%s6833_s1] ss:$16 sps:$4 sm:$0xff]  }
  0xc0   :  { %1544 = vmatprep.subr.bf16.mxu0 %v5142_v47  ;;  %1673 = vmatprep.subr.bf16.mxu1 %v5148_v42  ;;  %7136 = vst [vmem:[#allocation89_spill] sm:$0xff] %v5157_v41  ;;  %v5163_v47 = vld [vmem:[%s6833_s1 + $0x8] ss:$16 sps:$4 sm:$0xff]   ;;  %v5169_v42 = vld [vmem:[%s6833_s1 + $0x24] ss:$16 sps:$4 sm:$0xff]  }
  0xc1   :  { %7137 = vst [vmem:[#allocation90_spill] sm:$0xff] %v5169_v42 }
  0xc2   :  { %1334 = vmatmul.mubr.bf16.vlgmr.msra.gmra.mrb[0].mxu0 %v3780_v44  ;;  %1463 = vmatmul.mubr.bf16.vlgmr.msra.gmra.mrb[0].mxu1 %v3780_v44  ;;  %v5175_v44 = vld [vmem:[%s6833_s1 + $0x2c] ss:$16 sps:$4 sm:$0xff]  }
  0xc3   :  { %1545 = vmatpush1.bf16.msra.mxu0 %v5157_v41  ;;  %1674 = vmatpush1.bf16.msra.mxu1 %v5163_v47  ;;  %7138 = vst [vmem:[#allocation91_spill] sm:$0xff] %v5175_v44  ;;  %v5181_v41 = vld [vmem:[%s6833_s1 + $0x20] ss:$16 sps:$4 sm:$0xff]  }
  0xc4   :  { %1546 = vmatprep.subr.bf16.mxu0 %v5169_v42  ;;  %1675 = vmatprep.subr.bf16.mxu1 %v5175_v44  ;;  %7139 = vst [vmem:[#allocation92_spill] sm:$0xff] %v5181_v41  ;;  %v5187_v42 = vld [vmem:[%s6833_s1 + $0x28] ss:$16 sps:$4 sm:$0xff]   ;;  %v5193_v44 = vld [vmem:[%s6833_s1 + $0x44] ss:$16 sps:$4 sm:$0xff]  }
  0xc5   :  { %1576 = vmatprep.mubr.bf16.mxu0 %v3785_v43  ;;  %1705 = vmatprep.mubr.bf16.mxu1 %v3785_v43  ;;  %7140 = vst [vmem:[#allocation93_spill] sm:$0xff] %v5187_v42  ;;  %7141 = vst [vmem:[#allocation94_spill] sm:$0xff] %v5193_v44  ;;  %v5199_v43 = vld [vmem:[%s6833_s1 + $0x4c] ss:$16 sps:$4 sm:$0xff]  }
  0xc6   :  { %7142 = vst [vmem:[#allocation95_spill] sm:$0xff] %v5199_v43 }
  0xc7   :  { %1547 = vmatpush1.bf16.msra.mxu0 %v5181_v41  ;;  %1676 = vmatpush1.bf16.msra.mxu1 %v5187_v42  ;;  %v5205_v41 = vld [vmem:[%s6833_s1 + $0x40] ss:$16 sps:$4 sm:$0xff]   ;;  %v5211_v42 = vld [vmem:[%s6833_s1 + $0x48] ss:$16 sps:$4 sm:$0xff]  }
  0xc8   :  { %1548 = vmatprep.subr.bf16.mxu0 %v5193_v44  ;;  %1677 = vmatprep.subr.bf16.mxu1 %v5199_v43  ;;  %7143 = vst [vmem:[#allocation96_spill] sm:$0xff] %v5205_v41  ;;  %7144 = vst [vmem:[#allocation97_spill] sm:$0xff] %v5211_v42  ;;  %v5217_v44 = vld [vmem:[%s6833_s1 + $0x64] ss:$16 sps:$4 sm:$0xff]   ;;  %v5223_v43 = vld [vmem:[%s6833_s1 + $0x6c] ss:$16 sps:$4 sm:$0xff]  }
  0xc9   :  { %7145 = vst [vmem:[#allocation98_spill] sm:$0xff] %v5217_v44  ;;  %7146 = vst [vmem:[#allocation99_spill] sm:$0xff] %v5223_v43 }
  0xcb   :  { %1549 = vmatpush1.bf16.msra.mxu0 %v5205_v41  ;;  %1678 = vmatpush1.bf16.msra.mxu1 %v5211_v42  ;;  %v5229_v41 = vld [vmem:[%s6833_s1 + $0x60] ss:$16 sps:$4 sm:$0xff]   ;;  %v5235_v42 = vld [vmem:[%s6833_s1 + $0x68] ss:$16 sps:$4 sm:$0xff]  }
  0xcc   :  { %1550 = vmatprep.subr.bf16.mxu0 %v5217_v44  ;;  %1679 = vmatprep.subr.bf16.mxu1 %v5223_v43  ;;  %7147 = vst [vmem:[#allocation100_spill] sm:$0xff] %v5229_v41  ;;  %7148 = vst [vmem:[#allocation101_spill] sm:$0xff] %v5235_v42  ;;  %v5241_v44 = vld [vmem:[%s6833_s1 + $0x84] ss:$16 sps:$4 sm:$0xff]   ;;  %v5247_v43 = vld [vmem:[%s6833_s1 + $0x8c] ss:$16 sps:$4 sm:$0xff]  }
  0xcd   :  { %7149 = vst [vmem:[#allocation102_spill] sm:$0xff] %v5241_v44  ;;  %7150 = vst [vmem:[#allocation103_spill] sm:$0xff] %v5247_v43 }
  0xcf   :  { %1551 = vmatpush1.bf16.msra.mxu0 %v5229_v41  ;;  %1680 = vmatpush1.bf16.msra.mxu1 %v5235_v42  ;;  %v5253_v41 = vld [vmem:[%s6833_s1 + $0x80] ss:$16 sps:$4 sm:$0xff]   ;;  %v5259_v42 = vld [vmem:[%s6833_s1 + $0x88] ss:$16 sps:$4 sm:$0xff]  }
  0xd0   :  { %1552 = vmatprep.subr.bf16.mxu0 %v5241_v44  ;;  %1681 = vmatprep.subr.bf16.mxu1 %v5247_v43  ;;  %7151 = vst [vmem:[#allocation104_spill] sm:$0xff] %v5253_v41  ;;  %7152 = vst [vmem:[#allocation105_spill] sm:$0xff] %v5259_v42  ;;  %v5265_v44 = vld [vmem:[%s6833_s1 + $0xa4] ss:$16 sps:$4 sm:$0xff]   ;;  %v5271_v43 = vld [vmem:[%s6833_s1 + $0xac] ss:$16 sps:$4 sm:$0xff]  }
  0xd1   :  { %7153 = vst [vmem:[#allocation106_spill] sm:$0xff] %v5265_v44  ;;  %7154 = vst [vmem:[#allocation107_spill] sm:$0xff] %v5271_v43 }
  0xd3   :  { %1553 = vmatpush1.bf16.msra.mxu0 %v5253_v41  ;;  %1682 = vmatpush1.bf16.msra.mxu1 %v5259_v42  ;;  %v5277_v41 = vld [vmem:[%s6833_s1 + $0xa0] ss:$16 sps:$4 sm:$0xff]   ;;  %v5283_v42 = vld [vmem:[%s6833_s1 + $0xa8] ss:$16 sps:$4 sm:$0xff]  }
  0xd4   :  { %1554 = vmatprep.subr.bf16.mxu0 %v5265_v44  ;;  %1683 = vmatprep.subr.bf16.mxu1 %v5271_v43  ;;  %7155 = vst [vmem:[#allocation108_spill] sm:$0xff] %v5277_v41  ;;  %7156 = vst [vmem:[#allocation109_spill] sm:$0xff] %v5283_v42  ;;  %v5289_v44 = vld [vmem:[%s6833_s1 + $0xc4] ss:$16 sps:$4 sm:$0xff]   ;;  %v5295_v43 = vld [vmem:[%s6833_s1 + $0xcc] ss:$16 sps:$4 sm:$0xff]  }
  0xd5   :  { %7157 = vst [vmem:[#allocation110_spill] sm:$0xff] %v5289_v44  ;;  %7158 = vst [vmem:[#allocation111_spill] sm:$0xff] %v5295_v43 }
  0xd7   :  { %1555 = vmatpush1.bf16.msra.mxu0 %v5277_v41  ;;  %1684 = vmatpush1.bf16.msra.mxu1 %v5283_v42  ;;  %v5301_v41 = vld [vmem:[%s6833_s1 + $0xc0] ss:$16 sps:$4 sm:$0xff]   ;;  %v5307_v42 = vld [vmem:[%s6833_s1 + $0xc8] ss:$16 sps:$4 sm:$0xff]  }
  0xd8   :  { %1556 = vmatprep.subr.bf16.mxu0 %v5289_v44  ;;  %1685 = vmatprep.subr.bf16.mxu1 %v5295_v43  ;;  %7159 = vst [vmem:[#allocation112_spill] sm:$0xff] %v5301_v41  ;;  %7160 = vst [vmem:[#allocation113_spill] sm:$0xff] %v5307_v42  ;;  %v5313_v44 = vld [vmem:[%s6833_s1 + $0xe4] ss:$16 sps:$4 sm:$0xff]   ;;  %v5319_v43 = vld [vmem:[%s6833_s1 + $0xec] ss:$16 sps:$4 sm:$0xff]  }
  0xd9   :  { %7161 = vst [vmem:[#allocation114_spill] sm:$0xff] %v5313_v44  ;;  %7162 = vst [vmem:[#allocation115_spill] sm:$0xff] %v5319_v43 }
  0xdb   :  { %1557 = vmatpush1.bf16.msra.mxu0 %v5301_v41  ;;  %1686 = vmatpush1.bf16.msra.mxu1 %v5307_v42  ;;  %v5325_v41 = vld [vmem:[%s6833_s1 + $0xe0] ss:$16 sps:$4 sm:$0xff]   ;;  %v5331_v42 = vld [vmem:[%s6833_s1 + $0xe8] ss:$16 sps:$4 sm:$0xff]  }
  0xdc   :  { %1558 = vmatprep.subr.bf16.mxu0 %v5313_v44  ;;  %1687 = vmatprep.subr.bf16.mxu1 %v5319_v43  ;;  %7163 = vst [vmem:[#allocation116_spill] sm:$0xff] %v5325_v41  ;;  %7164 = vst [vmem:[#allocation117_spill] sm:$0xff] %v5331_v42  ;;  %v5337_v44 = vld [vmem:[%s6833_s1 + $0x104] ss:$16 sps:$4 sm:$0xff]   ;;  %v5343_v43 = vld [vmem:[%s6833_s1 + $0x10c] ss:$16 sps:$4 sm:$0xff]  }
  0xdd   :  { %7165 = vst [vmem:[#allocation118_spill] sm:$0xff] %v5337_v44  ;;  %7166 = vst [vmem:[#allocation119_spill] sm:$0xff] %v5343_v43 }
  0xdf   :  { %1559 = vmatpush1.bf16.msra.mxu0 %v5325_v41  ;;  %1688 = vmatpush1.bf16.msra.mxu1 %v5331_v42  ;;  %v5349_v41 = vld [vmem:[%s6833_s1 + $0x100] ss:$16 sps:$4 sm:$0xff]   ;;  %v5355_v42 = vld [vmem:[%s6833_s1 + $0x108] ss:$16 sps:$4 sm:$0xff]  }
  0xe0   :  { %1560 = vmatprep.subr.bf16.mxu0 %v5337_v44  ;;  %1689 = vmatprep.subr.bf16.mxu1 %v5343_v43  ;;  %7167 = vst [vmem:[#allocation120_spill] sm:$0xff] %v5349_v41  ;;  %7168 = vst [vmem:[#allocation121_spill] sm:$0xff] %v5355_v42  ;;  %v5361_v44 = vld [vmem:[%s6833_s1 + $0x124] ss:$16 sps:$4 sm:$0xff]   ;;  %v5367_v43 = vld [vmem:[%s6833_s1 + $0x12c] ss:$16 sps:$4 sm:$0xff]  }
  0xe1   :  { %7169 = vst [vmem:[#allocation122_spill] sm:$0xff] %v5361_v44  ;;  %7170 = vst [vmem:[#allocation123_spill] sm:$0xff] %v5367_v43 }
  0xe3   :  { %1561 = vmatpush1.bf16.msra.mxu0 %v5349_v41  ;;  %1690 = vmatpush1.bf16.msra.mxu1 %v5355_v42  ;;  %v5373_v41 = vld [vmem:[%s6833_s1 + $0x120] ss:$16 sps:$4 sm:$0xff]   ;;  %v5379_v42 = vld [vmem:[%s6833_s1 + $0x128] ss:$16 sps:$4 sm:$0xff]  }
  0xe4   :  { %1562 = vmatprep.subr.bf16.mxu0 %v5361_v44  ;;  %1691 = vmatprep.subr.bf16.mxu1 %v5367_v43  ;;  %7171 = vst [vmem:[#allocation124_spill] sm:$0xff] %v5373_v41  ;;  %7172 = vst [vmem:[#allocation125_spill] sm:$0xff] %v5379_v42  ;;  %v5385_v44 = vld [vmem:[%s6833_s1 + $0x144] ss:$16 sps:$4 sm:$0xff]   ;;  %v5391_v43 = vld [vmem:[%s6833_s1 + $0x14c] ss:$16 sps:$4 sm:$0xff]  }
  0xe5   :  { %7173 = vst [vmem:[#allocation126_spill] sm:$0xff] %v5385_v44  ;;  %7174 = vst [vmem:[#allocation127_spill] sm:$0xff] %v5391_v43 }
  0xe7   :  { %1563 = vmatpush1.bf16.msra.mxu0 %v5373_v41  ;;  %1692 = vmatpush1.bf16.msra.mxu1 %v5379_v42  ;;  %v5397_v41 = vld [vmem:[%s6833_s1 + $0x140] ss:$16 sps:$4 sm:$0xff]   ;;  %v5403_v42 = vld [vmem:[%s6833_s1 + $0x148] ss:$16 sps:$4 sm:$0xff]  }
  0xe8   :  { %1564 = vmatprep.subr.bf16.mxu0 %v5385_v44  ;;  %1693 = vmatprep.subr.bf16.mxu1 %v5391_v43  ;;  %7175 = vst [vmem:[#allocation128_spill] sm:$0xff] %v5397_v41  ;;  %7176 = vst [vmem:[#allocation129_spill] sm:$0xff] %v5403_v42  ;;  %v5409_v44 = vld [vmem:[%s6833_s1 + $0x164] ss:$16 sps:$4 sm:$0xff]   ;;  %v5415_v43 = vld [vmem:[%s6833_s1 + $0x16c] ss:$16 sps:$4 sm:$0xff]  }
  0xeb   :  { %1565 = vmatpush1.bf16.msra.mxu0 %v5397_v41  ;;  %1694 = vmatpush1.bf16.msra.mxu1 %v5403_v42  ;;  %v5421_v41 = vld [vmem:[%s6833_s1 + $0x160] ss:$16 sps:$4 sm:$0xff]   ;;  %v5427_v42 = vld [vmem:[%s6833_s1 + $0x168] ss:$16 sps:$4 sm:$0xff]  }
  0xec   :  { %1566 = vmatprep.subr.bf16.mxu0 %v5409_v44  ;;  %1695 = vmatprep.subr.bf16.mxu1 %v5415_v43 }
  0xef   :  { %1567 = vmatpush1.bf16.msra.mxu0 %v5421_v41  ;;  %1696 = vmatpush1.bf16.msra.mxu1 %v5427_v42 }
  0xf0   :  { %1568 = vmatprep.subr.bf16.mxu0 %v4263_v49  ;;  %1697 = vmatprep.subr.bf16.mxu1 %v4268_v50  ;;  %v3783_v49 = vld [vmem:[%s6834_s0 + $0x30] ss:$24 sps:$4 sm:$0xff]   ;;  %v3788_v50 = vld [vmem:[%s6834_s0 + $0x3c] ss:$24 sps:$4 sm:$0xff]  }
  0xf3   :  { %1569 = vmatpush1.bf16.msra.mxu0 %v4273_v51  ;;  %1698 = vmatpush1.bf16.msra.mxu1 %v4278_v52  ;;  %v7177_v51 = vld [vmem:[#allocation2_spill] sm:$0xff]  ;;  %v7178_v52 = vld [vmem:[#allocation3_spill] sm:$0xff] }
  0xf4   :  { %1570 = vmatprep.subr.bf16.mxu0 %v4283_v53  ;;  %1699 = vmatprep.subr.bf16.mxu1 %v4290_v54  ;;  %v7179_v53 = vld [vmem:[#allocation4_spill] sm:$0xff]  ;;  %v7180_v54 = vld [vmem:[#allocation5_spill] sm:$0xff] }
  0xf7   :  { %1571 = vmatpush1.bf16.msra.mxu0 %v4295_v55  ;;  %1700 = vmatpush1.bf16.msra.mxu1 %v4300_v56  ;;  %v7181_v55 = vld [vmem:[#allocation6_spill] sm:$0xff]  ;;  %v7182_v56 = vld [vmem:[#allocation7_spill] sm:$0xff] }
  0xf8   :  { %1572 = vmatprep.subr.bf16.mxu0 %v4307_v57  ;;  %1701 = vmatprep.subr.bf16.mxu1 %v4314_v58  ;;  %v7183_v57 = vld [vmem:[#allocation8_spill] sm:$0xff]  ;;  %v7184_v58 = vld [vmem:[#allocation9_spill] sm:$0xff] }
  0xfb   :  { %1573 = vmatpush1.bf16.msra.mxu0 %v4319_v59  ;;  %1702 = vmatpush1.bf16.msra.mxu1 %v4326_v60  ;;  %v7185_v59 = vld [vmem:[#allocation10_spill] sm:$0xff]  ;;  %v7186_v60 = vld [vmem:[#allocation11_spill] sm:$0xff] }
  0xfc   :  { %1574 = vmatprep.subr.bf16.mxu0 %v4331_v61  ;;  %1703 = vmatprep.subr.bf16.mxu1 %v4338_v62  ;;  %v7187_v61 = vld [vmem:[#allocation12_spill] sm:$0xff]  ;;  %v7188_v62 = vld [vmem:[#allocation13_spill] sm:$0xff] }
  0xff   :  { %1575 = vmatpush1.bf16.msra.mxu0 %v4343_v63  ;;  %1704 = vmatpush1.bf16.msra.mxu1 %v4348_v0  ;;  %v7189_v63 = vld [vmem:[#allocation14_spill] sm:$0xff]  ;;  %v7190_v0 = vld [vmem:[#allocation15_spill] sm:$0xff] }
 0x100   :  { %1587 = vmatprep.subr.bf16.mxu0 %v4355_v1  ;;  %1716 = vmatprep.subr.bf16.mxu1 %v4362_v2  ;;  %v7191_v1 = vld [vmem:[#allocation16_spill] sm:$0xff]  ;;  %v7192_v2 = vld [vmem:[#allocation17_spill] sm:$0xff] }
 0x102   :  { %1577 = vmatmul.mubr.bf16.vlgmr.msra.gmra.mrb[4].mxu0 %v3783_v49  ;;  %1706 = vmatmul.mubr.bf16.vlgmr.msra.gmra.mrb[4].mxu1 %v3783_v49  ;;  %v7231_v49 = vld [vmem:[#allocation56_spill] sm:$0xff] }
 0x103   :  { %1588 = vmatpush1.bf16.msra.mxu0 %v4370_v4  ;;  %1717 = vmatpush1.bf16.msra.mxu1 %v4377_v5  ;;  %v7193_v4 = vld [vmem:[#allocation18_spill] sm:$0xff]  ;;  %v7194_v5 = vld [vmem:[#allocation19_spill] sm:$0xff] }
 0x104   :  { %1589 = vmatprep.subr.bf16.mxu0 %v4382_v6  ;;  %1718 = vmatprep.subr.bf16.mxu1 %v4389_v7  ;;  %v7195_v6 = vld [vmem:[#allocation20_spill] sm:$0xff]  ;;  %v7196_v7 = vld [vmem:[#allocation21_spill] sm:$0xff] }
 0x105   :  { %1619 = vmatprep.mubr.bf16.mxu0 %v3788_v50  ;;  %1748 = vmatprep.mubr.bf16.mxu1 %v3788_v50  ;;  %v7232_v50 = vld [vmem:[#allocation57_spill] sm:$0xff] }
 0x107   :  { %1590 = vmatpush1.bf16.msra.mxu0 %v4394_v8  ;;  %1719 = vmatpush1.bf16.msra.mxu1 %v4399_v9  ;;  %v7197_v8 = vld [vmem:[#allocation22_spill] sm:$0xff]  ;;  %v7198_v9 = vld [vmem:[#allocation23_spill] sm:$0xff] }
 0x108   :  { %1591 = vmatprep.subr.bf16.mxu0 %v4406_v10  ;;  %1720 = vmatprep.subr.bf16.mxu1 %v4413_v11  ;;  %v7199_v10 = vld [vmem:[#allocation24_spill] sm:$0xff]  ;;  %v7200_v11 = vld [vmem:[#allocation25_spill] sm:$0xff] }
 0x10b   :  { %1592 = vmatpush1.bf16.msra.mxu0 %v4418_v12  ;;  %1721 = vmatpush1.bf16.msra.mxu1 %v4425_v13  ;;  %v3786_v12 = vld [vmem:[%s6834_s0 + $0x38] ss:$24 sps:$4 sm:$0xff]   ;;  %v7201_v13 = vld [vmem:[#allocation26_spill] sm:$0xff] }
 0x10c   :  { %1593 = vmatprep.subr.bf16.mxu0 %v4430_v14  ;;  %1722 = vmatprep.subr.bf16.mxu1 %v4437_v15  ;;  %v7202_v14 = vld [vmem:[#allocation27_spill] sm:$0xff]  ;;  %v7203_v15 = vld [vmem:[#allocation28_spill] sm:$0xff] }
 0x10f   :  { %1594 = vmatpush1.bf16.msra.mxu0 %v4442_v16  ;;  %1723 = vmatpush1.bf16.msra.mxu1 %v4447_v17  ;;  %v7204_v16 = vld [vmem:[#allocation29_spill] sm:$0xff] }
 0x110   :  { %1595 = vmatprep.subr.bf16.mxu0 %v4454_v18  ;;  %1724 = vmatprep.subr.bf16.mxu1 %v4461_v19  ;;  %v3791_v17 = vld [vmem:[%s6834_s0 + $0x44] ss:$24 sps:$4 sm:$0xff]   ;;  %v7206_v19 = vld [vmem:[#allocation31_spill] sm:$0xff] }
 0x111   :  { %v7205_v18 = vld [vmem:[#allocation30_spill] sm:$0xff] }
 0x113   :  { %1596 = vmatpush1.bf16.msra.mxu0 %v4466_v20  ;;  %1725 = vmatpush1.bf16.msra.mxu1 %v4473_v21  ;;  %v7207_v20 = vld [vmem:[#allocation32_spill] sm:$0xff]  ;;  %v7208_v21 = vld [vmem:[#allocation33_spill] sm:$0xff] }
 0x114   :  { %1597 = vmatprep.subr.bf16.mxu0 %v4478_v22  ;;  %1726 = vmatprep.subr.bf16.mxu1 %v4485_v23  ;;  %v7209_v22 = vld [vmem:[#allocation34_spill] sm:$0xff]  ;;  %v7210_v23 = vld [vmem:[#allocation35_spill] sm:$0xff] }
 0x117   :  { %1598 = vmatpush1.bf16.msra.mxu0 %v4490_v24  ;;  %1727 = vmatpush1.bf16.msra.mxu1 %v4495_v25  ;;  %v7211_v24 = vld [vmem:[#allocation36_spill] sm:$0xff]  ;;  %v7212_v25 = vld [vmem:[#allocation37_spill] sm:$0xff] }
 0x118   :  { %1599 = vmatprep.subr.bf16.mxu0 %v4502_v26  ;;  %1728 = vmatprep.subr.bf16.mxu1 %v4509_v27  ;;  %v7213_v26 = vld [vmem:[#allocation38_spill] sm:$0xff]  ;;  %v7214_v27 = vld [vmem:[#allocation39_spill] sm:$0xff] }
 0x11b   :  { %1600 = vmatpush1.bf16.msra.mxu0 %v4514_v28  ;;  %1729 = vmatpush1.bf16.msra.mxu1 %v4519_v29  ;;  %v7215_v28 = vld [vmem:[#allocation40_spill] sm:$0xff]  ;;  %v7216_v29 = vld [vmem:[#allocation41_spill] sm:$0xff] }
 0x11c   :  { %1601 = vmatprep.subr.bf16.mxu0 %v4529_v31  ;;  %1730 = vmatprep.subr.bf16.mxu1 %v4536_v32  ;;  %v7217_v31 = vld [vmem:[#allocation42_spill] sm:$0xff]  ;;  %v7218_v32 = vld [vmem:[#allocation43_spill] sm:$0xff] }
 0x11f   :  { %1602 = vmatpush1.bf16.msra.mxu0 %v4541_v33  ;;  %1731 = vmatpush1.bf16.msra.mxu1 %v4548_v34  ;;  %v7219_v33 = vld [vmem:[#allocation44_spill] sm:$0xff]  ;;  %v7220_v34 = vld [vmem:[#allocation45_spill] sm:$0xff] }
 0x120   :  { %1603 = vmatprep.subr.bf16.mxu0 %v4553_v35  ;;  %1732 = vmatprep.subr.bf16.mxu1 %v4560_v36  ;;  %v7221_v35 = vld [vmem:[#allocation46_spill] sm:$0xff]  ;;  %v7222_v36 = vld [vmem:[#allocation47_spill] sm:$0xff] }
 0x123   :  { %1604 = vmatpush1.bf16.msra.mxu0 %v4565_v37  ;;  %1733 = vmatpush1.bf16.msra.mxu1 %v4570_v38  ;;  %v7223_v37 = vld [vmem:[#allocation48_spill] sm:$0xff]  ;;  %v7224_v38 = vld [vmem:[#allocation49_spill] sm:$0xff] }
 0x124   :  { %1605 = vmatprep.subr.bf16.mxu0 %v4577_v39  ;;  %1734 = vmatprep.subr.bf16.mxu1 %v4584_v40  ;;  %v7225_v39 = vld [vmem:[#allocation50_spill] sm:$0xff]  ;;  %v7226_v40 = vld [vmem:[#allocation51_spill] sm:$0xff] }
 0x127   :  { %1606 = vmatpush1.bf16.msra.mxu0 %v7177_v51  ;;  %1735 = vmatpush1.bf16.msra.mxu1 %v7178_v52  ;;  %v7233_v51 = vld [vmem:[#allocation58_spill] sm:$0xff]  ;;  %v7234_v52 = vld [vmem:[#allocation59_spill] sm:$0xff] }
 0x128   :  { %1607 = vmatprep.subr.bf16.mxu0 %v7179_v53  ;;  %1736 = vmatprep.subr.bf16.mxu1 %v7180_v54  ;;  %v7235_v53 = vld [vmem:[#allocation60_spill] sm:$0xff]  ;;  %v7236_v54 = vld [vmem:[#allocation61_spill] sm:$0xff] }
 0x12b   :  { %1608 = vmatpush1.bf16.msra.mxu0 %v7181_v55  ;;  %1737 = vmatpush1.bf16.msra.mxu1 %v7182_v56  ;;  %v7237_v55 = vld [vmem:[#allocation62_spill] sm:$0xff]  ;;  %v7238_v56 = vld [vmem:[#allocation63_spill] sm:$0xff] }
 0x12c   :  { %1609 = vmatprep.subr.bf16.mxu0 %v7183_v57  ;;  %1738 = vmatprep.subr.bf16.mxu1 %v7184_v58  ;;  %v7239_v57 = vld [vmem:[#allocation64_spill] sm:$0xff]  ;;  %v7240_v58 = vld [vmem:[#allocation65_spill] sm:$0xff] }
 0x12f   :  { %1610 = vmatpush1.bf16.msra.mxu0 %v7185_v59  ;;  %1739 = vmatpush1.bf16.msra.mxu1 %v7186_v60  ;;  %v7241_v59 = vld [vmem:[#allocation66_spill] sm:$0xff]  ;;  %v7242_v60 = vld [vmem:[#allocation67_spill] sm:$0xff] }
 0x130   :  { %1611 = vmatprep.subr.bf16.mxu0 %v7187_v61  ;;  %1740 = vmatprep.subr.bf16.mxu1 %v7188_v62  ;;  %v7243_v61 = vld [vmem:[#allocation68_spill] sm:$0xff]  ;;  %v7244_v62 = vld [vmem:[#allocation69_spill] sm:$0xff] }
 0x133   :  { %1612 = vmatpush1.bf16.msra.mxu0 %v7189_v63  ;;  %1741 = vmatpush1.bf16.msra.mxu1 %v7190_v0  ;;  %v7245_v63 = vld [vmem:[#allocation70_spill] sm:$0xff]  ;;  %v7246_v0 = vld [vmem:[#allocation71_spill] sm:$0xff] }
 0x134   :  { %1613 = vmatprep.subr.bf16.mxu0 %v7191_v1  ;;  %1742 = vmatprep.subr.bf16.mxu1 %v7192_v2  ;;  %v7247_v1 = vld [vmem:[#allocation72_spill] sm:$0xff]  ;;  %v7248_v2 = vld [vmem:[#allocation73_spill] sm:$0xff] }
 0x137   :  { %1614 = vmatpush1.bf16.msra.mxu0 %v7193_v4  ;;  %1743 = vmatpush1.bf16.msra.mxu1 %v7194_v5  ;;  %v7249_v4 = vld [vmem:[#allocation74_spill] sm:$0xff]  ;;  %v7250_v5 = vld [vmem:[#allocation75_spill] sm:$0xff] }
 0x138   :  { %1615 = vmatprep.subr.bf16.mxu0 %v7195_v6  ;;  %1744 = vmatprep.subr.bf16.mxu1 %v7196_v7  ;;  %v7251_v6 = vld [vmem:[#allocation76_spill] sm:$0xff]  ;;  %v7252_v7 = vld [vmem:[#allocation77_spill] sm:$0xff] }
 0x13b   :  { %1616 = vmatpush1.bf16.msra.mxu0 %v7197_v8  ;;  %1745 = vmatpush1.bf16.msra.mxu1 %v7198_v9  ;;  %v7253_v8 = vld [vmem:[#allocation78_spill] sm:$0xff]  ;;  %v7254_v9 = vld [vmem:[#allocation79_spill] sm:$0xff] }
 0x13c   :  { %1617 = vmatprep.subr.bf16.mxu0 %v7199_v10  ;;  %1746 = vmatprep.subr.bf16.mxu1 %v7200_v11  ;;  %v7255_v10 = vld [vmem:[#allocation80_spill] sm:$0xff]  ;;  %v7256_v11 = vld [vmem:[#allocation81_spill] sm:$0xff] }
 0x13f   :  { %1618 = vmatpush1.bf16.msra.mxu0 %v7201_v13  ;;  %1747 = vmatpush1.bf16.msra.mxu1 %v7202_v14  ;;  %v7258_v13 = vld [vmem:[#allocation83_spill] sm:$0xff]  ;;  %v7259_v14 = vld [vmem:[#allocation84_spill] sm:$0xff] }
 0x140   :  { %1630 = vmatprep.subr.bf16.mxu0 %v7203_v15  ;;  %1759 = vmatprep.subr.bf16.mxu1 %v7204_v16  ;;  %v3789_v15 = vld [vmem:[%s6834_s0 + $0x40] ss:$24 sps:$4 sm:$0xff]  }
 0x141   :  { %v7260_v16 = vld [vmem:[#allocation85_spill] sm:$0xff] }
 0x142   :  { %1620 = vmatmul.mubr.bf16.vlgmr.msra.gmra.mrb[4].mxu0 %v3786_v12  ;;  %1749 = vmatmul.mubr.bf16.vlgmr.msra.gmra.mrb[4].mxu1 %v3786_v12  ;;  %v7257_v12 = vld [vmem:[#allocation82_spill] sm:$0xff] }
 0x143   :  { %1631 = vmatpush1.bf16.msra.mxu0 %v7205_v18  ;;  %1760 = vmatpush1.bf16.msra.mxu1 %v7206_v19  ;;  %v3792_v18 = vld [vmem:[%s6835_s3] sm:$0xff]   ;;  %v7007_v19 = vmov 0.0  }
 0x144   :  { %1632 = vmatprep.subr.bf16.mxu0 %v7207_v20  ;;  %1761 = vmatprep.subr.bf16.mxu1 %v7208_v21  ;;  %v3793_v20 = vld [vmem:[%s6835_s3 + $0x8] sm:$0xff]   ;;  %v3803_v21 = vld [vmem:[%s6835_s3 + $0x40] sm:$0xff]  }
 0x145   :  { %1662 = vmatprep.mubr.bf16.mxu0 %v3791_v17  ;;  %1791 = vmatprep.mubr.bf16.mxu1 %v3791_v17  ;;  %v7261_v17 = vld [vmem:[#allocation86_spill] sm:$0xff] }
 0x147   :  { %1633 = vmatpush1.bf16.msra.mxu0 %v4784_v3  ;;  %1762 = vmatpush1.bf16.msra.mxu1 %v4789_v45  ;;  %v7227_v45 = vld [vmem:[#allocation52_spill] sm:$0xff]  ;;  %v7229_v3 = vld [vmem:[#allocation54_spill] sm:$0xff] }
 0x148   :  { %1634 = vmatprep.subr.bf16.mxu0 %v4799_v46  ;;  %1763 = vmatprep.subr.bf16.mxu1 %v4806_v30  ;;  %v7228_v46 = vld [vmem:[#allocation53_spill] sm:$0xff]  ;;  %v7230_v30 = vld [vmem:[#allocation55_spill] sm:$0xff] }
 0x14b   :  { %1635 = vmatpush1.bf16.msra.mxu0 %v7209_v22  ;;  %1764 = vmatpush1.bf16.msra.mxu1 %v7210_v23  ;;  %v3794_v22 = vld [vmem:[%s6835_s3 + $0x10] sm:$0xff]   ;;  %v3804_v23 = vld [vmem:[%s6835_s3 + $0x48] sm:$0xff]  }
 0x14c   :  { %1636 = vmatprep.subr.bf16.mxu0 %v7211_v24  ;;  %1765 = vmatprep.subr.bf16.mxu1 %v7212_v25  ;;  %v3795_v24 = vld [vmem:[%s6835_s3 + $0x18] sm:$0xff]   ;;  %v3805_v25 = vld [vmem:[%s6835_s3 + $0x50] sm:$0xff]  }
 0x14f   :  { %1637 = vmatpush1.bf16.msra.mxu0 %v7213_v26  ;;  %1766 = vmatpush1.bf16.msra.mxu1 %v7214_v27  ;;  %v3796_v26 = vld [vmem:[%s6835_s3 + $0x20] sm:$0xff]   ;;  %v3806_v27 = vld [vmem:[%s6835_s3 + $0x58] sm:$0xff]  }
 0x150   :  { %1638 = vmatprep.subr.bf16.mxu0 %v7215_v28  ;;  %1767 = vmatprep.subr.bf16.mxu1 %v7216_v29  ;;  %v3797_v28 = vld [vmem:[%s6835_s3 + $0x28] sm:$0xff]   ;;  %v3807_v29 = vld [vmem:[%s6835_s3 + $0x60] sm:$0xff]  }
 0x153   :  { %1639 = vmatpush1.bf16.msra.mxu0 %v7217_v31  ;;  %1768 = vmatpush1.bf16.msra.mxu1 %v7218_v32 }
 0x154   :  { %1640 = vmatprep.subr.bf16.mxu0 %v7219_v33  ;;  %1769 = vmatprep.subr.bf16.mxu1 %v7220_v34 }
 0x157   :  { %1641 = vmatpush1.bf16.msra.mxu0 %v7221_v35  ;;  %1770 = vmatpush1.bf16.msra.mxu1 %v7222_v36 }
 0x158   :  { %1642 = vmatprep.subr.bf16.mxu0 %v7223_v37  ;;  %1771 = vmatprep.subr.bf16.mxu1 %v7224_v38 }
 0x15b   :  { %1643 = vmatpush1.bf16.msra.mxu0 %v7225_v39  ;;  %1772 = vmatpush1.bf16.msra.mxu1 %v7226_v40  ;;  %v3798_v39 = vld [vmem:[%s6835_s3 + $0x30] sm:$0xff]   ;;  %v5644_v40 = vld [vmem:[%s6836_s2] ss:$0 sm:$0xff] }
 0x15c   :  { %1644 = vmatprep.subr.bf16.mxu0 %v7227_v45  ;;  %1773 = vmatprep.subr.bf16.mxu1 %v7228_v46 }
 0x15f   :  { %1645 = vmatpush1.bf16.msra.mxu0 %v7229_v3  ;;  %1774 = vmatpush1.bf16.msra.mxu1 %v7230_v30 }
 0x160   :  { %1646 = vmatprep.subr.bf16.mxu0 %v7231_v49  ;;  %1775 = vmatprep.subr.bf16.mxu1 %v7232_v50 }
 0x163   :  { %1647 = vmatpush1.bf16.msra.mxu0 %v7233_v51  ;;  %1776 = vmatpush1.bf16.msra.mxu1 %v7234_v52 }
 0x164   :  { %1648 = vmatprep.subr.bf16.mxu0 %v7235_v53  ;;  %1777 = vmatprep.subr.bf16.mxu1 %v7236_v54 }
 0x167   :  { %1649 = vmatpush1.bf16.msra.mxu0 %v7237_v55  ;;  %1778 = vmatpush1.bf16.msra.mxu1 %v7238_v56 }
 0x168   :  { %1650 = vmatprep.subr.bf16.mxu0 %v7239_v57  ;;  %1779 = vmatprep.subr.bf16.mxu1 %v7240_v58  ;;  %v3799_v57 = vld [vmem:[%s6835_s3 + $0x38] sm:$0xff]  }
 0x16b   :  { %1651 = vmatpush1.bf16.msra.mxu0 %v7241_v59  ;;  %1780 = vmatpush1.bf16.msra.mxu1 %v7242_v60 }
 0x16c   :  { %1652 = vmatprep.subr.bf16.mxu0 %v7243_v61  ;;  %1781 = vmatprep.subr.bf16.mxu1 %v7244_v62 }
 0x16f   :  { %1653 = vmatpush1.bf16.msra.mxu0 %v7245_v63  ;;  %1782 = vmatpush1.bf16.msra.mxu1 %v7246_v0 }
 0x170   :  { %1654 = vmatprep.subr.bf16.mxu0 %v7247_v1  ;;  %1783 = vmatprep.subr.bf16.mxu1 %v7248_v2  ;;  %v7262_v1 = vld [vmem:[#allocation88_spill] sm:$0xff] }
 0x173   :  { %1655 = vmatpush1.bf16.msra.mxu0 %v7249_v4  ;;  %1784 = vmatpush1.bf16.msra.mxu1 %v7250_v5  ;;  %v5657_v4 = vld [vmem:[%s6834_s0 + $0x64] ss:$24 sps:$4 sm:$0xff]  }
 0x174   :  { %1656 = vmatprep.subr.bf16.mxu0 %v7251_v6  ;;  %1785 = vmatprep.subr.bf16.mxu1 %v7252_v7 }
 0x177   :  { %1657 = vmatpush1.bf16.msra.mxu0 %v7253_v8  ;;  %1786 = vmatpush1.bf16.msra.mxu1 %v7254_v9  ;;  %v7263_v8 = vld [vmem:[#allocation91_spill] sm:$0xff] }
 0x178   :  { %1658 = vmatprep.subr.bf16.mxu0 %v7255_v10  ;;  %1787 = vmatprep.subr.bf16.mxu1 %v7256_v11  ;;  %v7264_v10 = vld [vmem:[#allocation93_spill] sm:$0xff] }
 0x17b   :  { %1659 = vmatpush1.bf16.msra.mxu0 %v7257_v12  ;;  %1788 = vmatpush1.bf16.msra.mxu1 %v7258_v13  ;;  %v7265_v12 = vld [vmem:[#allocation95_spill] sm:$0xff] }
 0x17c   :  { %1660 = vmatprep.subr.bf16.mxu0 %v7259_v14  ;;  %1789 = vmatprep.subr.bf16.mxu1 %v5118_v48  ;;  %v7266_v14 = vld [vmem:[#allocation97_spill] sm:$0xff] }
 0x17f   :  { %1661 = vmatpush1.bf16.msra.mxu0 %v7260_v16  ;;  %1790 = vmatpush1.bf16.msra.mxu1 %v7261_v17  ;;  %v7268_v16 = vld [vmem:[#allocation101_spill] sm:$0xff] }
 0x180   :  { %3348 = vmatprep.subr.bf16.mxu1 %v7007_v19  ;;  %3328 = vmatprep.subr.bf16.mxu0 %v7007_v19 }
 0x182   :  { %1663 = vmatmul.mubr.bf16.vlgmr.msra.gmra.mrb[4].mxu0 %v3789_v15  ;;  %1792 = vmatmul.mubr.bf16.vlgmr.msra.gmra.mrb[4].mxu1 %v3789_v15  ;;  %v7267_v15 = vld [vmem:[#allocation99_spill] sm:$0xff] }
 0x183   :  { %3349 = vmatpush3.bf16.msra.mxu1 %v3792_v18  ;;  %3364 = vmatprep.mubr.msk.bf16.mxu1 %vm4072_vm0, %v7007_v19  ;;  %v7269_v18 = vld [vmem:[#allocation103_spill] sm:$0xff] }
 0x184   :  { %3350 = vmatprep.subr.bf16.mxu1 %v7007_v19  ;;  %3344 = vmatprep.mubr.msk.bf16.mxu0 %vm4072_vm0, %v7007_v19 }
 0x185   :  { %3329 = vmatpush3.bf16.msra.mxu0 %v3803_v21  ;;  %v7271_v21 = vld [vmem:[#allocation107_spill] sm:$0xff] }
 0x186   :  { %3330 = vmatprep.subr.bf16.mxu0 %v7007_v19 }
 0x187   :  { %3351 = vmatpush3.bf16.msra.mxu1 %v3793_v20  ;;  %v7270_v20 = vld [vmem:[#allocation105_spill] sm:$0xff] }
 0x188   :  { %3352 = vmatprep.subr.bf16.mxu1 %v7007_v19 }
 0x189   :  { %3331 = vmatpush3.bf16.msra.mxu0 %v3804_v23  ;;  %v7274_v23 = vld [vmem:[#allocation113_spill] sm:$0xff] }
 0x18a   :  { %3332 = vmatprep.subr.bf16.mxu0 %v7007_v19 }
 0x18b   :  { %3353 = vmatpush3.bf16.msra.mxu1 %v3794_v22  ;;  %v7273_v22 = vld [vmem:[#allocation111_spill] sm:$0xff] }
 0x18c   :  { %3354 = vmatprep.subr.bf16.mxu1 %v7007_v19 }
 0x18d   :  { %3333 = vmatpush3.bf16.msra.mxu0 %v3805_v25  ;;  %v7276_v25 = vld [vmem:[#allocation117_spill] sm:$0xff] }
 0x18e   :  { %3334 = vmatprep.subr.bf16.mxu0 %v7007_v19 }
 0x18f   :  { %3355 = vmatpush3.bf16.msra.mxu1 %v3795_v24  ;;  %v7275_v24 = vld [vmem:[#allocation115_spill] sm:$0xff] }
 0x190   :  { %3356 = vmatprep.subr.bf16.mxu1 %v7007_v19 }
 0x191   :  { %3335 = vmatpush3.bf16.msra.mxu0 %v3806_v27  ;;  %v7278_v27 = vld [vmem:[#allocation121_spill] sm:$0xff] }
 0x192   :  { %3336 = vmatprep.subr.bf16.mxu0 %v7007_v19 }
 0x193   :  { %3357 = vmatpush3.bf16.msra.mxu1 %v3796_v26  ;;  %v7277_v26 = vld [vmem:[#allocation119_spill] sm:$0xff] }
 0x194   :  { %3358 = vmatprep.subr.bf16.mxu1 %v7007_v19 }
 0x195   :  { %v1335_v31 = vpop.f32.mrb[0].mxu0  ;;  %v1464_v32 = vpop.f32.mrb[0].mxu1  ;;  %3337 = vmatpush3.bf16.msra.mxu0 %v3807_v29  ;;  %v7280_v29 = vld [vmem:[#allocation125_spill] sm:$0xff] }
 0x196   :  { %v1337_v33 = vpop.f32.mrb[1].mxu0  ;;  %v1466_v34 = vpop.f32.mrb[1].mxu1  ;;  %3338 = vmatprep.subr.bf16.mxu0 %v7007_v19 }
 0x197   :  { %v1473_v35 = vmax.f32 %v1335_v31, %v1337_v33  ;;  %v1475_v36 = vmax.f32 %v1464_v32, %v1466_v34  ;;  %v1339_v37 = vpop.f32.mrb[2].mxu0  ;;  %v1468_v38 = vpop.f32.mrb[2].mxu1  ;;  %3359 = vmatpush3.bf16.msra.mxu1 %v3797_v28  ;;  %v7279_v28 = vld [vmem:[#allocation123_spill] sm:$0xff]  ;;  %v7282_v32 = vld [vmem:[#allocation129_spill] sm:$0xff] }
 0x198   :  { %v1341_v45 = vpop.f32.mrb[3].mxu0  ;;  %v1470_v46 = vpop.f32.mrb[3].mxu1  ;;  %3360 = vmatprep.subr.bf16.mxu1 %v7007_v19  ;;  %v7281_v31 = vld [vmem:[#allocation127_spill] sm:$0xff] }
 0x199   :  { %v1477_v3 = vmax.f32 %v1473_v35, %v1475_v36  ;;  %v1474_v49 = vmax.f32 %v1339_v37, %v1341_v45  ;;  %v1476_v51 = vmax.f32 %v1468_v38, %v1470_v46  ;;  %v5686_v33 = vld [vmem:[%s6833_s1 + $0x18c] ss:$16 sps:$4 sm:$0xff]   ;;  %v5692_v34 = vld [vmem:[%s6833_s1 + $0x188] ss:$16 sps:$4 sm:$0xff]   ;;  %v3809_v37 = vld [vmem:[%s6835_s3 + $0x70] sm:$0xff]  }
 0x19a   :  { %v5707_v35 = vld [vmem:[%s6833_s1 + $0x1a8] ss:$16 sps:$4 sm:$0xff]   ;;  %v5714_v36 = vld [vmem:[%s6833_s1 + $0x1cc] ss:$16 sps:$4 sm:$0xff]  }
 0x19b   :  { %v1486_v53 = vadd.f32 %v5644_v40, %v1477_v3  ;;  %v1478_v55 = vmax.f32 %v1474_v49, %v1476_v51  ;;  %3361 = vmatpush3.bf16.msra.mxu1 %v3798_v39  ;;  %v5723_v38 = vld [vmem:[%s6833_s1 + $0x1c8] ss:$16 sps:$4 sm:$0xff]   ;;  %v5730_v39 = vld [vmem:[%s6833_s1 + $0x1ec] ss:$16 sps:$4 sm:$0xff]  }
 0x19c   :  { %3362 = vmatprep.subr.bf16.mxu1 %v7007_v19  ;;  %v3810_v45 = vld [vmem:[%s6835_s3 + $0x78] sm:$0xff]   ;;  %v5750_v49 = vld [vmem:[%s6834_s0 + $0x6c] ss:$24 sps:$4 sm:$0xff]  }
 0x19d   :  { %v1487_v59 = vadd.f32 %v5644_v40, %v1478_v55  ;;  %v1488_v61 = vmax.f32 %v1486_v53, 0.0  ;;  %v5739_v46 = vld [vmem:[%s6834_s0 + $0x60] ss:$24 sps:$4 sm:$0xff]   ;;  %v7283_v51 = vld [vmem:[#allocation87_spill] sm:$0xff] }
 0x19e   :  { %v5744_v3 = vld [vmem:[%s6833_s1 + $0x1e8] ss:$16 sps:$4 sm:$0xff]   ;;  %v5756_v53 = vld [vmem:[%s6833_s1 + $0x20c] ss:$16 sps:$4 sm:$0xff]  }
 0x19f   :  { %v1489_v63 = vmax.f32 %v1487_v59, 0.0  ;;  %3363 = vmatpush3.bf16.msra.mxu1 %v3799_v57  ;;  %v5763_v55 = vld [vmem:[%s6833_s1 + $0x208] ss:$16 sps:$4 sm:$0xff]   ;;  %v5770_v57 = vld [vmem:[%s6833_s1 + $0x22c] ss:$16 sps:$4 sm:$0xff]  }
 0x1a0   :  { %2174 = vmatprep.subr.bf16.mxu1 %v7262_v1  ;;  %v5776_v59 = vld [vmem:[%s6833_s1 + $0x228] ss:$16 sps:$4 sm:$0xff]   ;;  %v5794_v1 = vld [vmem:[%s6833_s1 + $0x26c] ss:$16 sps:$4 sm:$0xff]  }
 0x1a1   :  { %v1490_v6 = vpack.c.bf16 %v1489_v63, %v1488_v61  ;;  %v5782_v61 = vld [vmem:[%s6833_s1 + $0x24c] ss:$16 sps:$4 sm:$0xff]   ;;  %v5788_v63 = vld [vmem:[%s6833_s1 + $0x248] ss:$16 sps:$4 sm:$0xff]  }
 0x1a3   :  { %3365 = vmatmul.mubr.bf16.vlgmr.msra.gmra.mrb[8].mxu1 %v1490_v6  ;;  %v5800_v6 = vld [vmem:[%s6833_s1 + $0x268] ss:$16 sps:$4 sm:$0xff]  }
 0x1a4   :  { %2175 = vmatpush1.bf16.msra.mxu1 %v5163_v47  ;;  %2206 = vmatprep.mubr.bf16.mxu1 %v5657_v4  ;;  %v7272_v47 = vld [vmem:[#allocation109_spill] sm:$0xff]  ;;  %7284 = vst [vmem:[#allocation2_spill] sm:$0xff] %v5800_v6 }
 0x1a5   :  { %2176 = vmatprep.subr.bf16.mxu1 %v7263_v8  ;;  %v5806_v8 = vld [vmem:[%s6833_s1 + $0x28c] ss:$16 sps:$4 sm:$0xff]  }
 0x1a6   :  { %7285 = vst [vmem:[#allocation3_spill] sm:$0xff] %v5806_v8 }
 0x1a8   :  { %2177 = vmatpush1.bf16.msra.mxu1 %v7264_v10  ;;  %v5812_v10 = vld [vmem:[%s6833_s1 + $0x288] ss:$16 sps:$4 sm:$0xff]  }
 0x1a9   :  { %2178 = vmatprep.subr.bf16.mxu1 %v7265_v12  ;;  %7286 = vst [vmem:[#allocation4_spill] sm:$0xff] %v5812_v10  ;;  %v5818_v12 = vld [vmem:[%s6833_s1 + $0x2ac] ss:$16 sps:$4 sm:$0xff]  }
 0x1aa   :  { %7287 = vst [vmem:[#allocation5_spill] sm:$0xff] %v5818_v12 }
 0x1ac   :  { %2179 = vmatpush1.bf16.msra.mxu1 %v7266_v14  ;;  %v5824_v14 = vld [vmem:[%s6833_s1 + $0x2a8] ss:$16 sps:$4 sm:$0xff]  }
 0x1ad   :  { %2180 = vmatprep.subr.bf16.mxu1 %v7267_v15  ;;  %7288 = vst [vmem:[#allocation6_spill] sm:$0xff] %v5824_v14  ;;  %v5830_v15 = vld [vmem:[%s6833_s1 + $0x2cc] ss:$16 sps:$4 sm:$0xff]  }
 0x1ae   :  { %7289 = vst [vmem:[#allocation7_spill] sm:$0xff] %v5830_v15 }
 0x1b0   :  { %2181 = vmatpush1.bf16.msra.mxu1 %v7268_v16  ;;  %v5836_v16 = vld [vmem:[%s6833_s1 + $0x2c8] ss:$16 sps:$4 sm:$0xff]  }
 0x1b1   :  { %2182 = vmatprep.subr.bf16.mxu1 %v7269_v18  ;;  %7290 = vst [vmem:[#allocation8_spill] sm:$0xff] %v5836_v16  ;;  %v5842_v18 = vld [vmem:[%s6833_s1 + $0x2ec] ss:$16 sps:$4 sm:$0xff]  }
 0x1b2   :  { %7291 = vst [vmem:[#allocation9_spill] sm:$0xff] %v5842_v18 }
 0x1b4   :  { %2183 = vmatpush1.bf16.msra.mxu1 %v7270_v20  ;;  %v5848_v20 = vld [vmem:[%s6833_s1 + $0x2e8] ss:$16 sps:$4 sm:$0xff]  }
 0x1b5   :  { %2184 = vmatprep.subr.bf16.mxu1 %v7271_v21  ;;  %7292 = vst [vmem:[#allocation10_spill] sm:$0xff] %v5848_v20  ;;  %v5854_v21 = vld [vmem:[%s6833_s1 + $0x30c] ss:$16 sps:$4 sm:$0xff]  }
 0x1b6   :  { %7293 = vst [vmem:[#allocation11_spill] sm:$0xff] %v5854_v21 }
 0x1b8   :  { %2185 = vmatpush1.bf16.msra.mxu1 %v7272_v47  ;;  %v5860_v47 = vld [vmem:[%s6833_s1 + $0x308] ss:$16 sps:$4 sm:$0xff]  }
 0x1b9   :  { %2186 = vmatprep.subr.bf16.mxu1 %v7273_v22  ;;  %7294 = vst [vmem:[#allocation12_spill] sm:$0xff] %v5860_v47  ;;  %v5866_v22 = vld [vmem:[%s6833_s1 + $0x32c] ss:$16 sps:$4 sm:$0xff]  }
 0x1ba   :  { %7295 = vst [vmem:[#allocation13_spill] sm:$0xff] %v5866_v22 }
 0x1bc   :  { %2187 = vmatpush1.bf16.msra.mxu1 %v7274_v23  ;;  %v5872_v23 = vld [vmem:[%s6833_s1 + $0x328] ss:$16 sps:$4 sm:$0xff]  }
 0x1bd   :  { %2188 = vmatprep.subr.bf16.mxu1 %v7275_v24  ;;  %7296 = vst [vmem:[#allocation14_spill] sm:$0xff] %v5872_v23  ;;  %v5878_v24 = vld [vmem:[%s6833_s1 + $0x34c] ss:$16 sps:$4 sm:$0xff]  }
 0x1be   :  { %7297 = vst [vmem:[#allocation15_spill] sm:$0xff] %v5878_v24 }
 0x1c0   :  { %2189 = vmatpush1.bf16.msra.mxu1 %v7276_v25  ;;  %v5884_v25 = vld [vmem:[%s6833_s1 + $0x348] ss:$16 sps:$4 sm:$0xff]  }
 0x1c1   :  { %2190 = vmatprep.subr.bf16.mxu1 %v7277_v26  ;;  %7298 = vst [vmem:[#allocation16_spill] sm:$0xff] %v5884_v25  ;;  %v5890_v26 = vld [vmem:[%s6833_s1 + $0x36c] ss:$16 sps:$4 sm:$0xff]  }
 0x1c2   :  { %7299 = vst [vmem:[#allocation17_spill] sm:$0xff] %v5890_v26 }
 0x1c4   :  { %2191 = vmatpush1.bf16.msra.mxu1 %v7278_v27  ;;  %v5896_v27 = vld [vmem:[%s6833_s1 + $0x368] ss:$16 sps:$4 sm:$0xff]  }
 0x1c5   :  { %2192 = vmatprep.subr.bf16.mxu1 %v7279_v28  ;;  %7300 = vst [vmem:[#allocation18_spill] sm:$0xff] %v5896_v27  ;;  %v5902_v28 = vld [vmem:[%s6833_s1 + $0x38c] ss:$16 sps:$4 sm:$0xff]  }
 0x1c6   :  { %7301 = vst [vmem:[#allocation19_spill] sm:$0xff] %v5902_v28 }
 0x1c8   :  { %2193 = vmatpush1.bf16.msra.mxu1 %v7280_v29  ;;  %v5908_v29 = vld [vmem:[%s6833_s1 + $0x388] ss:$16 sps:$4 sm:$0xff]  }
 0x1c9   :  { %2194 = vmatprep.subr.bf16.mxu1 %v7281_v31  ;;  %7302 = vst [vmem:[#allocation20_spill] sm:$0xff] %v5908_v29  ;;  %v5914_v31 = vld [vmem:[%s6833_s1 + $0x3ac] ss:$16 sps:$4 sm:$0xff]  }
 0x1ca   :  { %7303 = vst [vmem:[#allocation21_spill] sm:$0xff] %v5914_v31 }
 0x1cc   :  { %2195 = vmatpush1.bf16.msra.mxu1 %v7282_v32  ;;  %v5920_v32 = vld [vmem:[%s6833_s1 + $0x3a8] ss:$16 sps:$4 sm:$0xff]  }
 0x1cd   :  { %2196 = vmatprep.subr.bf16.mxu1 %v5415_v43  ;;  %v5698_v43 = vld [vmem:[%s6833_s1 + $0x1ac] ss:$16 sps:$4 sm:$0xff]   ;;  %7304 = vst [vmem:[#allocation22_spill] sm:$0xff] %v5920_v32 }
 0x1d0   :  { %2197 = vmatpush1.bf16.msra.mxu1 %v5427_v42  ;;  %v3808_v42 = vld [vmem:[%s6835_s3 + $0x68] sm:$0xff]  }
 0x1d1   :  { %2198 = vmatprep.subr.bf16.mxu1 %v5686_v33  ;;  %3339 = vmatpush3.bf16.msra.mxu0 %v3808_v42  ;;  %v5926_v42 = vld [vmem:[%s6833_s1 + $0x3cc] ss:$16 sps:$4 sm:$0xff]  }
 0x1d2   :  { %3340 = vmatprep.subr.bf16.mxu0 %v7007_v19  ;;  %7305 = vst [vmem:[#allocation23_spill] sm:$0xff] %v5926_v42 }
 0x1d4   :  { %2199 = vmatpush1.bf16.msra.mxu1 %v5692_v34 }
 0x1d5   :  { %2200 = vmatprep.subr.bf16.mxu1 %v5698_v43  ;;  %3341 = vmatpush3.bf16.msra.mxu0 %v3809_v37  ;;  %v5932_v37 = vld [vmem:[%s6833_s1 + $0x3c8] ss:$16 sps:$4 sm:$0xff]  }
 0x1d6   :  { %3342 = vmatprep.subr.bf16.mxu0 %v7007_v19  ;;  %7306 = vst [vmem:[#allocation24_spill] sm:$0xff] %v5932_v37  ;;  %v5944_v19 = vld [vmem:[%s6834_s0 + $0x68] ss:$24 sps:$4 sm:$0xff]  }
 0x1d8   :  { %2201 = vmatpush1.bf16.msra.mxu1 %v5707_v35 }
 0x1d9   :  { %2202 = vmatprep.subr.bf16.mxu1 %v5714_v36  ;;  %3343 = vmatpush3.bf16.msra.mxu0 %v3810_v45  ;;  %v5938_v45 = vld [vmem:[%s6833_s1 + $0x3ec] ss:$16 sps:$4 sm:$0xff]  }
 0x1da   :  { %2045 = vmatprep.subr.bf16.mxu0 %v7283_v51  ;;  %7307 = vst [vmem:[#allocation25_spill] sm:$0xff] %v5938_v45 }
 0x1dc   :  { %2203 = vmatpush1.bf16.msra.mxu1 %v5723_v38 }
 0x1dd   :  { %2204 = vmatprep.subr.bf16.mxu1 %v5730_v39 }
 0x1e0   :  { %2205 = vmatpush1.bf16.msra.mxu1 %v5744_v3 }
 0x1e1   :  { %2217 = vmatprep.subr.bf16.mxu1 %v5756_v53 }
 0x1e3   :  { %2207 = vmatmul.mubr.bf16.vlgmr.msra.gmra.mrb[12].mxu1 %v5739_v46 }
 0x1e4   :  { %2218 = vmatpush1.bf16.msra.mxu1 %v5763_v55  ;;  %2249 = vmatprep.mubr.bf16.mxu1 %v5750_v49 }
 0x1e5   :  { %2219 = vmatprep.subr.bf16.mxu1 %v5770_v57 }
 0x1e8   :  { %2220 = vmatpush1.bf16.msra.mxu1 %v5776_v59 }
 0x1e9   :  { %2221 = vmatprep.subr.bf16.mxu1 %v5782_v61 }
 0x1ec   :  { %2222 = vmatpush1.bf16.msra.mxu1 %v5788_v63 }
 0x1ed   :  { %2223 = vmatprep.subr.bf16.mxu1 %v5794_v1 }
 0x1f0   :  { %2224 = vmatpush1.bf16.msra.mxu1 %v5800_v6 }
 0x1f1   :  { %2225 = vmatprep.subr.bf16.mxu1 %v5806_v8 }
 0x1f4   :  { %2226 = vmatpush1.bf16.msra.mxu1 %v5812_v10 }
 0x1f5   :  { %2227 = vmatprep.subr.bf16.mxu1 %v5818_v12 }
 0x1f8   :  { %2228 = vmatpush1.bf16.msra.mxu1 %v5824_v14 }
 0x1f9   :  { %2229 = vmatprep.subr.bf16.mxu1 %v5830_v15 }
 0x1fc   :  { %2230 = vmatpush1.bf16.msra.mxu1 %v5836_v16 }
 0x1fd   :  { %2231 = vmatprep.subr.bf16.mxu1 %v5842_v18 }
 0x200   :  { %2232 = vmatpush1.bf16.msra.mxu1 %v5848_v20  ;;  %v3822_v20 = vld [vmem:[%s6835_s3 + $0x90] sm:$0xff]  }
 0x201   :  { %2233 = vmatprep.subr.bf16.mxu1 %v5854_v21  ;;  %v3821_v21 = vld [vmem:[%s6835_s3 + $0x88] sm:$0xff]  }
 0x204   :  { %2234 = vmatpush1.bf16.msra.mxu1 %v5860_v47  ;;  %v7345_v47 = vmov 0.0  }
 0x205   :  { %2235 = vmatprep.subr.bf16.mxu1 %v5866_v22  ;;  %v3820_v22 = vld [vmem:[%s6835_s3 + $0x80] sm:$0xff]  }
 0x208   :  { %2236 = vmatpush1.bf16.msra.mxu1 %v5872_v23  ;;  %v6448_v23 = vld [vmem:[%s6833_s1 + $0x5e0] ss:$16 sps:$4 sm:$0xff]  }
 0x209   :  { %2237 = vmatprep.subr.bf16.mxu1 %v5878_v24  ;;  %v6442_v24 = vld [vmem:[%s6833_s1 + $0x5e4] ss:$16 sps:$4 sm:$0xff]  }
 0x20c   :  { %2238 = vmatpush1.bf16.msra.mxu1 %v5884_v25  ;;  %v6436_v25 = vld [vmem:[%s6833_s1 + $0x5c0] ss:$16 sps:$4 sm:$0xff]  }
 0x20d   :  { %2239 = vmatprep.subr.bf16.mxu1 %v5890_v26  ;;  %v6430_v26 = vld [vmem:[%s6833_s1 + $0x5c4] ss:$16 sps:$4 sm:$0xff]  }
 0x210   :  { %2240 = vmatpush1.bf16.msra.mxu1 %v5896_v27  ;;  %v6424_v27 = vld [vmem:[%s6833_s1 + $0x5a0] ss:$16 sps:$4 sm:$0xff]  }
 0x211   :  { %2241 = vmatprep.subr.bf16.mxu1 %v5902_v28  ;;  %v6418_v28 = vld [vmem:[%s6833_s1 + $0x5a4] ss:$16 sps:$4 sm:$0xff]  }
 0x214   :  { %2242 = vmatpush1.bf16.msra.mxu1 %v5908_v29  ;;  %v6412_v29 = vld [vmem:[%s6833_s1 + $0x580] ss:$16 sps:$4 sm:$0xff]  }
 0x215   :  { %2243 = vmatprep.subr.bf16.mxu1 %v5914_v31  ;;  %v5992_v31 = vld [vmem:[%s6833_s1 + $0x448] ss:$16 sps:$4 sm:$0xff]  }
 0x216   :  { %7314 = vst [vmem:[#allocation32_spill] sm:$0xff] %v5992_v31 }
 0x218   :  { %2244 = vmatpush1.bf16.msra.mxu1 %v5920_v32  ;;  %v5967_v32 = vld [vmem:[%s6833_s1 + $0x408] ss:$16 sps:$4 sm:$0xff]  }
 0x219   :  { %2245 = vmatprep.subr.bf16.mxu1 %v5926_v42  ;;  %v5949_v42 = vld [vmem:[%s6833_s1 + $0x3e8] ss:$16 sps:$4 sm:$0xff]   ;;  %7310 = vst [vmem:[#allocation28_spill] sm:$0xff] %v5967_v32 }
 0x21a   :  { %7308 = vst [vmem:[#allocation26_spill] sm:$0xff] %v5949_v42 }
 0x21c   :  { %2246 = vmatpush1.bf16.msra.mxu1 %v5932_v37  ;;  %v5955_v37 = vld [vmem:[%s6834_s0 + $0x74] ss:$24 sps:$4 sm:$0xff]  }
 0x21d   :  { %2247 = vmatprep.subr.bf16.mxu1 %v5938_v45  ;;  %v5960_v45 = vld [vmem:[%s6833_s1 + $0x40c] ss:$16 sps:$4 sm:$0xff]  }
 0x21e   :  { %7309 = vst [vmem:[#allocation27_spill] sm:$0xff] %v5960_v45 }
 0x220   :  { %2248 = vmatpush1.bf16.msra.mxu1 %v5949_v42  ;;  %v5974_v42 = vld [vmem:[%s6833_s1 + $0x42c] ss:$16 sps:$4 sm:$0xff]  }
 0x221   :  { %2260 = vmatprep.subr.bf16.mxu1 %v5960_v45  ;;  %7311 = vst [vmem:[#allocation29_spill] sm:$0xff] %v5974_v42  ;;  %v5980_v45 = vld [vmem:[%s6833_s1 + $0x428] ss:$16 sps:$4 sm:$0xff]  }
 0x222   :  { %7312 = vst [vmem:[#allocation30_spill] sm:$0xff] %v5980_v45 }
 0x223   :  { %2250 = vmatmul.mubr.bf16.vlgmr.msra.gmra.mrb[12].mxu1 %v5944_v19 }
 0x224   :  { %2261 = vmatpush1.bf16.msra.mxu1 %v5967_v32  ;;  %2292 = vmatprep.mubr.bf16.mxu1 %v5955_v37  ;;  %v5986_v32 = vld [vmem:[%s6833_s1 + $0x44c] ss:$16 sps:$4 sm:$0xff]  }
 0x225   :  { %2262 = vmatprep.subr.bf16.mxu1 %v5974_v42  ;;  %7313 = vst [vmem:[#allocation31_spill] sm:$0xff] %v5986_v32  ;;  %v5998_v42 = vld [vmem:[%s6833_s1 + $0x46c] ss:$16 sps:$4 sm:$0xff]  }
 0x226   :  { %7315 = vst [vmem:[#allocation33_spill] sm:$0xff] %v5998_v42 }
 0x228   :  { %2263 = vmatpush1.bf16.msra.mxu1 %v5980_v45  ;;  %v6004_v45 = vld [vmem:[%s6833_s1 + $0x468] ss:$16 sps:$4 sm:$0xff]  }
 0x229   :  { %2264 = vmatprep.subr.bf16.mxu1 %v5986_v32  ;;  %7316 = vst [vmem:[#allocation34_spill] sm:$0xff] %v6004_v45  ;;  %v6010_v32 = vld [vmem:[%s6833_s1 + $0x48c] ss:$16 sps:$4 sm:$0xff]  }
 0x22a   :  { %7317 = vst [vmem:[#allocation35_spill] sm:$0xff] %v6010_v32 }
 0x22c   :  { %2265 = vmatpush1.bf16.msra.mxu1 %v5992_v31  ;;  %v6016_v31 = vld [vmem:[%s6833_s1 + $0x488] ss:$16 sps:$4 sm:$0xff]  }
 0x22d   :  { %2266 = vmatprep.subr.bf16.mxu1 %v5998_v42  ;;  %7318 = vst [vmem:[#allocation36_spill] sm:$0xff] %v6016_v31  ;;  %v6022_v42 = vld [vmem:[%s6833_s1 + $0x4ac] ss:$16 sps:$4 sm:$0xff]  }
 0x22e   :  { %7319 = vst [vmem:[#allocation37_spill] sm:$0xff] %v6022_v42 }
 0x230   :  { %2267 = vmatpush1.bf16.msra.mxu1 %v6004_v45  ;;  %v6028_v45 = vld [vmem:[%s6833_s1 + $0x4a8] ss:$16 sps:$4 sm:$0xff]  }
 0x231   :  { %2268 = vmatprep.subr.bf16.mxu1 %v6010_v32  ;;  %7320 = vst [vmem:[#allocation38_spill] sm:$0xff] %v6028_v45  ;;  %v6034_v32 = vld [vmem:[%s6833_s1 + $0x4cc] ss:$16 sps:$4 sm:$0xff]  }
 0x232   :  { %7321 = vst [vmem:[#allocation39_spill] sm:$0xff] %v6034_v32 }
 0x234   :  { %2269 = vmatpush1.bf16.msra.mxu1 %v6016_v31  ;;  %v6040_v31 = vld [vmem:[%s6833_s1 + $0x4c8] ss:$16 sps:$4 sm:$0xff]  }
 0x235   :  { %2270 = vmatprep.subr.bf16.mxu1 %v6022_v42  ;;  %7322 = vst [vmem:[#allocation40_spill] sm:$0xff] %v6040_v31  ;;  %v6046_v42 = vld [vmem:[%s6833_s1 + $0x4ec] ss:$16 sps:$4 sm:$0xff]  }
 0x236   :  { %7323 = vst [vmem:[#allocation41_spill] sm:$0xff] %v6046_v42 }
 0x238   :  { %2271 = vmatpush1.bf16.msra.mxu1 %v6028_v45 }
 0x239   :  { %2272 = vmatprep.subr.bf16.mxu1 %v6034_v32 }
 0x23c   :  { %2273 = vmatpush1.bf16.msra.mxu1 %v6040_v31 }
 0x23d   :  { %2274 = vmatprep.subr.bf16.mxu1 %v6046_v42 }
 0x240   :  { %2275 = vmatpush1.bf16.msra.mxu1 %v7230_v30 }
 0x241   :  { %2276 = vmatprep.subr.bf16.mxu1 %v7232_v50 }
 0x244   :  { %2277 = vmatpush1.bf16.msra.mxu1 %v7234_v52 }
 0x245   :  { %2278 = vmatprep.subr.bf16.mxu1 %v7236_v54 }
 0x248   :  { %2279 = vmatpush1.bf16.msra.mxu1 %v7238_v56 }
 0x249   :  { %2280 = vmatprep.subr.bf16.mxu1 %v7240_v58 }
 0x24c   :  { %2281 = vmatpush1.bf16.msra.mxu1 %v7242_v60 }
 0x24d   :  { %2282 = vmatprep.subr.bf16.mxu1 %v7244_v62 }
 0x250   :  { %2283 = vmatpush1.bf16.msra.mxu1 %v7246_v0 }
 0x251   :  { %2284 = vmatprep.subr.bf16.mxu1 %v7248_v2 }
 0x254   :  { %2285 = vmatpush1.bf16.msra.mxu1 %v7250_v5 }
 0x255   :  { %v1664_v30 = vpop.f32.mrb[4].mxu0  ;;  %v1793_v50 = vpop.f32.mrb[4].mxu1  ;;  %2286 = vmatprep.subr.bf16.mxu1 %v7252_v7 }
 0x256   :  { %v1666_v52 = vpop.f32.mrb[5].mxu0  ;;  %v1795_v54 = vpop.f32.mrb[5].mxu1 }
 0x257   :  { %v1802_v42 = vmax.f32 %v1664_v30, %v1666_v52  ;;  %v1804_v56 = vmax.f32 %v1793_v50, %v1795_v54  ;;  %v1668_v31 = vpop.f32.mrb[6].mxu0  ;;  %v1797_v58 = vpop.f32.mrb[6].mxu1  ;;  %v7333_v52 = vld [vmem:[#allocation106_spill] sm:$0xff] }
 0x258   :  { %v1670_v32 = vpop.f32.mrb[7].mxu0  ;;  %v1799_v60 = vpop.f32.mrb[7].mxu1  ;;  %2287 = vmatpush1.bf16.msra.mxu1 %v7254_v9  ;;  %v6070_v9 = vld [vmem:[%s6834_s0 + $0x70] ss:$24 sps:$4 sm:$0xff]  }
 0x259   :  { %v1806_v62 = vmax.f32 %v1802_v42, %v1804_v56  ;;  %v1803_v0 = vmax.f32 %v1668_v31, %v1670_v32  ;;  %v1805_v45 = vmax.f32 %v1797_v58, %v1799_v60  ;;  %2288 = vmatprep.subr.bf16.mxu1 %v7256_v11  ;;  %v7324_v11 = vld [vmem:[#allocation89_spill] sm:$0xff]  ;;  %v7327_v32 = vld [vmem:[#allocation94_spill] sm:$0xff]  ;;  %v7334_v58 = vld [vmem:[#allocation108_spill] sm:$0xff] }
 0x25a   :  { %v7331_v42 = vld [vmem:[#allocation102_spill] sm:$0xff] }
 0x25b   :  { %v1808_v2 = vadd.f32 %v5644_v40, %v1806_v62  ;;  %v1807_v5 = vmax.f32 %v1803_v0, %v1805_v45  ;;  %v7332_v45 = vld [vmem:[#allocation104_spill] sm:$0xff]  ;;  %v7335_v0 = vld [vmem:[#allocation110_spill] sm:$0xff] }
 0x25c   :  { %2289 = vmatpush1.bf16.msra.mxu1 %v7258_v13  ;;  %v7326_v13 = vld [vmem:[#allocation92_spill] sm:$0xff] }
 0x25d   :  { %v1809_v7 = vadd.f32 %v5644_v40, %v1807_v5  ;;  %2290 = vmatprep.subr.bf16.mxu1 %v5118_v48  ;;  %v1810_v30 = vmax.f32 %v1808_v2, 0.0  ;;  %v7325_v48 = vld [vmem:[#allocation90_spill] sm:$0xff]  ;;  %v7336_v2 = vld [vmem:[#allocation112_spill] sm:$0xff] }
 0x25e   :  { %v7337_v5 = vld [vmem:[#allocation114_spill] sm:$0xff] }
 0x25f   :  { %v1811_v50 = vmax.f32 %v1809_v7, 0.0  ;;  %v7338_v7 = vld [vmem:[#allocation116_spill] sm:$0xff] }
 0x260   :  { %2291 = vmatpush1.bf16.msra.mxu1 %v7261_v17  ;;  %v7328_v17 = vld [vmem:[#allocation96_spill] sm:$0xff] }
 0x261   :  { %v1812_v31 = vpack.c.bf16 %v1811_v50, %v1810_v30  ;;  %2459 = vmatprep.subr.bf16.mxu1 %v7283_v51  ;;  %v7329_v51 = vld [vmem:[#allocation98_spill] sm:$0xff]  ;;  %v7340_v50 = vld [vmem:[#allocation120_spill] sm:$0xff] }
 0x262   :  { %v7339_v30 = vld [vmem:[#allocation118_spill] sm:$0xff] }
 0x263   :  { %3345 = vmatmul.mubr.bf16.vlgmr.msra.gmra.mrb[8].mxu0 %v1812_v31  ;;  %2293 = vmatmul.mubr.bf16.vlgmr.msra.gmra.mrb[12].mxu1 %v6070_v9  ;;  %v7341_v31 = vld [vmem:[#allocation122_spill] sm:$0xff] }
 0x264   :  { %2046 = vmatpush1.bf16.msra.mxu0 %v7324_v11  ;;  %2077 = vmatprep.mubr.bf16.mxu0 %v5657_v4  ;;  %v7330_v4 = vld [vmem:[#allocation100_spill] sm:$0xff] }
 0x265   :  { %2047 = vmatprep.subr.bf16.mxu0 %v7325_v48  ;;  %2460 = vmatpush1.bf16.msra.mxu1 %v7324_v11  ;;  %v7342_v11 = vld [vmem:[#allocation124_spill] sm:$0xff] }
 0x266   :  { %2461 = vmatprep.subr.bf16.mxu1 %v7325_v48  ;;  %v7343_v48 = vld [vmem:[#allocation126_spill] sm:$0xff] }
 0x268   :  { %2048 = vmatpush1.bf16.msra.mxu0 %v7326_v13 }
 0x269   :  { %2049 = vmatprep.subr.bf16.mxu0 %v7327_v32  ;;  %2462 = vmatpush1.bf16.msra.mxu1 %v7326_v13  ;;  %v7344_v13 = vld [vmem:[#allocation128_spill] sm:$0xff] }
 0x26a   :  { %2463 = vmatprep.subr.bf16.mxu1 %v7327_v32  ;;  %v3957_v32 = vld [vmem:[%s6833_s1 + $0x184] ss:$16 sps:$4 sm:$0xff]  }
 0x26c   :  { %2050 = vmatpush1.bf16.msra.mxu0 %v7328_v17 }
 0x26d   :  { %2051 = vmatprep.subr.bf16.mxu0 %v7329_v51  ;;  %2464 = vmatpush1.bf16.msra.mxu1 %v7328_v17  ;;  %v3958_v17 = vld [vmem:[%s6833_s1 + $0x180] ss:$16 sps:$4 sm:$0xff]  }
 0x26e   :  { %2465 = vmatprep.subr.bf16.mxu1 %v7329_v51  ;;  %v3959_v51 = vld [vmem:[%s6833_s1 + $0x1a4] ss:$16 sps:$4 sm:$0xff]  }
 0x270   :  { %2052 = vmatpush1.bf16.msra.mxu0 %v7330_v4 }
 0x271   :  { %2053 = vmatprep.subr.bf16.mxu0 %v7331_v42  ;;  %2466 = vmatpush1.bf16.msra.mxu1 %v7330_v4  ;;  %v3962_v4 = vld [vmem:[%s6833_s1 + $0x1c0] ss:$16 sps:$4 sm:$0xff]  }
 0x272   :  { %2467 = vmatprep.subr.bf16.mxu1 %v7331_v42  ;;  %v3963_v42 = vld [vmem:[%s6833_s1 + $0x1e4] ss:$16 sps:$4 sm:$0xff]  }
 0x274   :  { %2054 = vmatpush1.bf16.msra.mxu0 %v7332_v45 }
 0x275   :  { %2055 = vmatprep.subr.bf16.mxu0 %v7333_v52  ;;  %2468 = vmatpush1.bf16.msra.mxu1 %v7332_v45  ;;  %v3964_v45 = vld [vmem:[%s6833_s1 + $0x1e0] ss:$16 sps:$4 sm:$0xff]  }
 0x276   :  { %v6095_v54 = vpop.f32.mrb[8].mxu1  ;;  %2469 = vmatprep.subr.bf16.mxu1 %v7333_v52  ;;  %v3965_v52 = vld [vmem:[%s6833_s1 + $0x204] ss:$16 sps:$4 sm:$0xff]  }
 0x277   :  { %v3366_v56 = vpop.f32.mrb[9].mxu1 }
 0x278   :  { %2056 = vmatpush1.bf16.msra.mxu0 %v7334_v58  ;;  %v6099_v60 = vpop.f32.mrb[10].mxu1  ;;  %v3966_v56 = vld [vmem:[%s6833_s1 + $0x200] ss:$16 sps:$4 sm:$0xff]  }
 0x279   :  { %v3367_v62 = vpop.f32.mrb[11].mxu1  ;;  %2057 = vmatprep.subr.bf16.mxu0 %v7335_v0  ;;  %2470 = vmatpush1.bf16.msra.mxu1 %v7334_v58  ;;  %v3967_v58 = vld [vmem:[%s6833_s1 + $0x224] ss:$16 sps:$4 sm:$0xff]  }
 0x27a   :  { %2471 = vmatprep.subr.bf16.mxu1 %v7335_v0  ;;  %v3968_v62 = vld [vmem:[%s6833_s1 + $0x220] ss:$16 sps:$4 sm:$0xff]  }
 0x27b   :  { %v3970_v0 = vld [vmem:[%s6833_s1 + $0x240] ss:$16 sps:$4 sm:$0xff]  }
 0x27c   :  { %2058 = vmatpush1.bf16.msra.mxu0 %v7336_v2 }
 0x27d   :  { %2059 = vmatprep.subr.bf16.mxu0 %v7337_v5  ;;  %2472 = vmatpush1.bf16.msra.mxu1 %v7336_v2  ;;  %v3972_v2 = vld [vmem:[%s6833_s1 + $0x260] ss:$16 sps:$4 sm:$0xff]  }
 0x27e   :  { %2473 = vmatprep.subr.bf16.mxu1 %v7337_v5  ;;  %v3973_v5 = vld [vmem:[%s6833_s1 + $0x284] ss:$16 sps:$4 sm:$0xff]  }
 0x280   :  { %2060 = vmatpush1.bf16.msra.mxu0 %v7338_v7 }
 0x281   :  { %2061 = vmatprep.subr.bf16.mxu0 %v7339_v30  ;;  %2474 = vmatpush1.bf16.msra.mxu1 %v7338_v7  ;;  %v3974_v7 = vld [vmem:[%s6833_s1 + $0x280] ss:$16 sps:$4 sm:$0xff]  }
 0x282   :  { %2475 = vmatprep.subr.bf16.mxu1 %v7339_v30  ;;  %v3975_v30 = vld [vmem:[%s6833_s1 + $0x2a4] ss:$16 sps:$4 sm:$0xff]  }
 0x284   :  { %2062 = vmatpush1.bf16.msra.mxu0 %v7340_v50 }
 0x285   :  { %2063 = vmatprep.subr.bf16.mxu0 %v7341_v31  ;;  %2476 = vmatpush1.bf16.msra.mxu1 %v7340_v50  ;;  %v3976_v50 = vld [vmem:[%s6833_s1 + $0x2a0] ss:$16 sps:$4 sm:$0xff]  }
 0x286   :  { %2477 = vmatprep.subr.bf16.mxu1 %v7341_v31  ;;  %v3977_v31 = vld [vmem:[%s6833_s1 + $0x2c4] ss:$16 sps:$4 sm:$0xff]  }
 0x288   :  { %2064 = vmatpush1.bf16.msra.mxu0 %v7342_v11 }
 0x289   :  { %2065 = vmatprep.subr.bf16.mxu0 %v7343_v48  ;;  %2478 = vmatpush1.bf16.msra.mxu1 %v7342_v11  ;;  %v6194_v11 = vld [vmem:[%s6834_s0 + $0x90] ss:$24 sps:$4 sm:$0xff]  }
 0x28a   :  { %2479 = vmatprep.subr.bf16.mxu1 %v7343_v48  ;;  %v6199_v48 = vld [vmem:[%s6834_s0 + $0x94] ss:$24 sps:$4 sm:$0xff]  }
 0x28b   :  { %2491 = vmatprep.mubr.bf16.mxu1 %v6199_v48 }
 0x28c   :  { %2066 = vmatpush1.bf16.msra.mxu0 %v7344_v13 }
 0x28d   :  { %2067 = vmatprep.subr.bf16.mxu0 %v5409_v44  ;;  %2480 = vmatpush1.bf16.msra.mxu1 %v7344_v13  ;;  %v3978_v13 = vld [vmem:[%s6833_s1 + $0x2c0] ss:$16 sps:$4 sm:$0xff]  }
 0x28e   :  { %2481 = vmatprep.subr.bf16.mxu1 %v5409_v44  ;;  %v3960_v44 = vld [vmem:[%s6833_s1 + $0x1a0] ss:$16 sps:$4 sm:$0xff]  }
 0x290   :  { %2068 = vmatpush1.bf16.msra.mxu0 %v5421_v41 }
 0x291   :  { %2069 = vmatprep.subr.bf16.mxu0 %v3957_v32  ;;  %2482 = vmatpush1.bf16.msra.mxu1 %v5421_v41  ;;  %v3961_v41 = vld [vmem:[%s6833_s1 + $0x1c4] ss:$16 sps:$4 sm:$0xff]  }
 0x292   :  { %2483 = vmatprep.subr.bf16.mxu1 %v3957_v32  ;;  %v3979_v32 = vld [vmem:[%s6833_s1 + $0x2e4] ss:$16 sps:$4 sm:$0xff]  }
 0x294   :  { %2070 = vmatpush1.bf16.msra.mxu0 %v3958_v17 }
 0x295   :  { %2071 = vmatprep.subr.bf16.mxu0 %v3959_v51  ;;  %2484 = vmatpush1.bf16.msra.mxu1 %v3958_v17  ;;  %v3980_v17 = vld [vmem:[%s6833_s1 + $0x2e0] ss:$16 sps:$4 sm:$0xff]  }
 0x296   :  { %2485 = vmatprep.subr.bf16.mxu1 %v3959_v51  ;;  %v3981_v51 = vld [vmem:[%s6833_s1 + $0x304] ss:$16 sps:$4 sm:$0xff]  }
 0x298   :  { %2072 = vmatpush1.bf16.msra.mxu0 %v3960_v44 }
 0x299   :  { %2073 = vmatprep.subr.bf16.mxu0 %v3961_v41  ;;  %2486 = vmatpush1.bf16.msra.mxu1 %v3960_v44  ;;  %v3982_v44 = vld [vmem:[%s6833_s1 + $0x300] ss:$16 sps:$4 sm:$0xff]  }
 0x29a   :  { %2487 = vmatprep.subr.bf16.mxu1 %v3961_v41  ;;  %v3983_v41 = vld [vmem:[%s6833_s1 + $0x324] ss:$16 sps:$4 sm:$0xff]  }
 0x29c   :  { %2074 = vmatpush1.bf16.msra.mxu0 %v3962_v4 }
 0x29d   :  { %2075 = vmatprep.subr.bf16.mxu0 %v3963_v42  ;;  %2488 = vmatpush1.bf16.msra.mxu1 %v3962_v4  ;;  %v3984_v4 = vld [vmem:[%s6833_s1 + $0x320] ss:$16 sps:$4 sm:$0xff]  }
 0x29e   :  { %2489 = vmatprep.subr.bf16.mxu1 %v3963_v42  ;;  %v3985_v42 = vld [vmem:[%s6833_s1 + $0x344] ss:$16 sps:$4 sm:$0xff]  }
 0x2a0   :  { %2076 = vmatpush1.bf16.msra.mxu0 %v3964_v45 }
 0x2a1   :  { %2088 = vmatprep.subr.bf16.mxu0 %v3965_v52  ;;  %2490 = vmatpush1.bf16.msra.mxu1 %v3964_v45  ;;  %v3986_v45 = vld [vmem:[%s6833_s1 + $0x340] ss:$16 sps:$4 sm:$0xff]  }
 0x2a2   :  { %2502 = vmatprep.subr.bf16.mxu1 %v3965_v52  ;;  %v3987_v52 = vld [vmem:[%s6833_s1 + $0x364] ss:$16 sps:$4 sm:$0xff]  }
 0x2a3   :  { %2078 = vmatmul.mubr.bf16.vlgmr.msra.gmra.mrb[12].mxu0 %v5739_v46  ;;  %v3969_v46 = vld [vmem:[%s6833_s1 + $0x244] ss:$16 sps:$4 sm:$0xff]  }
 0x2a4   :  { %2089 = vmatpush1.bf16.msra.mxu0 %v3966_v56  ;;  %2120 = vmatprep.mubr.bf16.mxu0 %v5750_v49  ;;  %v3971_v49 = vld [vmem:[%s6833_s1 + $0x264] ss:$16 sps:$4 sm:$0xff]  }
 0x2a5   :  { %2090 = vmatprep.subr.bf16.mxu0 %v3967_v58  ;;  %2492 = vmatmul.mubr.bf16.vlgmr.msra.gmra.mrb[16].mxu1 %v6194_v11 }
 0x2a6   :  { %2503 = vmatpush1.bf16.msra.mxu1 %v3966_v56  ;;  %v3988_v56 = vld [vmem:[%s6833_s1 + $0x360] ss:$16 sps:$4 sm:$0xff]  }
 0x2a7   :  { %2504 = vmatprep.subr.bf16.mxu1 %v3967_v58  ;;  %v3989_v58 = vld [vmem:[%s6833_s1 + $0x384] ss:$16 sps:$4 sm:$0xff]  }
 0x2a8   :  { %2091 = vmatpush1.bf16.msra.mxu0 %v3968_v62 }
 0x2a9   :  { %2092 = vmatprep.subr.bf16.mxu0 %v3969_v46 }
 0x2aa   :  { %2505 = vmatpush1.bf16.msra.mxu1 %v3968_v62  ;;  %v3990_v62 = vld [vmem:[%s6833_s1 + $0x380] ss:$16 sps:$4 sm:$0xff]  }
 0x2ab   :  { %2506 = vmatprep.subr.bf16.mxu1 %v3969_v46  ;;  %v3991_v46 = vld [vmem:[%s6833_s1 + $0x3a4] ss:$16 sps:$4 sm:$0xff]  }
 0x2ac   :  { %2093 = vmatpush1.bf16.msra.mxu0 %v3970_v0 }
 0x2ad   :  { %2094 = vmatprep.subr.bf16.mxu0 %v3971_v49 }
 0x2ae   :  { %2507 = vmatpush1.bf16.msra.mxu1 %v3970_v0  ;;  %v3992_v0 = vld [vmem:[%s6833_s1 + $0x3a0] ss:$16 sps:$4 sm:$0xff]  }
 0x2af   :  { %2508 = vmatprep.subr.bf16.mxu1 %v3971_v49  ;;  %v3993_v49 = vld [vmem:[%s6833_s1 + $0x3c4] ss:$16 sps:$4 sm:$0xff]  }
 0x2b0   :  { %2095 = vmatpush1.bf16.msra.mxu0 %v3972_v2 }
 0x2b1   :  { %2096 = vmatprep.subr.bf16.mxu0 %v3973_v5 }
 0x2b2   :  { %2509 = vmatpush1.bf16.msra.mxu1 %v3972_v2  ;;  %v3994_v2 = vld [vmem:[%s6833_s1 + $0x3c0] ss:$16 sps:$4 sm:$0xff]  }
 0x2b3   :  { %2510 = vmatprep.subr.bf16.mxu1 %v3973_v5  ;;  %v3995_v5 = vld [vmem:[%s6833_s1 + $0x3e4] ss:$16 sps:$4 sm:$0xff]  }
 0x2b4   :  { %2097 = vmatpush1.bf16.msra.mxu0 %v3974_v7 }
 0x2b5   :  { %2098 = vmatprep.subr.bf16.mxu0 %v3975_v30 }
 0x2b6   :  { %2511 = vmatpush1.bf16.msra.mxu1 %v3974_v7  ;;  %v3996_v7 = vld [vmem:[%s6833_s1 + $0x3e0] ss:$16 sps:$4 sm:$0xff]  }
 0x2b7   :  { %2512 = vmatprep.subr.bf16.mxu1 %v3975_v30  ;;  %v3997_v30 = vld [vmem:[%s6833_s1 + $0x404] ss:$16 sps:$4 sm:$0xff]  }
 0x2b8   :  { %2099 = vmatpush1.bf16.msra.mxu0 %v3976_v50 }
 0x2b9   :  { %2100 = vmatprep.subr.bf16.mxu0 %v3977_v31 }
 0x2ba   :  { %2513 = vmatpush1.bf16.msra.mxu1 %v3976_v50  ;;  %v6267_v50 = vld [vmem:[%s6833_s1 + $0x400] ss:$16 sps:$4 sm:$0xff]  }
 0x2bb   :  { %2514 = vmatprep.subr.bf16.mxu1 %v3977_v31  ;;  %v6274_v31 = vld [vmem:[%s6833_s1 + $0x424] ss:$16 sps:$4 sm:$0xff]  }
 0x2bc   :  { %2101 = vmatpush1.bf16.msra.mxu0 %v3978_v13 }
 0x2bd   :  { %2102 = vmatprep.subr.bf16.mxu0 %v3979_v32 }
 0x2be   :  { %2515 = vmatpush1.bf16.msra.mxu1 %v3978_v13  ;;  %v6292_v13 = vld [vmem:[%s6833_s1 + $0x440] ss:$16 sps:$4 sm:$0xff]  }
 0x2bf   :  { %2516 = vmatprep.subr.bf16.mxu1 %v3979_v32  ;;  %v6298_v32 = vld [vmem:[%s6833_s1 + $0x464] ss:$16 sps:$4 sm:$0xff]  }
 0x2c0   :  { %2103 = vmatpush1.bf16.msra.mxu0 %v3980_v17 }
 0x2c1   :  { %2104 = vmatprep.subr.bf16.mxu0 %v3981_v51 }
 0x2c2   :  { %2517 = vmatpush1.bf16.msra.mxu1 %v3980_v17  ;;  %v6304_v17 = vld [vmem:[%s6833_s1 + $0x460] ss:$16 sps:$4 sm:$0xff]  }
 0x2c3   :  { %2518 = vmatprep.subr.bf16.mxu1 %v3981_v51  ;;  %v6310_v51 = vld [vmem:[%s6833_s1 + $0x484] ss:$16 sps:$4 sm:$0xff]  }
 0x2c4   :  { %2105 = vmatpush1.bf16.msra.mxu0 %v3982_v44 }
 0x2c5   :  { %2106 = vmatprep.subr.bf16.mxu0 %v3983_v41 }
 0x2c6   :  { %2519 = vmatpush1.bf16.msra.mxu1 %v3982_v44  ;;  %v6316_v44 = vld [vmem:[%s6833_s1 + $0x480] ss:$16 sps:$4 sm:$0xff]  }
 0x2c7   :  { %2520 = vmatprep.subr.bf16.mxu1 %v3983_v41  ;;  %v6322_v41 = vld [vmem:[%s6833_s1 + $0x4a4] ss:$16 sps:$4 sm:$0xff]  }
 0x2c8   :  { %2107 = vmatpush1.bf16.msra.mxu0 %v3984_v4 }
 0x2c9   :  { %2108 = vmatprep.subr.bf16.mxu0 %v3985_v42 }
 0x2ca   :  { %2521 = vmatpush1.bf16.msra.mxu1 %v3984_v4  ;;  %v6328_v4 = vld [vmem:[%s6833_s1 + $0x4a0] ss:$16 sps:$4 sm:$0xff]  }
 0x2cb   :  { %2522 = vmatprep.subr.bf16.mxu1 %v3985_v42  ;;  %v6334_v42 = vld [vmem:[%s6833_s1 + $0x4c4] ss:$16 sps:$4 sm:$0xff]  }
 0x2cc   :  { %2109 = vmatpush1.bf16.msra.mxu0 %v3986_v45 }
 0x2cd   :  { %2110 = vmatprep.subr.bf16.mxu0 %v3987_v52 }
 0x2ce   :  { %2523 = vmatpush1.bf16.msra.mxu1 %v3986_v45  ;;  %v6340_v45 = vld [vmem:[%s6833_s1 + $0x4c0] ss:$16 sps:$4 sm:$0xff]  }
 0x2cf   :  { %2524 = vmatprep.subr.bf16.mxu1 %v3987_v52  ;;  %v6346_v52 = vld [vmem:[%s6833_s1 + $0x4e4] ss:$16 sps:$4 sm:$0xff]  }
 0x2d0   :  { %2111 = vmatpush1.bf16.msra.mxu0 %v3988_v56 }
 0x2d1   :  { %2112 = vmatprep.subr.bf16.mxu0 %v3989_v58 }
 0x2d2   :  { %2525 = vmatpush1.bf16.msra.mxu1 %v3988_v56  ;;  %v6352_v56 = vld [vmem:[%s6833_s1 + $0x4e0] ss:$16 sps:$4 sm:$0xff]  }
 0x2d3   :  { %2526 = vmatprep.subr.bf16.mxu1 %v3989_v58  ;;  %v6358_v58 = vld [vmem:[%s6833_s1 + $0x504] ss:$16 sps:$4 sm:$0xff]  }
 0x2d4   :  { %2113 = vmatpush1.bf16.msra.mxu0 %v3990_v62 }
 0x2d5   :  { %2114 = vmatprep.subr.bf16.mxu0 %v3991_v46 }
 0x2d6   :  { %2527 = vmatpush1.bf16.msra.mxu1 %v3990_v62  ;;  %v6364_v62 = vld [vmem:[%s6833_s1 + $0x500] ss:$16 sps:$4 sm:$0xff]  }
 0x2d7   :  { %2528 = vmatprep.subr.bf16.mxu1 %v3991_v46  ;;  %v6370_v46 = vld [vmem:[%s6833_s1 + $0x524] ss:$16 sps:$4 sm:$0xff]  }
 0x2d8   :  { %2115 = vmatpush1.bf16.msra.mxu0 %v3992_v0 }
 0x2d9   :  { %2116 = vmatprep.subr.bf16.mxu0 %v3993_v49 }
 0x2da   :  { %2529 = vmatpush1.bf16.msra.mxu1 %v3992_v0  ;;  %v6376_v0 = vld [vmem:[%s6833_s1 + $0x520] ss:$16 sps:$4 sm:$0xff]  }
 0x2db   :  { %2530 = vmatprep.subr.bf16.mxu1 %v3993_v49  ;;  %v6382_v49 = vld [vmem:[%s6833_s1 + $0x544] ss:$16 sps:$4 sm:$0xff]  }
 0x2dc   :  { %2117 = vmatpush1.bf16.msra.mxu0 %v3994_v2 }
 0x2dd   :  { %2118 = vmatprep.subr.bf16.mxu0 %v3995_v5 }
 0x2de   :  { %2531 = vmatpush1.bf16.msra.mxu1 %v3994_v2  ;;  %v6388_v2 = vld [vmem:[%s6833_s1 + $0x540] ss:$16 sps:$4 sm:$0xff]  }
 0x2df   :  { %2532 = vmatprep.subr.bf16.mxu1 %v3995_v5  ;;  %v6394_v5 = vld [vmem:[%s6833_s1 + $0x564] ss:$16 sps:$4 sm:$0xff]  }
 0x2e0   :  { %2119 = vmatpush1.bf16.msra.mxu0 %v3996_v7 }
 0x2e1   :  { %2131 = vmatprep.subr.bf16.mxu0 %v3997_v30 }
 0x2e2   :  { %2533 = vmatpush1.bf16.msra.mxu1 %v3996_v7  ;;  %v6400_v7 = vld [vmem:[%s6833_s1 + $0x560] ss:$16 sps:$4 sm:$0xff]  }
 0x2e3   :  { %2121 = vmatmul.mubr.bf16.vlgmr.msra.gmra.mrb[12].mxu0 %v5944_v19  ;;  %v6280_v19 = vld [vmem:[%s6833_s1 + $0x420] ss:$16 sps:$4 sm:$0xff]   ;;  %2545 = vmatprep.subr.bf16.mxu1 %v3997_v30  ;;  %v6406_v30 = vld [vmem:[%s6833_s1 + $0x584] ss:$16 sps:$4 sm:$0xff]  }
 0x2e4   :  { %2132 = vmatpush1.bf16.msra.mxu0 %v6267_v50  ;;  %2163 = vmatprep.mubr.bf16.mxu0 %v5955_v37  ;;  %v6286_v37 = vld [vmem:[%s6833_s1 + $0x444] ss:$16 sps:$4 sm:$0xff]  }
 0x2e5   :  { %2133 = vmatprep.subr.bf16.mxu0 %v6274_v31 }
 0x2e8   :  { %2134 = vmatpush1.bf16.msra.mxu0 %v6280_v19 }
 0x2e9   :  { %2135 = vmatprep.subr.bf16.mxu0 %v6286_v37 }
 0x2ec   :  { %2136 = vmatpush1.bf16.msra.mxu0 %v6292_v13 }
 0x2ed   :  { %2137 = vmatprep.subr.bf16.mxu0 %v6298_v32 }
 0x2f0   :  { %2138 = vmatpush1.bf16.msra.mxu0 %v6304_v17 }
 0x2f1   :  { %2139 = vmatprep.subr.bf16.mxu0 %v6310_v51 }
 0x2f4   :  { %2140 = vmatpush1.bf16.msra.mxu0 %v6316_v44 }
 0x2f5   :  { %2141 = vmatprep.subr.bf16.mxu0 %v6322_v41 }
 0x2f8   :  { %2142 = vmatpush1.bf16.msra.mxu0 %v6328_v4 }
 0x2f9   :  { %2143 = vmatprep.subr.bf16.mxu0 %v6334_v42 }
 0x2fc   :  { %2144 = vmatpush1.bf16.msra.mxu0 %v6340_v45 }
 0x2fd   :  { %2145 = vmatprep.subr.bf16.mxu0 %v6346_v52 }
 0x300   :  { %2146 = vmatpush1.bf16.msra.mxu0 %v6352_v56 }
 0x301   :  { %2147 = vmatprep.subr.bf16.mxu0 %v6358_v58 }
 0x304   :  { %2148 = vmatpush1.bf16.msra.mxu0 %v6364_v62 }
 0x305   :  { %2149 = vmatprep.subr.bf16.mxu0 %v6370_v46 }
 0x308   :  { %2150 = vmatpush1.bf16.msra.mxu0 %v6376_v0 }
 0x309   :  { %2151 = vmatprep.subr.bf16.mxu0 %v6382_v49 }
 0x30c   :  { %2152 = vmatpush1.bf16.msra.mxu0 %v6388_v2 }
 0x30d   :  { %2153 = vmatprep.subr.bf16.mxu0 %v6394_v5 }
 0x310   :  { %2154 = vmatpush1.bf16.msra.mxu0 %v6400_v7 }
 0x311   :  { %2155 = vmatprep.subr.bf16.mxu0 %v6406_v30 }
 0x314   :  { %2156 = vmatpush1.bf16.msra.mxu0 %v6412_v29 }
 0x315   :  { %2157 = vmatprep.subr.bf16.mxu0 %v6418_v28 }
 0x318   :  { %2158 = vmatpush1.bf16.msra.mxu0 %v6424_v27 }
 0x319   :  { %2159 = vmatprep.subr.bf16.mxu0 %v6430_v26 }
 0x31c   :  { %2160 = vmatpush1.bf16.msra.mxu0 %v6436_v25 }
 0x31d   :  { %2161 = vmatprep.subr.bf16.mxu0 %v6442_v24 }
 0x320   :  { %2162 = vmatpush1.bf16.msra.mxu0 %v6448_v23 }
 0x321   :  { %3368 = vmatprep.subr.bf16.mxu0 %v7345_v47 }
 0x323   :  { %2164 = vmatmul.mubr.bf16.vlgmr.msra.gmra.mrb[12].mxu0 %v6070_v9  ;;  %v3824_v9 = vld [vmem:[%s6835_s3 + $0xa0] sm:$0xff]  }
 0x324   :  { %3369 = vmatpush3.bf16.msra.mxu0 %v3820_v22  ;;  %3384 = vmatprep.mubr.msk.bf16.mxu0 %vm4072_vm0, %v7345_v47  ;;  %v3823_v22 = vld [vmem:[%s6835_s3 + $0x98] sm:$0xff]  }
 0x325   :  { %3370 = vmatprep.subr.bf16.mxu0 %v7345_v47 }
 0x328   :  { %3371 = vmatpush3.bf16.msra.mxu0 %v3821_v21 }
 0x329   :  { %3372 = vmatprep.subr.bf16.mxu0 %v7345_v47 }
 0x32c   :  { %3373 = vmatpush3.bf16.msra.mxu0 %v3822_v20 }
 0x32d   :  { %3374 = vmatprep.subr.bf16.mxu0 %v7345_v47 }
 0x330   :  { %3375 = vmatpush3.bf16.msra.mxu0 %v3823_v22 }
 0x331   :  { %3376 = vmatprep.subr.bf16.mxu0 %v7345_v47 }
 0x334   :  { %3377 = vmatpush3.bf16.msra.mxu0 %v3824_v9 }
 0x335   :  { %3378 = vmatprep.subr.bf16.mxu0 %v7345_v47 }
 0x336   :  { %v1912_v21 = vpop.f32.mrb[8].mxu0  ;;  %v6475_v18 = vpop.f32.mrb[12].mxu1 }
 0x337   :  { %v6478_v20 = vadd.f32 %v6095_v54, %v1912_v21  ;;  %v3346_v16 = vpop.f32.mrb[9].mxu0  ;;  %v6480_v15 = vpop.f32.mrb[13].mxu1  ;;  %v3825_v54 = vld [vmem:[%s6835_s3 + $0xa8] sm:$0xff]  }
 0x338   :  { %v1915_v14 = vpop.f32.mrb[10].mxu0  ;;  %v2305_v22 = vmax.f32 %v6475_v18, %v6480_v15  ;;  %v6484_v12 = vpop.f32.mrb[14].mxu1  ;;  %3379 = vmatpush3.bf16.msra.mxu0 %v3825_v54  ;;  %v3826_v15 = vld [vmem:[%s6835_s3 + $0xb0] sm:$0xff]   ;;  %v4029_v16 = vld [vmem:[%s6833_s1 + $0xc] ss:$16 sps:$4 sm:$0xff]   ;;  %v7358_v54 = vld [vmem:[#allocation14_spill] sm:$0xff] }
 0x339   :  { %v6487_v10 = vadd.f32 %v6099_v60, %v1915_v14  ;;  %v3347_v9 = vpop.f32.mrb[11].mxu0  ;;  %v2300_v8 = vpop.f32.mrb[15].mxu1  ;;  %3380 = vmatprep.subr.bf16.mxu0 %v7345_v47  ;;  %v3827_v14 = vld [vmem:[%s6835_s3 + $0xb8] sm:$0xff]  }
 0x33a   :  { %v2306_v6 = vmax.f32 %v6484_v12, %v2300_v8  ;;  %v6504_v8 = vld [vmem:[%s6834_s0 + $0x9c] ss:$24 sps:$4 sm:$0xff]   ;;  %v6509_v12 = vld [vmem:[%s6834_s0 + $0x98] ss:$24 sps:$4 sm:$0xff]   ;;  %v3838_v9 = vld [vmem:[%s6835_s3 + $0xe0] sm:$0xff]  }
 0x33b   :  { %2534 = vmatprep.mubr.bf16.mxu1 %v6504_v8  ;;  %v6549_v18 = vld [vmem:[%s6834_s0 + $0xa0] ss:$24 sps:$4 sm:$0xff]   ;;  %v6554_v60 = vld [vmem:[%s6834_s0 + $0xa4] ss:$24 sps:$4 sm:$0xff]  }
 0x33c   :  { %3381 = vmatpush3.bf16.msra.mxu0 %v3826_v15  ;;  %2535 = vmatmul.mubr.bf16.vlgmr.msra.gmra.mrb[16].mxu1 %v6509_v12  ;;  %v4051_v21 = vld [vmem:[%s6833_s1 + $0x16c] ss:$16 sps:$4 sm:$0xff]  }
 0x33d   :  { %3382 = vmatprep.subr.bf16.mxu0 %v7345_v47  ;;  %2546 = vmatpush1.bf16.msra.mxu1 %v6267_v50  ;;  %v7359_v15 = vld [vmem:[#allocation15_spill] sm:$0xff] }
 0x33e   :  { %2547 = vmatprep.subr.bf16.mxu1 %v6274_v31  ;;  %2577 = vmatprep.mubr.bf16.mxu1 %v6554_v60 }
 0x340   :  { %3383 = vmatpush3.bf16.msra.mxu0 %v3827_v14  ;;  %v7360_v14 = vld [vmem:[#allocation16_spill] sm:$0xff] }
 0x341   :  { %2588 = vmatprep.subr.bf16.mxu0 %v4029_v16  ;;  %2548 = vmatpush1.bf16.msra.mxu1 %v6280_v19  ;;  %v7362_v16 = vld [vmem:[#allocation18_spill] sm:$0xff] }
 0x342   :  { %2549 = vmatprep.subr.bf16.mxu1 %v6286_v37 }
 0x345   :  { %2550 = vmatpush1.bf16.msra.mxu1 %v6292_v13 }
 0x346   :  { %2551 = vmatprep.subr.bf16.mxu1 %v6298_v32 }
 0x349   :  { %2552 = vmatpush1.bf16.msra.mxu1 %v6304_v17  ;;  %v4030_v17 = vld [vmem:[%s6833_s1 + $0x8] ss:$16 sps:$4 sm:$0xff]  }
 0x34a   :  { %2553 = vmatprep.subr.bf16.mxu1 %v6310_v51  ;;  %v4031_v51 = vld [vmem:[%s6833_s1 + $0x2c] ss:$16 sps:$4 sm:$0xff]  }
 0x34d   :  { %2554 = vmatpush1.bf16.msra.mxu1 %v6316_v44  ;;  %v4034_v44 = vld [vmem:[%s6833_s1 + $0x48] ss:$16 sps:$4 sm:$0xff]  }
 0x34e   :  { %2555 = vmatprep.subr.bf16.mxu1 %v6322_v41  ;;  %v4036_v41 = vld [vmem:[%s6833_s1 + $0x68] ss:$16 sps:$4 sm:$0xff]  }
 0x351   :  { %2556 = vmatpush1.bf16.msra.mxu1 %v6328_v4  ;;  %v4037_v4 = vld [vmem:[%s6833_s1 + $0x8c] ss:$16 sps:$4 sm:$0xff]  }
 0x352   :  { %2557 = vmatprep.subr.bf16.mxu1 %v6334_v42  ;;  %v4038_v42 = vld [vmem:[%s6833_s1 + $0x88] ss:$16 sps:$4 sm:$0xff]  }
 0x355   :  { %2558 = vmatpush1.bf16.msra.mxu1 %v6340_v45  ;;  %v4039_v45 = vld [vmem:[%s6833_s1 + $0xac] ss:$16 sps:$4 sm:$0xff]  }
 0x356   :  { %2559 = vmatprep.subr.bf16.mxu1 %v6346_v52  ;;  %v4040_v52 = vld [vmem:[%s6833_s1 + $0xa8] ss:$16 sps:$4 sm:$0xff]  }
 0x359   :  { %2560 = vmatpush1.bf16.msra.mxu1 %v6352_v56  ;;  %v4041_v56 = vld [vmem:[%s6833_s1 + $0xcc] ss:$16 sps:$4 sm:$0xff]  }
 0x35a   :  { %2561 = vmatprep.subr.bf16.mxu1 %v6358_v58  ;;  %v4042_v58 = vld [vmem:[%s6833_s1 + $0xc8] ss:$16 sps:$4 sm:$0xff]  }
 0x35d   :  { %2562 = vmatpush1.bf16.msra.mxu1 %v6364_v62  ;;  %v4043_v62 = vld [vmem:[%s6833_s1 + $0xec] ss:$16 sps:$4 sm:$0xff]  }
 0x35e   :  { %2563 = vmatprep.subr.bf16.mxu1 %v6370_v46  ;;  %v4044_v46 = vld [vmem:[%s6833_s1 + $0xe8] ss:$16 sps:$4 sm:$0xff]  }
 0x361   :  { %2564 = vmatpush1.bf16.msra.mxu1 %v6376_v0  ;;  %v4045_v0 = vld [vmem:[%s6833_s1 + $0x10c] ss:$16 sps:$4 sm:$0xff]  }
 0x362   :  { %2565 = vmatprep.subr.bf16.mxu1 %v6382_v49  ;;  %v4046_v49 = vld [vmem:[%s6833_s1 + $0x108] ss:$16 sps:$4 sm:$0xff]  }
 0x365   :  { %2566 = vmatpush1.bf16.msra.mxu1 %v6388_v2  ;;  %v4047_v2 = vld [vmem:[%s6833_s1 + $0x12c] ss:$16 sps:$4 sm:$0xff]  }
 0x366   :  { %2567 = vmatprep.subr.bf16.mxu1 %v6394_v5  ;;  %v4048_v5 = vld [vmem:[%s6833_s1 + $0x128] ss:$16 sps:$4 sm:$0xff]  }
 0x369   :  { %2568 = vmatpush1.bf16.msra.mxu1 %v6400_v7  ;;  %v4049_v7 = vld [vmem:[%s6833_s1 + $0x14c] ss:$16 sps:$4 sm:$0xff]  }
 0x36a   :  { %2569 = vmatprep.subr.bf16.mxu1 %v6406_v30  ;;  %v4050_v30 = vld [vmem:[%s6833_s1 + $0x148] ss:$16 sps:$4 sm:$0xff]  }
 0x36d   :  { %2570 = vmatpush1.bf16.msra.mxu1 %v6412_v29 }
 0x36e   :  { %2571 = vmatprep.subr.bf16.mxu1 %v6418_v28 }
 0x371   :  { %2572 = vmatpush1.bf16.msra.mxu1 %v6424_v27 }
 0x372   :  { %2573 = vmatprep.subr.bf16.mxu1 %v6430_v26 }
 0x375   :  { %2574 = vmatpush1.bf16.msra.mxu1 %v6436_v25 }
 0x376   :  { %2575 = vmatprep.subr.bf16.mxu1 %v6442_v24 }
 0x379   :  { %2576 = vmatpush1.bf16.msra.mxu1 %v6448_v23 }
 0x37a   :  { %3388 = vmatprep.subr.bf16.mxu1 %v7345_v47 }
 0x37c   :  { %2578 = vmatmul.mubr.bf16.vlgmr.msra.gmra.mrb[16].mxu1 %v6549_v18 }
 0x37d   :  { %3404 = vmatprep.mubr.msk.bf16.mxu1 %vm4072_vm0, %v7345_v47 }
 0x3f6   :  { %v2165_v24 = vpop.f32.mrb[12].mxu0 }
 0x3f7   :  { %v2167_v25 = vpop.f32.mrb[13].mxu0 }
 0x3f8   :  { %v2303_v26 = vmax.f32 %v2165_v24, %v2167_v25  ;;  %v2169_v27 = vpop.f32.mrb[14].mxu0  ;;  %v7363_v24 = vld [vmem:[#allocation19_spill] sm:$0xff]  ;;  %v7364_v25 = vld [vmem:[#allocation20_spill] sm:$0xff] }
 0x3f9   :  { %v2171_v28 = vpop.f32.mrb[15].mxu0 }
 0x3fa   :  { %v2307_v29 = vmax.f32 %v2303_v26, %v2305_v22  ;;  %v2304_v50 = vmax.f32 %v2169_v27, %v2171_v28  ;;  %v4052_v22 = vld [vmem:[%s6833_s1 + $0x168] ss:$16 sps:$4 sm:$0xff]   ;;  %v7366_v27 = vld [vmem:[#allocation22_spill] sm:$0xff] }
 0x3fb   :  { %v7365_v26 = vld [vmem:[#allocation21_spill] sm:$0xff]  ;;  %v7367_v28 = vld [vmem:[#allocation23_spill] sm:$0xff] }
 0x3fc   :  { %v2309_v31 = vadd.f32 %v5644_v40, %v2307_v29  ;;  %v2308_v19 = vmax.f32 %v2304_v50, %v2306_v6  ;;  %v4033_v6 = vld [vmem:[%s6833_s1 + $0x4c] ss:$16 sps:$4 sm:$0xff]   ;;  %v7368_v29 = vld [vmem:[#allocation24_spill] sm:$0xff] }
 0x3fd   :  { %v7369_v50 = vld [vmem:[#allocation25_spill] sm:$0xff] }
 0x3fe   :  { %v2310_v23 = vadd.f32 %v5644_v40, %v2308_v19  ;;  %v2311_v37 = vmax.f32 %v2309_v31, 0.0  ;;  %v4032_v40 = vld [vmem:[%s6833_s1 + $0x28] ss:$16 sps:$4 sm:$0xff]   ;;  %v7370_v31 = vld [vmem:[#allocation26_spill] sm:$0xff] }
 0x3ff   :  { %v7371_v19 = vld [vmem:[#allocation27_spill] sm:$0xff] }
 0x400   :  { %v2312_v13 = vmax.f32 %v2310_v23, 0.0  ;;  %v7372_v23 = vld [vmem:[#allocation28_spill] sm:$0xff] }
 0x402   :  { %v2313_v32 = vpack.c.bf16 %v2312_v13, %v2311_v37  ;;  %v7373_v37 = vld [vmem:[#allocation29_spill] sm:$0xff]  ;;  %v7374_v13 = vld [vmem:[#allocation30_spill] sm:$0xff] }
 0x404   :  { %3385 = vmatmul.mubr.bf16.vlgmr.msra.gmra.mrb[16].mxu0 %v2313_v32  ;;  %v7375_v32 = vld [vmem:[#allocation31_spill] sm:$0xff] }
 0x405   :  { %2589 = vmatpush1.bf16.msra.mxu0 %v4030_v17  ;;  %2620 = vmatprep.mubr.bf16.mxu0 %v6199_v48  ;;  %v4035_v48 = vld [vmem:[%s6833_s1 + $0x6c] ss:$16 sps:$4 sm:$0xff]   ;;  %v7376_v17 = vld [vmem:[#allocation32_spill] sm:$0xff] }
 0x406   :  { %2590 = vmatprep.subr.bf16.mxu0 %v4031_v51  ;;  %v7377_v51 = vld [vmem:[#allocation33_spill] sm:$0xff] }
 0x409   :  { %2591 = vmatpush1.bf16.msra.mxu0 %v4032_v40  ;;  %v7378_v40 = vld [vmem:[#allocation34_spill] sm:$0xff] }
 0x40a   :  { %2592 = vmatprep.subr.bf16.mxu0 %v4033_v6  ;;  %v7379_v6 = vld [vmem:[#allocation35_spill] sm:$0xff] }
 0x40d   :  { %2593 = vmatpush1.bf16.msra.mxu0 %v4034_v44  ;;  %v7380_v44 = vld [vmem:[#allocation36_spill] sm:$0xff] }
 0x40e   :  { %2594 = vmatprep.subr.bf16.mxu0 %v4035_v48  ;;  %v7381_v48 = vld [vmem:[#allocation37_spill] sm:$0xff] }
 0x411   :  { %2595 = vmatpush1.bf16.msra.mxu0 %v4036_v41 }
 0x412   :  { %2596 = vmatprep.subr.bf16.mxu0 %v4037_v4 }
 0x415   :  { %2597 = vmatpush1.bf16.msra.mxu0 %v4038_v42 }
 0x416   :  { %2598 = vmatprep.subr.bf16.mxu0 %v4039_v45  ;;  %v7382_v45 = vld [vmem:[#allocation38_spill] sm:$0xff] }
 0x419   :  { %2599 = vmatpush1.bf16.msra.mxu0 %v4040_v52 }
 0x41a   :  { %2600 = vmatprep.subr.bf16.mxu0 %v4041_v56  ;;  %v7383_v56 = vld [vmem:[#allocation39_spill] sm:$0xff] }
 0x41d   :  { %2601 = vmatpush1.bf16.msra.mxu0 %v4042_v58  ;;  %v7384_v58 = vld [vmem:[#allocation40_spill] sm:$0xff] }
 0x41e   :  { %2602 = vmatprep.subr.bf16.mxu0 %v4043_v62  ;;  %v7385_v62 = vld [vmem:[#allocation41_spill] sm:$0xff] }
 0x421   :  { %2603 = vmatpush1.bf16.msra.mxu0 %v4044_v46  ;;  %v4053_v46 = vld [vmem:[%s6833_s1 + $0x4e8] ss:$16 sps:$4 sm:$0xff]  }
 0x422   :  { %2604 = vmatprep.subr.bf16.mxu0 %v4045_v0  ;;  %v4054_v0 = vld [vmem:[%s6833_s1 + $0x50c] ss:$16 sps:$4 sm:$0xff]  }
 0x425   :  { %2605 = vmatpush1.bf16.msra.mxu0 %v4046_v49  ;;  %v4055_v49 = vld [vmem:[%s6833_s1 + $0x508] ss:$16 sps:$4 sm:$0xff]  }
 0x426   :  { %2606 = vmatprep.subr.bf16.mxu0 %v4047_v2  ;;  %v4056_v2 = vld [vmem:[%s6833_s1 + $0x52c] ss:$16 sps:$4 sm:$0xff]  }
 0x429   :  { %2607 = vmatpush1.bf16.msra.mxu0 %v4048_v5  ;;  %v4057_v5 = vld [vmem:[%s6833_s1 + $0x528] ss:$16 sps:$4 sm:$0xff]  }
 0x42a   :  { %2608 = vmatprep.subr.bf16.mxu0 %v4049_v7  ;;  %v4058_v7 = vld [vmem:[%s6833_s1 + $0x54c] ss:$16 sps:$4 sm:$0xff]  }
 0x42d   :  { %2609 = vmatpush1.bf16.msra.mxu0 %v4050_v30  ;;  %v4059_v30 = vld [vmem:[%s6833_s1 + $0x548] ss:$16 sps:$4 sm:$0xff]  }
 0x42e   :  { %2610 = vmatprep.subr.bf16.mxu0 %v4051_v21  ;;  %v4060_v21 = vld [vmem:[%s6833_s1 + $0x56c] ss:$16 sps:$4 sm:$0xff]  }
 0x431   :  { %2611 = vmatpush1.bf16.msra.mxu0 %v4052_v22  ;;  %v4061_v22 = vld [vmem:[%s6833_s1 + $0x568] ss:$16 sps:$4 sm:$0xff]  }
 0x432   :  { %2612 = vmatprep.subr.bf16.mxu0 %v5686_v33  ;;  %v7346_v33 = vld [vmem:[#allocation2_spill] sm:$0xff] }
 0x435   :  { %2613 = vmatpush1.bf16.msra.mxu0 %v5692_v34  ;;  %v7347_v34 = vld [vmem:[#allocation3_spill] sm:$0xff] }
 0x436   :  { %2614 = vmatprep.subr.bf16.mxu0 %v5698_v43  ;;  %v7348_v43 = vld [vmem:[#allocation4_spill] sm:$0xff] }
 0x439   :  { %2615 = vmatpush1.bf16.msra.mxu0 %v5707_v35  ;;  %v7349_v35 = vld [vmem:[#allocation5_spill] sm:$0xff] }
 0x43a   :  { %2616 = vmatprep.subr.bf16.mxu0 %v5714_v36  ;;  %v7350_v36 = vld [vmem:[#allocation6_spill] sm:$0xff] }
 0x43d   :  { %2617 = vmatpush1.bf16.msra.mxu0 %v5723_v38  ;;  %v7351_v38 = vld [vmem:[#allocation7_spill] sm:$0xff] }
 0x43e   :  { %2618 = vmatprep.subr.bf16.mxu0 %v5730_v39  ;;  %v3834_v39 = vld [vmem:[%s6835_s3 + $0xc0] sm:$0xff]  }
 0x43f   :  { %3389 = vmatpush3.bf16.msra.mxu1 %v3834_v39  ;;  %v4068_v39 = vld [vmem:[%s6833_s1 + $0x5ec] ss:$16 sps:$4 sm:$0xff]  }
 0x440   :  { %3390 = vmatprep.subr.bf16.mxu1 %v7345_v47 }
 0x441   :  { %2619 = vmatpush1.bf16.msra.mxu0 %v5744_v3  ;;  %v3835_v3 = vld [vmem:[%s6835_s3 + $0xc8] sm:$0xff]  }
 0x442   :  { %2631 = vmatprep.subr.bf16.mxu0 %v5756_v53  ;;  %v7352_v53 = vld [vmem:[#allocation8_spill] sm:$0xff] }
 0x443   :  { %3391 = vmatpush3.bf16.msra.mxu1 %v3835_v3  ;;  %v4069_v3 = vld [vmem:[%s6833_s1 + $0x5e8] ss:$16 sps:$4 sm:$0xff]  }
 0x444   :  { %2621 = vmatmul.mubr.bf16.vlgmr.msra.gmra.mrb[20].mxu0 %v6194_v11  ;;  %3392 = vmatprep.subr.bf16.mxu1 %v7345_v47  ;;  %v7357_v11 = vld [vmem:[#allocation13_spill] sm:$0xff] }
 0x445   :  { %2632 = vmatpush1.bf16.msra.mxu0 %v5763_v55  ;;  %2663 = vmatprep.mubr.bf16.mxu0 %v6504_v8  ;;  %v7353_v55 = vld [vmem:[#allocation9_spill] sm:$0xff] }
 0x446   :  { %2633 = vmatprep.subr.bf16.mxu0 %v5770_v57  ;;  %v3836_v57 = vld [vmem:[%s6835_s3 + $0xd0] sm:$0xff]   ;;  %v7361_v8 = vld [vmem:[#allocation17_spill] sm:$0xff] }
 0x447   :  { %3393 = vmatpush3.bf16.msra.mxu1 %v3836_v57 }
 0x448   :  { %3394 = vmatprep.subr.bf16.mxu1 %v7345_v47 }
 0x449   :  { %2634 = vmatpush1.bf16.msra.mxu0 %v5776_v59  ;;  %v7354_v59 = vld [vmem:[#allocation10_spill] sm:$0xff] }
 0x44a   :  { %2635 = vmatprep.subr.bf16.mxu0 %v5782_v61  ;;  %v7355_v61 = vld [vmem:[#allocation11_spill] sm:$0xff] }
 0x44d   :  { %2636 = vmatpush1.bf16.msra.mxu0 %v5788_v63  ;;  %v3837_v63 = vld [vmem:[%s6835_s3 + $0xd8] sm:$0xff]  }
 0x44e   :  { %2637 = vmatprep.subr.bf16.mxu0 %v5794_v1  ;;  %v7356_v1 = vld [vmem:[#allocation12_spill] sm:$0xff]  ;;  %3395 = vmatpush3.bf16.msra.mxu1 %v3837_v63 }
 0x44f   :  { %3396 = vmatprep.subr.bf16.mxu1 %v7345_v47 }
 0x451   :  { %2638 = vmatpush1.bf16.msra.mxu0 %v7346_v33  ;;  %v4062_v33 = vld [vmem:[%s6833_s1 + $0x58c] ss:$16 sps:$4 sm:$0xff]  }
 0x452   :  { %2639 = vmatprep.subr.bf16.mxu0 %v7347_v34  ;;  %3397 = vmatpush3.bf16.msra.mxu1 %v3838_v9  ;;  %v4063_v34 = vld [vmem:[%s6833_s1 + $0x588] ss:$16 sps:$4 sm:$0xff]  }
 0x453   :  { %3398 = vmatprep.subr.bf16.mxu1 %v7345_v47 }
 0x455   :  { %2640 = vmatpush1.bf16.msra.mxu0 %v7348_v43  ;;  %v4064_v43 = vld [vmem:[%s6833_s1 + $0x5ac] ss:$16 sps:$4 sm:$0xff]  }
 0x456   :  { %2641 = vmatprep.subr.bf16.mxu0 %v7349_v35  ;;  %v4065_v35 = vld [vmem:[%s6833_s1 + $0x5a8] ss:$16 sps:$4 sm:$0xff]  }
 0x459   :  { %2642 = vmatpush1.bf16.msra.mxu0 %v7350_v36  ;;  %v4066_v36 = vld [vmem:[%s6833_s1 + $0x5cc] ss:$16 sps:$4 sm:$0xff]  }
 0x45a   :  { %2643 = vmatprep.subr.bf16.mxu0 %v7351_v38  ;;  %v4067_v38 = vld [vmem:[%s6833_s1 + $0x5c8] ss:$16 sps:$4 sm:$0xff]  }
 0x45d   :  { %2644 = vmatpush1.bf16.msra.mxu0 %v7352_v53 }
 0x45e   :  { %2645 = vmatprep.subr.bf16.mxu0 %v7353_v55 }
 0x461   :  { %2646 = vmatpush1.bf16.msra.mxu0 %v7354_v59 }
 0x462   :  { %2647 = vmatprep.subr.bf16.mxu0 %v7355_v61 }
 0x465   :  { %2648 = vmatpush1.bf16.msra.mxu0 %v7356_v1  ;;  %v3839_v1 = vld [vmem:[%s6835_s3 + $0xe8] sm:$0xff]  }
 0x466   :  { %2649 = vmatprep.subr.bf16.mxu0 %v7357_v11  ;;  %3399 = vmatpush3.bf16.msra.mxu1 %v3839_v1 }
 0x467   :  { %3400 = vmatprep.subr.bf16.mxu1 %v7345_v47 }
 0x469   :  { %2650 = vmatpush1.bf16.msra.mxu0 %v7358_v54 }
 0x46a   :  { %2651 = vmatprep.subr.bf16.mxu0 %v7359_v15 }
 0x46d   :  { %2652 = vmatpush1.bf16.msra.mxu0 %v7360_v14 }
 0x46e   :  { %2653 = vmatprep.subr.bf16.mxu0 %v7361_v8 }
 0x471   :  { %2654 = vmatpush1.bf16.msra.mxu0 %v7362_v16 }
 0x472   :  { %2655 = vmatprep.subr.bf16.mxu0 %v7363_v24  ;;  %v4070_v24 = vld [vmem:[%s6836_s2] ss:$0 sm:$0xff] }
 0x475   :  { %2656 = vmatpush1.bf16.msra.mxu0 %v7364_v25 }
 0x476   :  { %2657 = vmatprep.subr.bf16.mxu0 %v7365_v26 }
 0x479   :  { %2658 = vmatpush1.bf16.msra.mxu0 %v7366_v27 }
 0x47a   :  { %2659 = vmatprep.subr.bf16.mxu0 %v7367_v28 }
 0x47d   :  { %2660 = vmatpush1.bf16.msra.mxu0 %v7368_v29 }
 0x47e   :  { %2661 = vmatprep.subr.bf16.mxu0 %v7369_v50 }
 0x481   :  { %2662 = vmatpush1.bf16.msra.mxu0 %v7370_v31  ;;  %v3843_v31 = vld [vmem:[%s6837_s5 + $0x8] sm:$0xff]  }
 0x482   :  { %2674 = vmatprep.subr.bf16.mxu0 %v7371_v19  ;;  %v3844_v19 = vld [vmem:[%s6837_s5 + $0x10] sm:$0xff]  }
 0x484   :  { %2664 = vmatmul.mubr.bf16.vlgmr.msra.gmra.mrb[20].mxu0 %v6509_v12  ;;  %v6708_v12 = vpop.f32.mrb[16].mxu1 }
 0x485   :  { %2675 = vmatpush1.bf16.msra.mxu0 %v7372_v23  ;;  %2706 = vmatprep.mubr.bf16.mxu0 %v6554_v60  ;;  %v6711_v60 = vpop.f32.mrb[17].mxu1  ;;  %v3845_v23 = vld [vmem:[%s6837_s5 + $0x18] sm:$0xff]  }
 0x486   :  { %2676 = vmatprep.subr.bf16.mxu0 %v7373_v37  ;;  %v2717_v41 = vmax.f32 %v6708_v12, %v6711_v60  ;;  %v6715_v4 = vpop.f32.mrb[18].mxu1 }
 0x487   :  { %v6717_v42 = vpop.f32.mrb[19].mxu1 }
 0x488   :  { %v2718_v52 = vmax.f32 %v6715_v4, %v6717_v42 }
 0x489   :  { %2677 = vmatpush1.bf16.msra.mxu0 %v7374_v13  ;;  %v3280_v13 = vld [vmem:[%s6838_s4] ss:$0 sm:$0xff] }
 0x48a   :  { %2678 = vmatprep.subr.bf16.mxu0 %v7375_v32 }
 0x48d   :  { %2679 = vmatpush1.bf16.msra.mxu0 %v7376_v17 }
 0x48e   :  { %2680 = vmatprep.subr.bf16.mxu0 %v7377_v51 }
 0x491   :  { %2681 = vmatpush1.bf16.msra.mxu0 %v7378_v40 }
 0x492   :  { %2682 = vmatprep.subr.bf16.mxu0 %v7379_v6 }
 0x495   :  { %2683 = vmatpush1.bf16.msra.mxu0 %v7380_v44 }
 0x496   :  { %2684 = vmatprep.subr.bf16.mxu0 %v7381_v48 }
 0x499   :  { %2685 = vmatpush1.bf16.msra.mxu0 %v7382_v45 }
 0x49a   :  { %2686 = vmatprep.subr.bf16.mxu0 %v7383_v56 }
 0x49d   :  { %2687 = vmatpush1.bf16.msra.mxu0 %v7384_v58 }
 0x49e   :  { %2688 = vmatprep.subr.bf16.mxu0 %v7385_v62 }
 0x4a1   :  { %2689 = vmatpush1.bf16.msra.mxu0 %v4053_v46 }
 0x4a2   :  { %2690 = vmatprep.subr.bf16.mxu0 %v4054_v0 }
 0x4a5   :  { %2691 = vmatpush1.bf16.msra.mxu0 %v4055_v49 }
 0x4a6   :  { %2692 = vmatprep.subr.bf16.mxu0 %v4056_v2 }
 0x4a9   :  { %2693 = vmatpush1.bf16.msra.mxu0 %v4057_v5 }
 0x4aa   :  { %2694 = vmatprep.subr.bf16.mxu0 %v4058_v7 }
 0x4ad   :  { %2695 = vmatpush1.bf16.msra.mxu0 %v4059_v30 }
 0x4ae   :  { %2696 = vmatprep.subr.bf16.mxu0 %v4060_v21 }
 0x4b1   :  { %2697 = vmatpush1.bf16.msra.mxu0 %v4061_v22 }
 0x4b2   :  { %2698 = vmatprep.subr.bf16.mxu0 %v4062_v33 }
 0x4b5   :  { %2699 = vmatpush1.bf16.msra.mxu0 %v4063_v34 }
 0x4b6   :  { %2700 = vmatprep.subr.bf16.mxu0 %v4064_v43 }
 0x4b9   :  { %2701 = vmatpush1.bf16.msra.mxu0 %v4065_v35 }
 0x4ba   :  { %2702 = vmatprep.subr.bf16.mxu0 %v4066_v36 }
 0x4bd   :  { %2703 = vmatpush1.bf16.msra.mxu0 %v4067_v38 }
 0x4be   :  { %2704 = vmatprep.subr.bf16.mxu0 %v4068_v39 }
 0x4c1   :  { %2705 = vmatpush1.bf16.msra.mxu0 %v4069_v3 }
 0x4c2   :  { %3408 = vmatprep.subr.bf16.mxu0 %v7345_v47 }
 0x4c4   :  { %2707 = vmatmul.mubr.bf16.vlgmr.msra.gmra.mrb[20].mxu0 %v6549_v18  ;;  %v3840_v18 = vld [vmem:[%s6835_s3 + $0xf0] sm:$0xff]  }
 0x4c5   :  { %3416 = vmatprep.mubr.msk.bf16.mxu0 %vm4072_vm0, %v7345_v47  ;;  %3401 = vmatpush3.bf16.msra.mxu1 %v3840_v18 }
 0x4c6   :  { %3402 = vmatprep.subr.bf16.mxu1 %v7345_v47 }
 0x4d7   :  { %v2413_v53 = vpop.f32.mrb[16].mxu0 }
 0x4d8   :  { %v2420_v55 = vadd.f32 %v2413_v53, %v6478_v20  ;;  %v3386_v57 = vpop.f32.mrb[17].mxu0  ;;  %v3841_v20 = vld [vmem:[%s6835_s3 + $0xf8] sm:$0xff]  }
 0x4d9   :  { %v2416_v59 = vpop.f32.mrb[18].mxu0  ;;  %3403 = vmatpush3.bf16.msra.mxu1 %v3841_v20 }
 0x4da   :  { %v2421_v61 = vadd.f32 %v2416_v59, %v6487_v10  ;;  %v3387_v63 = vpop.f32.mrb[19].mxu0  ;;  %v3842_v10 = vld [vmem:[%s6837_s5] sm:$0xff]  }
 0x4db   :  { %3409 = vmatpush3.bf16.msra.mxu0 %v3842_v10 }
 0x4dc   :  { %3410 = vmatprep.subr.bf16.mxu0 %v7345_v47 }
 0x4df   :  { %3411 = vmatpush3.bf16.msra.mxu0 %v3843_v31 }
 0x4e0   :  { %3412 = vmatprep.subr.bf16.mxu0 %v7345_v47 }
 0x4e3   :  { %3413 = vmatpush3.bf16.msra.mxu0 %v3844_v19 }
 0x4e4   :  { %3414 = vmatprep.subr.bf16.mxu0 %v7345_v47 }
 0x4e7   :  { %3415 = vmatpush3.bf16.msra.mxu0 %v3845_v23 }
 0x597   :  { %v2708_v11 = vpop.f32.mrb[20].mxu0 }
 0x598   :  { %v2710_v9 = vpop.f32.mrb[21].mxu0 }
 0x599   :  { %v2719_v54 = vmax.f32 %v2708_v11, %v2710_v9  ;;  %v2712_v15 = vpop.f32.mrb[22].mxu0 }
 0x59a   :  { %v2714_v14 = vpop.f32.mrb[23].mxu0 }
 0x59b   :  { %v2721_v8 = vmax.f32 %v2717_v41, %v2719_v54  ;;  %v2720_v16 = vmax.f32 %v2712_v15, %v2714_v14  ;;  %v3281_v41 = vld [vmem:[%s6839_s6] ss:$0 sm:$0xff] }
 0x59d   :  { %v2723_v25 = vadd.f32 %v4070_v24, %v2721_v8  ;;  %v2722_v26 = vmax.f32 %v2718_v52, %v2720_v16 }
 0x59f   :  { %v2724_v27 = vadd.f32 %v4070_v24, %v2722_v26  ;;  %v2725_v28 = vmax.f32 %v2723_v25, 0.0 }
 0x5a1   :  { %v2726_v29 = vmax.f32 %v2724_v27, 0.0 }
 0x5a3   :  { %v2727_v50 = vpack.c.bf16 %v2726_v29, %v2725_v28 }
 0x5a5   :  { %3405 = vmatmul.mubr.bf16.vlgmr.msra.gmra.mrb[20].mxu1 %v2727_v50 }
 0x678   :  { %v2827_v37 = vpop.f32.mrb[20].mxu1 }
 0x679   :  { %v2834_v32 = vadd.f32 %v2827_v37, %v2420_v55  ;;  %v3406_v17 = vpop.f32.mrb[21].mxu1 }
 0x67a   :  { %v2830_v51 = vpop.f32.mrb[22].mxu1 }
 0x67b   :  { %v2843_v40 = vadd.f32 %v3280_v13, %v2834_v32  ;;  %v2835_v6 = vadd.f32 %v2830_v51, %v2421_v61  ;;  %v3407_v44 = vpop.f32.mrb[23].mxu1 }
 0x67d   :  { %v2844_v12 = vadd.f32 %v3280_v13, %v2835_v6  ;;  %v2845_v48 = vmax.f32 %v2843_v40, 0.0 }
 0x67f   :  { %v2846_v60 = vmax.f32 %v2844_v12, 0.0 }
 0x681   :  { %v2847_v47 = vpack.c.bf16 %v2846_v60, %v2845_v48 }
 0x683   :  { %3417 = vmatmul.mubr.msk.bf16.vlgmr.msra.gmra.mrb[24].mxu0 %vm2887_vm1, %v2847_v47 }
 0x756   :  { %v2925_v4 = vpop.f32.mrb[24].mxu0 }
 0x757   :  { %v2926_v42 = vadd.f32 %v3281_v41, %v2925_v4  ;;  %v3418_v45 = vpop.f32.mrb[25].mxu0 }
 0x758   :  { %v2928_v52 = vpop.f32.mrb[26].mxu0 }
 0x759   :  { %v2929_v56 = vadd.f32 %v3281_v41, %v2928_v52  ;;  %v3419_v58 = vpop.f32.mrb[27].mxu0  ;;  %v2933_v62 = vsel %vm2932_vm2, %v2926_v42, -inf }
 0x75a   :  { %2934 = vmax.xlane.f32.xlu0 %v2933_v62 }
 0x75b   :  { %v2936_v46 = vsel %vm2932_vm2, %v2929_v56, -inf }
 0x75e   :  { %2937 = vmax.xlane.f32.xlu0 %v2936_v46 }
 0x7e7   :  { %v2935_v0 = vpop.xlane.xlu0 %2934 }
 0x7e8   :  { %v2939_v49 = vsub.f32 %v2926_v42, %v2935_v0 }
 0x7ea   :  { %v2941_v2 = vmul.f32 1.442695, %v2939_v49 }
 0x7eb   :  { %v2938_v5 = vpop.xlane.xlu0 %2937 }
 0x7ec   :  { %3846 = vpow2.f32 %v2941_v2  ;;  %v2940_v7 = vsub.f32 %v2929_v56, %v2938_v5 }
 0x7ee   :  { %v2943_v30 = vmul.f32 1.442695, %v2940_v7 }
 0x7f0   :  { %3848 = vpow2.f32 %v2943_v30 }
 0x7f6   :  { %v3847_v21 = vpop.eup %3846 }
 0x7f7   :  { %v2945_v22 = vsel %vm2932_vm2, %v3847_v21, 0.0 }
 0x7f8   :  { %2946 = vadd.xlane.f32.xlu1 %v2945_v22 }
 0x7fa   :  { %v3849_v33 = vpop.eup %3848 }
 0x7fb   :  { %v2948_v34 = vsel %vm2932_vm2, %v3849_v33, 0.0 }
 0x7fc   :  { %2949 = vadd.xlane.f32.xlu1 %v2948_v34 }
 0x885   :  { %v2947_v43 = vpop.xlane.xlu1 %2946 }
 0x886   :  { %3850 = vlog2.f32 %v2947_v43 }
 0x889   :  { %v2950_v35 = vpop.xlane.xlu1 %2949 }
 0x88a   :  { %3852 = vlog2.f32 %v2950_v35 }
 0x890   :  { %v3851_v36 = vpop.eup %3850 }
 0x891   :  { %v2952_v38 = vmul.f32 0.6931472, %v3851_v36 }
 0x893   :  { %v2955_v39 = vadd.f32 %v2952_v38, %v2935_v0 }
 0x894   :  { %v3853_v3 = vpop.eup %3852 }
 0x895   :  { %v2957_v53 = vsub.f32 %v2926_v42, %v2955_v39  ;;  %v2954_v55 = vmul.f32 0.6931472, %v3853_v3 }
 0x897   :  { %2959 = vst [vmem:[%s6840_s7] sm:$0xff] %v2957_v53  ;;  %v2956_v57 = vadd.f32 %v2954_v55, %v2938_v5 }
 0x899   :  { %v2958_v59 = vsub.f32 %v2929_v56, %v2956_v57 }
 0x89b   :  { %2960 = vst [vmem:[%s6840_s7 + $0x8] sm:$0xff] %v2958_v59 }

</bundles_post_ra>
